<compile_context>
chip_gen: v7x
topology: tpu7x:2x2x1
jax: 0.10.0
libtpu: 0.0.40
codegen_flags: <defaults>
</compile_context>

<pallas_src>
import functools
import math

import jax
import jax.numpy as jnp
from jax.experimental import pallas as pl
from jax.experimental.pallas import tpu as pltpu

D_MODEL = 32
N_HEADS = 2
D_HEAD = D_MODEL // N_HEADS
D_FFN = 64
N_LAYERS = 2
EPS = 1e-5
NEG_INF = -1e9


# ----------------------------- fused kernel ----------------------------------

def _fused_decoder_kernel(
    # activations / masks
    memory_ref, trg_ref, bert_ref, src_mask_ref, trg_mask_ref,
    # self-attention: fused QKV + output proj
    w_sqkv_ref, b_sqkv_ref, w_so_ref, b_so_ref,
    # cross-attention queries (enc | bert), fused
    w_xq_ref, b_xq_ref,
    # enc / bert K|V (fused) -- loop invariant
    w_ekv_ref, b_ekv_ref, w_bkv_ref, b_bkv_ref,
    # enc / bert output projections
    w_eo_ref, b_eo_ref, w_bo_ref, b_bo_ref,
    # layernorms
    ln1_g_ref, ln1_b_ref, ln2_g_ref, ln2_b_ref, ln3_g_ref, ln3_b_ref,
    # ffn
    ffn_w1_ref, ffn_b1_ref, ffn_w2_ref, ffn_b2_ref,
    # outputs: decoded trg, then per-head enc-attention probabilities
    out_ref, *attn_refs,
    n_layers, n_heads):
  B, Tt, D = trg_ref.shape
  Ts = memory_ref.shape[1]
  Dh = D // n_heads
  scale = 1.0 / math.sqrt(Dh)

  def layernorm(x, g_ref, b_ref):
    mean = jnp.mean(x, axis=-1, keepdims=True)
    var = jnp.mean((x - mean) ** 2, axis=-1, keepdims=True)
    return (x - mean) * jax.lax.rsqrt(var + EPS) * g_ref[...] + b_ref[...]

  def mha(q2d, k2d, v2d, mask3d, Tq, Tk, w_o_ref, b_o_ref, return_attn=False):
    # q2d: (B*Tq, H*Dh); k2d, v2d: (B*Tk, H*Dh); mask3d: (B, Tq, Tk)
    out = None
    probs = []
    for h in range(n_heads):
      sl = slice(h * Dh, (h + 1) * Dh)
      qh = q2d[:, sl].reshape(B, Tq, Dh)
      kh = k2d[:, sl].reshape(B, Tk, Dh)
      vh = v2d[:, sl].reshape(B, Tk, Dh)
      s = jax.lax.dot_general(qh, kh, (((2,), (2,)), ((0,), (0,))),
                              preferred_element_type=jnp.float32) * scale
      s = jnp.where(mask3d > 0, s, NEG_INF)       # masked_fill(mask == 0, -1e9)
      s = s - jnp.max(s, axis=-1, keepdims=True)  # stable softmax
      p = jnp.exp(s)
      p = p * pl.reciprocal(jnp.sum(p, axis=-1, keepdims=True), approx=False)
      if return_attn:
        probs.append(p)
      ctx = jax.lax.dot_general(p, vh, (((2,), (1,)), ((0,), (0,))),
                                preferred_element_type=jnp.float32)
      ctx = ctx.reshape(B * Tq, Dh)
      # merge-heads + output projection == sum_h ctx_h @ Wo[h*Dh:(h+1)*Dh, :]
      contrib = jnp.dot(ctx, w_o_ref[sl, :], preferred_element_type=jnp.float32)
      out = contrib if out is None else out + contrib
    out = out + b_o_ref[...]
    if return_attn:
      return out, tuple(probs)
    return out

  # ---- loop-invariant work: cross-attention K/V and broadcast masks ----------
  mem2d = memory_ref[...].reshape(B * Ts, D)
  bert2d = bert_ref[...].reshape(B * Ts, D)
  enc_kv = jnp.dot(mem2d, w_ekv_ref[...],
                   preferred_element_type=jnp.float32) + b_ekv_ref[...]
  bert_kv = jnp.dot(bert2d, w_bkv_ref[...],
                    preferred_element_type=jnp.float32) + b_bkv_ref[...]
  k_enc, v_enc = enc_kv[:, :D], enc_kv[:, D:]
  k_bert, v_bert = bert_kv[:, :D], bert_kv[:, D:]

  trg_mask3 = trg_mask_ref[...]                                      # (B,Tt,Tt)
  src_mask3 = jnp.broadcast_to(src_mask_ref[...][:, None, :], (B, Tt, Ts))

  # ---- one (weight-shared) decoder layer -------------------------------------
  def layer(x2d):
    # 1) masked self-attention
    sqkv = jnp.dot(x2d, w_sqkv_ref[...],
                   preferred_element_type=jnp.float32) + b_sqkv_ref[...]
    sa = mha(sqkv[:, :D], sqkv[:, D:2 * D], sqkv[:, 2 * D:],
             trg_mask3, Tt, Tt, w_so_ref, b_so_ref)
    x1 = layernorm(x2d + sa, ln1_g_ref, ln1_b_ref)
    # 2) enc-dec attention + BERT attention (averaged)
    xq = jnp.dot(x1, w_xq_ref[...],
                 preferred_element_type=jnp.float32) + b_xq_ref[...]
    e_out, attn_probs = mha(xq[:, :D], k_enc, v_enc, src_mask3, Tt, Ts,
                            w_eo_ref, b_eo_ref, return_attn=True)
    b_out = mha(xq[:, D:], k_bert, v_bert, src_mask3, Tt, Ts,
                w_bo_ref, b_bo_ref)
    x2 = layernorm(x1 + 0.5 * (e_out + b_out), ln2_g_ref, ln2_b_ref)
    # 3) position-wise feed-forward
    hdn = jnp.maximum(
        jnp.dot(x2, ffn_w1_ref[...],
                preferred_element_type=jnp.float32) + ffn_b1_ref[...], 0.0)
    ff = jnp.dot(hdn, ffn_w2_ref[...],
                 preferred_element_type=jnp.float32) + ffn_b2_ref[...]
    x3 = layernorm(x2 + ff, ln3_g_ref, ln3_b_ref)
    return x3, attn_probs

  def body(_, carry):
    x2d, _attn = carry
    return layer(x2d)

  x0 = trg_ref[...].reshape(B * Tt, D)
  attn0 = tuple(jnp.zeros((B, Tt, Ts), jnp.float32) for _ in range(n_heads))
  x_fin, attn_fin = jax.lax.fori_loop(0, n_layers, body, (x0, attn0),
                                      unroll=True)

  out_ref[...] = x_fin.reshape(B, Tt, D)
  for h, a_ref in enumerate(attn_refs):
    a_ref[...] = attn_fin[h]


# ------------------------------- wrapper --------------------------------------

def decoder_pallas(params, memory, trg, bert_out, src_mask, trg_mask,
                   n_layers=N_LAYERS):
  B, Tt, D = trg.shape
  Ts = memory.shape[1]
  H = N_HEADS

  p = params
  sa, ea, ba = p["self_attn"], p["enc_attn"], p["bert_attn"]

  def cat_w(*ws):
    return jnp.concatenate(ws, axis=1)

  def cat_b(*bs):
    return jnp.concatenate(bs, axis=0).reshape(1, -1)

  def row(v):
    return v.reshape(1, -1)

  inputs = [
      memory, trg, bert_out,
      src_mask[:, 0, 0, :].astype(jnp.float32),       # (B, Ts)
      trg_mask[:, 0].astype(jnp.float32),             # (B, Tt, Tt)
      cat_w(sa["wq"], sa["wk"], sa["wv"]), cat_b(sa["bq"], sa["bk"], sa["bv"]),
      sa["wo"], row(sa["bo"]),
      cat_w(ea["wq"], ba["wq"]), cat_b(ea["bq"], ba["bq"]),
      cat_w(ea["wk"], ea["wv"]), cat_b(ea["bk"], ea["bv"]),
      cat_w(ba["wk"], ba["wv"]), cat_b(ba["bk"], ba["bv"]),
      ea["wo"], row(ea["bo"]), ba["wo"], row(ba["bo"]),
      row(p["ln1_g"]), row(p["ln1_b"]),
      row(p["ln2_g"]), row(p["ln2_b"]),
      row(p["ln3_g"]), row(p["ln3_b"]),
      p["ffn_w1"], row(p["ffn_b1"]), p["ffn_w2"], row(p["ffn_b2"]),
  ]

  vmem_spec = pl.BlockSpec(memory_space=pltpu.MemorySpace.VMEM)
  out_shapes = (jax.ShapeDtypeStruct((B, Tt, D), jnp.float32),) + tuple(
      jax.ShapeDtypeStruct((B, Tt, Ts), jnp.float32) for _ in range(H))

  results = pl.pallas_call(
      functools.partial(_fused_decoder_kernel, n_layers=n_layers, n_heads=H),
      in_specs=[vmem_spec] * len(inputs),
      out_specs=tuple(vmem_spec for _ in range(1 + H)),
      out_shape=out_shapes,
      compiler_params=pltpu.CompilerParams(
          vmem_limit_bytes=32 * 1024 * 1024),
  )(*inputs)

  out = results[0]
  attn = jnp.stack(results[1:], axis=1)               # (B, H, Tt, Ts)
  return out, attn


# ------------------------ pure-JAX reference ----------------------------------

def _ref_layernorm(x, g, b):
  mean = jnp.mean(x, axis=-1, keepdims=True)
  var = jnp.mean((x - mean) ** 2, axis=-1, keepdims=True)
  return (x - mean) * jax.lax.rsqrt(var + EPS) * g + b


def _ref_mha(p, q_in, k_in, v_in, mask):
  B, Tq, D = q_in.shape
  Tk = k_in.shape[1]

  def split(x, T):
    return x.reshape(B, T, N_HEADS, D_HEAD).transpose(0, 2, 1, 3)

  q = split(q_in @ p["wq"] + p["bq"], Tq)
  k = split(k_in @ p["wk"] + p["bk"], Tk)
  v = split(v_in @ p["wv"] + p["bv"], Tk)
  scale = 1.0 / math.sqrt(D_HEAD)
  s = jnp.einsum("bhqd,bhkd->bhqk", q, k) * scale
  mask_b = jnp.broadcast_to(mask[:, 0].astype(jnp.float32)[:, None],
                            (B, N_HEADS, Tq, Tk))
  s = jnp.where(mask_b > 0, s, NEG_INF)
  s = s - jnp.max(s, axis=-1, keepdims=True)
  pr = jnp.exp(s)
  pr = pr / jnp.sum(pr, axis=-1, keepdims=True)
  out = jnp.einsum("bhqk,bhkd->bhqd", pr, v)
  out = out.transpose(0, 2, 1, 3).reshape(B, Tq, D)
  return out @ p["wo"] + p["bo"], pr


def decoder_reference(p, memory, trg, bert_out, src_mask, trg_mask,
                      n_layers=N_LAYERS):
  x = trg
  attn = None
  for _ in range(n_layers):
    sa, _ = _ref_mha(p["self_attn"], x, x, x, trg_mask)
    x1 = _ref_layernorm(x + sa, p["ln1_g"], p["ln1_b"])
    e, attn = _ref_mha(p["enc_attn"], x1, memory, memory, src_mask)
    b, _ = _ref_mha(p["bert_attn"], x1, bert_out, bert_out, src_mask)
    x2 = _ref_layernorm(x1 + 0.5 * (e + b), p["ln2_g"], p["ln2_b"])
    h = jnp.maximum(x2 @ p["ffn_w1"] + p["ffn_b1"], 0.0)
    ff = h @ p["ffn_w2"] + p["ffn_b2"]
    x = _ref_layernorm(x2 + ff, p["ln3_g"], p["ln3_b"])
  return x, attn


# ------------------------------ parameters -------------------------------------

def init_params(key):
  def dense(k, fan_in, fan_out):
    kw, kb = jax.random.split(k)
    lim = 1.0 / math.sqrt(fan_in)
    w = jax.random.uniform(kw, (fan_in, fan_out), jnp.float32, -lim, lim)
    b = jax.random.uniform(kb, (fan_out,), jnp.float32, -lim, lim)
    return w, b

  def mha_params(k):
    ks = jax.random.split(k, 4)
    p = {}
    for name, kk in zip(("q", "k", "v", "o"), ks):
      w, b = dense(kk, D_MODEL, D_MODEL)
      p["w" + name] = w
      p["b" + name] = b
    return p

  ks = jax.random.split(key, 5)
  params = {
      "self_attn": mha_params(ks[0]),
      "enc_attn": mha_params(ks[1]),
      "bert_attn": mha_params(ks[2]),
      "ln1_g": jnp.ones((D_MODEL,), jnp.float32),
      "ln1_b": jnp.zeros((D_MODEL,), jnp.float32),
      "ln2_g": jnp.ones((D_MODEL,), jnp.float32),
      "ln2_b": jnp.zeros((D_MODEL,), jnp.float32),
      "ln3_g": jnp.ones((D_MODEL,), jnp.float32),
      "ln3_b": jnp.zeros((D_MODEL,), jnp.float32),
  }
  w1, b1 = dense(ks[3], D_MODEL, D_FFN)
  w2, b2 = dense(ks[4], D_FFN, D_MODEL)
  params.update(ffn_w1=w1, ffn_b1=b1, ffn_w2=w2, ffn_b2=b2)
  return params


# --------------------------------- main ----------------------------------------

if __name__ == "__main__":
  B, Tt, Ts = 2, 8, 8
  key = jax.random.PRNGKey(0)
  pkey, k1, k2, k3 = jax.random.split(key, 4)

  params = init_params(pkey)
  memory = jax.random.normal(k1, (B, Ts, D_MODEL), jnp.float32)
  trg = jax.random.normal(k2, (B, Tt, D_MODEL), jnp.float32)
  bert_out = jax.random.normal(k3, (B, Ts, D_MODEL), jnp.float32)

  # src_mask: padding mask (mask out the last 2 source tokens of batch 1)
  src_mask = jnp.ones((B, 1, 1, Ts), jnp.float32)
  src_mask = src_mask.at[1, 0, 0, -2:].set(0.0)
  # trg_mask: causal mask
  trg_mask = jnp.broadcast_to(jnp.tril(jnp.ones((Tt, Tt), jnp.float32)),
                              (B, 1, Tt, Tt))

  out, attn = jax.jit(decoder_pallas)(params, memory, trg, bert_out,
                                      src_mask, trg_mask)
  out, attn = jax.block_until_ready((out, attn))

  ref_out, ref_attn = decoder_reference(params, memory, trg, bert_out,
                                        src_mask, trg_mask)

  assert out.shape == (B, Tt, D_MODEL)
  assert attn.shape == (B, N_HEADS, Tt, Ts)
  assert bool(jnp.all(jnp.isfinite(out)))
  assert jnp.allclose(out, ref_out, atol=1e-3, rtol=1e-3)
  assert jnp.allclose(attn, ref_attn, atol=1e-3, rtol=1e-3)

  print("KERNEL_OK")
</pallas_src>

<mosaic_0001>
module attributes {stable_mosaic.version = 11 : i64} {
  func.func @_fused_decoder_kernel(%arg0: memref<2x8x32xf32, #tpu.memory_space<vmem>>, %arg1: memref<2x8x32xf32, #tpu.memory_space<vmem>>, %arg2: memref<2x8x32xf32, #tpu.memory_space<vmem>>, %arg3: memref<2x8xf32, #tpu.memory_space<vmem>>, %arg4: memref<2x8x8xf32, #tpu.memory_space<vmem>>, %arg5: memref<32x96xf32, #tpu.memory_space<vmem>>, %arg6: memref<1x96xf32, #tpu.memory_space<vmem>>, %arg7: memref<32x32xf32, #tpu.memory_space<vmem>>, %arg8: memref<1x32xf32, #tpu.memory_space<vmem>>, %arg9: memref<32x64xf32, #tpu.memory_space<vmem>>, %arg10: memref<1x64xf32, #tpu.memory_space<vmem>>, %arg11: memref<32x64xf32, #tpu.memory_space<vmem>>, %arg12: memref<1x64xf32, #tpu.memory_space<vmem>>, %arg13: memref<32x64xf32, #tpu.memory_space<vmem>>, %arg14: memref<1x64xf32, #tpu.memory_space<vmem>>, %arg15: memref<32x32xf32, #tpu.memory_space<vmem>>, %arg16: memref<1x32xf32, #tpu.memory_space<vmem>>, %arg17: memref<32x32xf32, #tpu.memory_space<vmem>>, %arg18: memref<1x32xf32, #tpu.memory_space<vmem>>, %arg19: memref<1x32xf32, #tpu.memory_space<vmem>>, %arg20: memref<1x32xf32, #tpu.memory_space<vmem>>, %arg21: memref<1x32xf32, #tpu.memory_space<vmem>>, %arg22: memref<1x32xf32, #tpu.memory_space<vmem>>, %arg23: memref<1x32xf32, #tpu.memory_space<vmem>>, %arg24: memref<1x32xf32, #tpu.memory_space<vmem>>, %arg25: memref<32x64xf32, #tpu.memory_space<vmem>>, %arg26: memref<1x64xf32, #tpu.memory_space<vmem>>, %arg27: memref<64x32xf32, #tpu.memory_space<vmem>>, %arg28: memref<1x32xf32, #tpu.memory_space<vmem>>, %arg29: memref<2x8x32xf32, #tpu.memory_space<vmem>>, %arg30: memref<2x8x8xf32, #tpu.memory_space<vmem>>, %arg31: memref<2x8x8xf32, #tpu.memory_space<vmem>>) attributes {dimension_semantics = [], scalar_prefetch = 0 : i64, scratch_operands = 0 : i64, tpu.core_type = #tpu.core_type<tc>} {
    %c0 = arith.constant 0 : index
    %c0_0 = arith.constant 0 : index
    %c0_1 = arith.constant 0 : index
    %0 = vector.load %arg0[%c0, %c0_0, %c0_1] : memref<2x8x32xf32, #tpu.memory_space<vmem>>, vector<2x8x32xf32>
    %1 = vector.shape_cast %0 : vector<2x8x32xf32> to vector<16x32xf32>
    %c0_2 = arith.constant 0 : index
    %c0_3 = arith.constant 0 : index
    %c0_4 = arith.constant 0 : index
    %2 = vector.load %arg2[%c0_2, %c0_3, %c0_4] : memref<2x8x32xf32, #tpu.memory_space<vmem>>, vector<2x8x32xf32>
    %3 = vector.shape_cast %2 : vector<2x8x32xf32> to vector<16x32xf32>
    %c0_5 = arith.constant 0 : index
    %c0_6 = arith.constant 0 : index
    %4 = vector.load %arg11[%c0_5, %c0_6] : memref<32x64xf32, #tpu.memory_space<vmem>>, vector<32x64xf32>
    %cst = arith.constant dense<0.000000e+00> : vector<16x64xf32>
    %5 = tpu.matmul %1, %4, %cst {dimension_numbers = #tpu.dot_dimension_numbers<[1], [0], [0], [1], [0, 0, 1, 1], [], []>} : vector<16x32xf32>, vector<32x64xf32>, vector<16x64xf32> -> vector<16x64xf32>
    %c0_7 = arith.constant 0 : index
    %c0_8 = arith.constant 0 : index
    %6 = vector.load %arg12[%c0_7, %c0_8] : memref<1x64xf32, #tpu.memory_space<vmem>>, vector<1x64xf32>
    %7 = vector.broadcast %6 : vector<1x64xf32> to vector<16x64xf32>
    %8 = arith.addf %5, %7 : vector<16x64xf32>
    %c0_9 = arith.constant 0 : index
    %c0_10 = arith.constant 0 : index
    %9 = vector.load %arg13[%c0_9, %c0_10] : memref<32x64xf32, #tpu.memory_space<vmem>>, vector<32x64xf32>
    %cst_11 = arith.constant dense<0.000000e+00> : vector<16x64xf32>
    %10 = tpu.matmul %3, %9, %cst_11 {dimension_numbers = #tpu.dot_dimension_numbers<[1], [0], [0], [1], [0, 0, 1, 1], [], []>} : vector<16x32xf32>, vector<32x64xf32>, vector<16x64xf32> -> vector<16x64xf32>
    %c0_12 = arith.constant 0 : index
    %c0_13 = arith.constant 0 : index
    %11 = vector.load %arg14[%c0_12, %c0_13] : memref<1x64xf32, #tpu.memory_space<vmem>>, vector<1x64xf32>
    %12 = vector.broadcast %11 : vector<1x64xf32> to vector<16x64xf32>
    %13 = arith.addf %10, %12 : vector<16x64xf32>
    %14 = vector.extract_strided_slice %8 {offsets = [0, 0], sizes = [16, 32], strides = [1, 1]} : vector<16x64xf32> to vector<16x32xf32>
    %15 = vector.extract_strided_slice %8 {offsets = [0, 32], sizes = [16, 32], strides = [1, 1]} : vector<16x64xf32> to vector<16x32xf32>
    %16 = vector.extract_strided_slice %13 {offsets = [0, 0], sizes = [16, 32], strides = [1, 1]} : vector<16x64xf32> to vector<16x32xf32>
    %17 = vector.extract_strided_slice %13 {offsets = [0, 32], sizes = [16, 32], strides = [1, 1]} : vector<16x64xf32> to vector<16x32xf32>
    %c0_14 = arith.constant 0 : index
    %c0_15 = arith.constant 0 : index
    %c0_16 = arith.constant 0 : index
    %18 = vector.load %arg4[%c0_14, %c0_15, %c0_16] : memref<2x8x8xf32, #tpu.memory_space<vmem>>, vector<2x8x8xf32>
    %c0_17 = arith.constant 0 : index
    %c0_18 = arith.constant 0 : index
    %19 = vector.load %arg3[%c0_17, %c0_18] : memref<2x8xf32, #tpu.memory_space<vmem>>, vector<2x8xf32>
    %20 = vector.shape_cast %19 : vector<2x8xf32> to vector<2x1x8xf32>
    %21 = vector.shape_cast %20 : vector<2x1x8xf32> to vector<2x1x8xf32>
    %22 = vector.broadcast %21 : vector<2x1x8xf32> to vector<2x8x8xf32>
    %c0_19 = arith.constant 0 : index
    %c0_20 = arith.constant 0 : index
    %c0_21 = arith.constant 0 : index
    %23 = vector.load %arg1[%c0_19, %c0_20, %c0_21] : memref<2x8x32xf32, #tpu.memory_space<vmem>>, vector<2x8x32xf32>
    %24 = vector.shape_cast %23 : vector<2x8x32xf32> to vector<16x32xf32>
    %cst_22 = arith.constant 0.000000e+00 : f32
    %25 = vector.broadcast %cst_22 : f32 to vector<2x8x8xf32>
    %cst_23 = arith.constant 0.000000e+00 : f32
    %26 = vector.broadcast %cst_23 : f32 to vector<2x8x8xf32>
    %c0_i32 = arith.constant 0 : i32
    %c0_24 = arith.constant 0 : index
    %c0_25 = arith.constant 0 : index
    %27 = vector.load %arg5[%c0_24, %c0_25] : memref<32x96xf32, #tpu.memory_space<vmem>>, vector<32x96xf32>
    %cst_26 = arith.constant dense<0.000000e+00> : vector<16x96xf32>
    %28 = tpu.matmul %24, %27, %cst_26 {dimension_numbers = #tpu.dot_dimension_numbers<[1], [0], [0], [1], [0, 0, 1, 1], [], []>} : vector<16x32xf32>, vector<32x96xf32>, vector<16x96xf32> -> vector<16x96xf32>
    %c0_27 = arith.constant 0 : index
    %c0_28 = arith.constant 0 : index
    %29 = vector.load %arg6[%c0_27, %c0_28] : memref<1x96xf32, #tpu.memory_space<vmem>>, vector<1x96xf32>
    %30 = vector.broadcast %29 : vector<1x96xf32> to vector<16x96xf32>
    %31 = arith.addf %28, %30 : vector<16x96xf32>
    %32 = vector.extract_strided_slice %31 {offsets = [0, 0], sizes = [16, 32], strides = [1, 1]} : vector<16x96xf32> to vector<16x32xf32>
    %33 = vector.extract_strided_slice %31 {offsets = [0, 32], sizes = [16, 32], strides = [1, 1]} : vector<16x96xf32> to vector<16x32xf32>
    %34 = vector.extract_strided_slice %31 {offsets = [0, 64], sizes = [16, 32], strides = [1, 1]} : vector<16x96xf32> to vector<16x32xf32>
    %35 = vector.extract_strided_slice %32 {offsets = [0, 0], sizes = [16, 16], strides = [1, 1]} : vector<16x32xf32> to vector<16x16xf32>
    %36 = vector.shape_cast %35 : vector<16x16xf32> to vector<2x8x16xf32>
    %37 = vector.extract_strided_slice %33 {offsets = [0, 0], sizes = [16, 16], strides = [1, 1]} : vector<16x32xf32> to vector<16x16xf32>
    %38 = vector.shape_cast %37 : vector<16x16xf32> to vector<2x8x16xf32>
    %39 = vector.extract_strided_slice %34 {offsets = [0, 0], sizes = [16, 16], strides = [1, 1]} : vector<16x32xf32> to vector<16x16xf32>
    %40 = vector.shape_cast %39 : vector<16x16xf32> to vector<2x8x16xf32>
    %cst_29 = arith.constant dense<0.000000e+00> : vector<2x8x8xf32>
    %41 = tpu.matmul %36, %38, %cst_29 {dimension_numbers = #tpu.dot_dimension_numbers<[2], [2], [1], [1], [0, 0, 0, 1, 1, 1], [0], [0]>} : vector<2x8x16xf32>, vector<2x8x16xf32>, vector<2x8x8xf32> -> vector<2x8x8xf32>
    %cst_30 = arith.constant 2.500000e-01 : f32
    %42 = vector.broadcast %cst_30 : f32 to vector<2x8x8xf32>
    %43 = arith.mulf %41, %42 : vector<2x8x8xf32>
    %cst_31 = arith.constant 0.000000e+00 : f32
    %44 = vector.broadcast %cst_31 : f32 to vector<2x8x8xf32>
    %45 = arith.cmpf ogt, %18, %44 : vector<2x8x8xf32>
    %cst_32 = arith.constant -1.000000e+09 : f32
    %46 = vector.broadcast %cst_32 : f32 to vector<2x8x8xf32>
    %47 = arith.select %45, %43, %46 : vector<2x8x8xi1>, vector<2x8x8xf32>
    %cst_33 = arith.constant dense<0xFF800000> : vector<2x8xf32>
    %48 = vector.multi_reduction <maximumf>, %47, %cst_33 [2] : vector<2x8x8xf32> to vector<2x8xf32>
    %49 = vector.shape_cast %48 : vector<2x8xf32> to vector<2x8x1xf32>
    %50 = vector.broadcast %49 : vector<2x8x1xf32> to vector<2x8x8xf32>
    %51 = arith.subf %47, %50 : vector<2x8x8xf32>
    %52 = math.exp %51 : vector<2x8x8xf32>
    %cst_34 = arith.constant dense<0.000000e+00> : vector<2x8xf32>
    %53 = vector.multi_reduction <add>, %52, %cst_34 [2] : vector<2x8x8xf32> to vector<2x8xf32>
    %54 = vector.shape_cast %53 : vector<2x8xf32> to vector<2x8x1xf32>
    %55 = tpu.reciprocal %54 : vector<2x8x1xf32> -> vector<2x8x1xf32>
    %56 = vector.broadcast %55 : vector<2x8x1xf32> to vector<2x8x8xf32>
    %57 = arith.mulf %52, %56 : vector<2x8x8xf32>
    %cst_35 = arith.constant dense<0.000000e+00> : vector<2x8x16xf32>
    %58 = tpu.matmul %57, %40, %cst_35 {dimension_numbers = #tpu.dot_dimension_numbers<[2], [1], [1], [2], [0, 0, 0, 1, 1, 2], [0], [0]>} : vector<2x8x8xf32>, vector<2x8x16xf32>, vector<2x8x16xf32> -> vector<2x8x16xf32>
    %59 = vector.shape_cast %58 : vector<2x8x16xf32> to vector<16x16xf32>
    %c0_36 = arith.constant 0 : index
    %c0_37 = arith.constant 0 : index
    %60 = vector.load %arg7[%c0_36, %c0_37] : memref<32x32xf32, #tpu.memory_space<vmem>>, vector<16x32xf32>
    %cst_38 = arith.constant dense<0.000000e+00> : vector<16x32xf32>
    %61 = tpu.matmul %59, %60, %cst_38 {dimension_numbers = #tpu.dot_dimension_numbers<[1], [0], [0], [1], [0, 0, 1, 1], [], []>} : vector<16x16xf32>, vector<16x32xf32>, vector<16x32xf32> -> vector<16x32xf32>
    %62 = vector.extract_strided_slice %32 {offsets = [0, 16], sizes = [16, 16], strides = [1, 1]} : vector<16x32xf32> to vector<16x16xf32>
    %63 = vector.shape_cast %62 : vector<16x16xf32> to vector<2x8x16xf32>
    %64 = vector.extract_strided_slice %33 {offsets = [0, 16], sizes = [16, 16], strides = [1, 1]} : vector<16x32xf32> to vector<16x16xf32>
    %65 = vector.shape_cast %64 : vector<16x16xf32> to vector<2x8x16xf32>
    %66 = vector.extract_strided_slice %34 {offsets = [0, 16], sizes = [16, 16], strides = [1, 1]} : vector<16x32xf32> to vector<16x16xf32>
    %67 = vector.shape_cast %66 : vector<16x16xf32> to vector<2x8x16xf32>
    %cst_39 = arith.constant dense<0.000000e+00> : vector<2x8x8xf32>
    %68 = tpu.matmul %63, %65, %cst_39 {dimension_numbers = #tpu.dot_dimension_numbers<[2], [2], [1], [1], [0, 0, 0, 1, 1, 1], [0], [0]>} : vector<2x8x16xf32>, vector<2x8x16xf32>, vector<2x8x8xf32> -> vector<2x8x8xf32>
    %cst_40 = arith.constant 2.500000e-01 : f32
    %69 = vector.broadcast %cst_40 : f32 to vector<2x8x8xf32>
    %70 = arith.mulf %68, %69 : vector<2x8x8xf32>
    %cst_41 = arith.constant 0.000000e+00 : f32
    %71 = vector.broadcast %cst_41 : f32 to vector<2x8x8xf32>
    %72 = arith.cmpf ogt, %18, %71 : vector<2x8x8xf32>
    %cst_42 = arith.constant -1.000000e+09 : f32
    %73 = vector.broadcast %cst_42 : f32 to vector<2x8x8xf32>
    %74 = arith.select %72, %70, %73 : vector<2x8x8xi1>, vector<2x8x8xf32>
    %cst_43 = arith.constant dense<0xFF800000> : vector<2x8xf32>
    %75 = vector.multi_reduction <maximumf>, %74, %cst_43 [2] : vector<2x8x8xf32> to vector<2x8xf32>
    %76 = vector.shape_cast %75 : vector<2x8xf32> to vector<2x8x1xf32>
    %77 = vector.broadcast %76 : vector<2x8x1xf32> to vector<2x8x8xf32>
    %78 = arith.subf %74, %77 : vector<2x8x8xf32>
    %79 = math.exp %78 : vector<2x8x8xf32>
    %cst_44 = arith.constant dense<0.000000e+00> : vector<2x8xf32>
    %80 = vector.multi_reduction <add>, %79, %cst_44 [2] : vector<2x8x8xf32> to vector<2x8xf32>
    %81 = vector.shape_cast %80 : vector<2x8xf32> to vector<2x8x1xf32>
    %82 = tpu.reciprocal %81 : vector<2x8x1xf32> -> vector<2x8x1xf32>
    %83 = vector.broadcast %82 : vector<2x8x1xf32> to vector<2x8x8xf32>
    %84 = arith.mulf %79, %83 : vector<2x8x8xf32>
    %cst_45 = arith.constant dense<0.000000e+00> : vector<2x8x16xf32>
    %85 = tpu.matmul %84, %67, %cst_45 {dimension_numbers = #tpu.dot_dimension_numbers<[2], [1], [1], [2], [0, 0, 0, 1, 1, 2], [0], [0]>} : vector<2x8x8xf32>, vector<2x8x16xf32>, vector<2x8x16xf32> -> vector<2x8x16xf32>
    %86 = vector.shape_cast %85 : vector<2x8x16xf32> to vector<16x16xf32>
    %c16 = arith.constant 16 : index
    %c0_46 = arith.constant 0 : index
    %87 = vector.load %arg7[%c16, %c0_46] : memref<32x32xf32, #tpu.memory_space<vmem>>, vector<16x32xf32>
    %cst_47 = arith.constant dense<0.000000e+00> : vector<16x32xf32>
    %88 = tpu.matmul %86, %87, %cst_47 {dimension_numbers = #tpu.dot_dimension_numbers<[1], [0], [0], [1], [0, 0, 1, 1], [], []>} : vector<16x16xf32>, vector<16x32xf32>, vector<16x32xf32> -> vector<16x32xf32>
    %89 = arith.addf %61, %88 : vector<16x32xf32>
    %c0_48 = arith.constant 0 : index
    %c0_49 = arith.constant 0 : index
    %90 = vector.load %arg8[%c0_48, %c0_49] : memref<1x32xf32, #tpu.memory_space<vmem>>, vector<1x32xf32>
    %91 = vector.broadcast %90 : vector<1x32xf32> to vector<16x32xf32>
    %92 = arith.addf %89, %91 : vector<16x32xf32>
    %93 = arith.addf %24, %92 : vector<16x32xf32>
    %cst_50 = arith.constant dense<0.000000e+00> : vector<16xf32>
    %94 = vector.multi_reduction <add>, %93, %cst_50 [1] : vector<16x32xf32> to vector<16xf32>
    %95 = vector.shape_cast %94 : vector<16xf32> to vector<16x1xf32>
    %cst_51 = arith.constant 3.200000e+01 : f32
    %96 = vector.broadcast %cst_51 : f32 to vector<16x1xf32>
    %97 = arith.divf %95, %96 : vector<16x1xf32>
    %98 = vector.broadcast %97 : vector<16x1xf32> to vector<16x32xf32>
    %99 = arith.subf %93, %98 : vector<16x32xf32>
    %100 = arith.mulf %99, %99 : vector<16x32xf32>
    %cst_52 = arith.constant dense<0.000000e+00> : vector<16xf32>
    %101 = vector.multi_reduction <add>, %100, %cst_52 [1] : vector<16x32xf32> to vector<16xf32>
    %102 = vector.shape_cast %101 : vector<16xf32> to vector<16x1xf32>
    %cst_53 = arith.constant 3.200000e+01 : f32
    %103 = vector.broadcast %cst_53 : f32 to vector<16x1xf32>
    %104 = arith.divf %102, %103 : vector<16x1xf32>
    %105 = vector.broadcast %97 : vector<16x1xf32> to vector<16x32xf32>
    %106 = arith.subf %93, %105 : vector<16x32xf32>
    %cst_54 = arith.constant 9.99999974E-6 : f32
    %107 = vector.broadcast %cst_54 : f32 to vector<16x1xf32>
    %108 = arith.addf %104, %107 : vector<16x1xf32>
    %109 = math.rsqrt %108 : vector<16x1xf32>
    %110 = vector.broadcast %109 : vector<16x1xf32> to vector<16x32xf32>
    %111 = arith.mulf %106, %110 : vector<16x32xf32>
    %c0_55 = arith.constant 0 : index
    %c0_56 = arith.constant 0 : index
    %112 = vector.load %arg19[%c0_55, %c0_56] : memref<1x32xf32, #tpu.memory_space<vmem>>, vector<1x32xf32>
    %113 = vector.broadcast %112 : vector<1x32xf32> to vector<16x32xf32>
    %114 = arith.mulf %111, %113 : vector<16x32xf32>
    %c0_57 = arith.constant 0 : index
    %c0_58 = arith.constant 0 : index
    %115 = vector.load %arg20[%c0_57, %c0_58] : memref<1x32xf32, #tpu.memory_space<vmem>>, vector<1x32xf32>
    %116 = vector.broadcast %115 : vector<1x32xf32> to vector<16x32xf32>
    %117 = arith.addf %114, %116 : vector<16x32xf32>
    %c0_59 = arith.constant 0 : index
    %c0_60 = arith.constant 0 : index
    %118 = vector.load %arg9[%c0_59, %c0_60] : memref<32x64xf32, #tpu.memory_space<vmem>>, vector<32x64xf32>
    %cst_61 = arith.constant dense<0.000000e+00> : vector<16x64xf32>
    %119 = tpu.matmul %117, %118, %cst_61 {dimension_numbers = #tpu.dot_dimension_numbers<[1], [0], [0], [1], [0, 0, 1, 1], [], []>} : vector<16x32xf32>, vector<32x64xf32>, vector<16x64xf32> -> vector<16x64xf32>
    %c0_62 = arith.constant 0 : index
    %c0_63 = arith.constant 0 : index
    %120 = vector.load %arg10[%c0_62, %c0_63] : memref<1x64xf32, #tpu.memory_space<vmem>>, vector<1x64xf32>
    %121 = vector.broadcast %120 : vector<1x64xf32> to vector<16x64xf32>
    %122 = arith.addf %119, %121 : vector<16x64xf32>
    %123 = vector.extract_strided_slice %122 {offsets = [0, 0], sizes = [16, 32], strides = [1, 1]} : vector<16x64xf32> to vector<16x32xf32>
    %124 = vector.extract_strided_slice %123 {offsets = [0, 0], sizes = [16, 16], strides = [1, 1]} : vector<16x32xf32> to vector<16x16xf32>
    %125 = vector.shape_cast %124 : vector<16x16xf32> to vector<2x8x16xf32>
    %126 = vector.extract_strided_slice %14 {offsets = [0, 0], sizes = [16, 16], strides = [1, 1]} : vector<16x32xf32> to vector<16x16xf32>
    %127 = vector.shape_cast %126 : vector<16x16xf32> to vector<2x8x16xf32>
    %128 = vector.extract_strided_slice %15 {offsets = [0, 0], sizes = [16, 16], strides = [1, 1]} : vector<16x32xf32> to vector<16x16xf32>
    %129 = vector.shape_cast %128 : vector<16x16xf32> to vector<2x8x16xf32>
    %cst_64 = arith.constant dense<0.000000e+00> : vector<2x8x8xf32>
    %130 = tpu.matmul %125, %127, %cst_64 {dimension_numbers = #tpu.dot_dimension_numbers<[2], [2], [1], [1], [0, 0, 0, 1, 1, 1], [0], [0]>} : vector<2x8x16xf32>, vector<2x8x16xf32>, vector<2x8x8xf32> -> vector<2x8x8xf32>
    %cst_65 = arith.constant 2.500000e-01 : f32
    %131 = vector.broadcast %cst_65 : f32 to vector<2x8x8xf32>
    %132 = arith.mulf %130, %131 : vector<2x8x8xf32>
    %cst_66 = arith.constant 0.000000e+00 : f32
    %133 = vector.broadcast %cst_66 : f32 to vector<2x8x8xf32>
    %134 = arith.cmpf ogt, %22, %133 : vector<2x8x8xf32>
    %cst_67 = arith.constant -1.000000e+09 : f32
    %135 = vector.broadcast %cst_67 : f32 to vector<2x8x8xf32>
    %136 = arith.select %134, %132, %135 : vector<2x8x8xi1>, vector<2x8x8xf32>
    %cst_68 = arith.constant dense<0xFF800000> : vector<2x8xf32>
    %137 = vector.multi_reduction <maximumf>, %136, %cst_68 [2] : vector<2x8x8xf32> to vector<2x8xf32>
    %138 = vector.shape_cast %137 : vector<2x8xf32> to vector<2x8x1xf32>
    %139 = vector.broadcast %138 : vector<2x8x1xf32> to vector<2x8x8xf32>
    %140 = arith.subf %136, %139 : vector<2x8x8xf32>
    %141 = math.exp %140 : vector<2x8x8xf32>
    %cst_69 = arith.constant dense<0.000000e+00> : vector<2x8xf32>
    %142 = vector.multi_reduction <add>, %141, %cst_69 [2] : vector<2x8x8xf32> to vector<2x8xf32>
    %143 = vector.shape_cast %142 : vector<2x8xf32> to vector<2x8x1xf32>
    %144 = tpu.reciprocal %143 : vector<2x8x1xf32> -> vector<2x8x1xf32>
    %145 = vector.broadcast %144 : vector<2x8x1xf32> to vector<2x8x8xf32>
    %146 = arith.mulf %141, %145 : vector<2x8x8xf32>
    %cst_70 = arith.constant dense<0.000000e+00> : vector<2x8x16xf32>
    %147 = tpu.matmul %146, %129, %cst_70 {dimension_numbers = #tpu.dot_dimension_numbers<[2], [1], [1], [2], [0, 0, 0, 1, 1, 2], [0], [0]>} : vector<2x8x8xf32>, vector<2x8x16xf32>, vector<2x8x16xf32> -> vector<2x8x16xf32>
    %148 = vector.shape_cast %147 : vector<2x8x16xf32> to vector<16x16xf32>
    %c0_71 = arith.constant 0 : index
    %c0_72 = arith.constant 0 : index
    %149 = vector.load %arg15[%c0_71, %c0_72] : memref<32x32xf32, #tpu.memory_space<vmem>>, vector<16x32xf32>
    %cst_73 = arith.constant dense<0.000000e+00> : vector<16x32xf32>
    %150 = tpu.matmul %148, %149, %cst_73 {dimension_numbers = #tpu.dot_dimension_numbers<[1], [0], [0], [1], [0, 0, 1, 1], [], []>} : vector<16x16xf32>, vector<16x32xf32>, vector<16x32xf32> -> vector<16x32xf32>
    %151 = vector.extract_strided_slice %123 {offsets = [0, 16], sizes = [16, 16], strides = [1, 1]} : vector<16x32xf32> to vector<16x16xf32>
    %152 = vector.shape_cast %151 : vector<16x16xf32> to vector<2x8x16xf32>
    %153 = vector.extract_strided_slice %14 {offsets = [0, 16], sizes = [16, 16], strides = [1, 1]} : vector<16x32xf32> to vector<16x16xf32>
    %154 = vector.shape_cast %153 : vector<16x16xf32> to vector<2x8x16xf32>
    %155 = vector.extract_strided_slice %15 {offsets = [0, 16], sizes = [16, 16], strides = [1, 1]} : vector<16x32xf32> to vector<16x16xf32>
    %156 = vector.shape_cast %155 : vector<16x16xf32> to vector<2x8x16xf32>
    %cst_74 = arith.constant dense<0.000000e+00> : vector<2x8x8xf32>
    %157 = tpu.matmul %152, %154, %cst_74 {dimension_numbers = #tpu.dot_dimension_numbers<[2], [2], [1], [1], [0, 0, 0, 1, 1, 1], [0], [0]>} : vector<2x8x16xf32>, vector<2x8x16xf32>, vector<2x8x8xf32> -> vector<2x8x8xf32>
    %cst_75 = arith.constant 2.500000e-01 : f32
    %158 = vector.broadcast %cst_75 : f32 to vector<2x8x8xf32>
    %159 = arith.mulf %157, %158 : vector<2x8x8xf32>
    %cst_76 = arith.constant 0.000000e+00 : f32
    %160 = vector.broadcast %cst_76 : f32 to vector<2x8x8xf32>
    %161 = arith.cmpf ogt, %22, %160 : vector<2x8x8xf32>
    %cst_77 = arith.constant -1.000000e+09 : f32
    %162 = vector.broadcast %cst_77 : f32 to vector<2x8x8xf32>
    %163 = arith.select %161, %159, %162 : vector<2x8x8xi1>, vector<2x8x8xf32>
    %cst_78 = arith.constant dense<0xFF800000> : vector<2x8xf32>
    %164 = vector.multi_reduction <maximumf>, %163, %cst_78 [2] : vector<2x8x8xf32> to vector<2x8xf32>
    %165 = vector.shape_cast %164 : vector<2x8xf32> to vector<2x8x1xf32>
    %166 = vector.broadcast %165 : vector<2x8x1xf32> to vector<2x8x8xf32>
    %167 = arith.subf %163, %166 : vector<2x8x8xf32>
    %168 = math.exp %167 : vector<2x8x8xf32>
    %cst_79 = arith.constant dense<0.000000e+00> : vector<2x8xf32>
    %169 = vector.multi_reduction <add>, %168, %cst_79 [2] : vector<2x8x8xf32> to vector<2x8xf32>
    %170 = vector.shape_cast %169 : vector<2x8xf32> to vector<2x8x1xf32>
    %171 = tpu.reciprocal %170 : vector<2x8x1xf32> -> vector<2x8x1xf32>
    %172 = vector.broadcast %171 : vector<2x8x1xf32> to vector<2x8x8xf32>
    %173 = arith.mulf %168, %172 : vector<2x8x8xf32>
    %cst_80 = arith.constant dense<0.000000e+00> : vector<2x8x16xf32>
    %174 = tpu.matmul %173, %156, %cst_80 {dimension_numbers = #tpu.dot_dimension_numbers<[2], [1], [1], [2], [0, 0, 0, 1, 1, 2], [0], [0]>} : vector<2x8x8xf32>, vector<2x8x16xf32>, vector<2x8x16xf32> -> vector<2x8x16xf32>
    %175 = vector.shape_cast %174 : vector<2x8x16xf32> to vector<16x16xf32>
    %c16_81 = arith.constant 16 : index
    %c0_82 = arith.constant 0 : index
    %176 = vector.load %arg15[%c16_81, %c0_82] : memref<32x32xf32, #tpu.memory_space<vmem>>, vector<16x32xf32>
    %cst_83 = arith.constant dense<0.000000e+00> : vector<16x32xf32>
    %177 = tpu.matmul %175, %176, %cst_83 {dimension_numbers = #tpu.dot_dimension_numbers<[1], [0], [0], [1], [0, 0, 1, 1], [], []>} : vector<16x16xf32>, vector<16x32xf32>, vector<16x32xf32> -> vector<16x32xf32>
    %178 = arith.addf %150, %177 : vector<16x32xf32>
    %c0_84 = arith.constant 0 : index
    %c0_85 = arith.constant 0 : index
    %179 = vector.load %arg16[%c0_84, %c0_85] : memref<1x32xf32, #tpu.memory_space<vmem>>, vector<1x32xf32>
    %180 = vector.broadcast %179 : vector<1x32xf32> to vector<16x32xf32>
    %181 = arith.addf %178, %180 : vector<16x32xf32>
    %182 = vector.extract_strided_slice %122 {offsets = [0, 32], sizes = [16, 32], strides = [1, 1]} : vector<16x64xf32> to vector<16x32xf32>
    %183 = vector.extract_strided_slice %182 {offsets = [0, 0], sizes = [16, 16], strides = [1, 1]} : vector<16x32xf32> to vector<16x16xf32>
    %184 = vector.shape_cast %183 : vector<16x16xf32> to vector<2x8x16xf32>
    %185 = vector.extract_strided_slice %16 {offsets = [0, 0], sizes = [16, 16], strides = [1, 1]} : vector<16x32xf32> to vector<16x16xf32>
    %186 = vector.shape_cast %185 : vector<16x16xf32> to vector<2x8x16xf32>
    %187 = vector.extract_strided_slice %17 {offsets = [0, 0], sizes = [16, 16], strides = [1, 1]} : vector<16x32xf32> to vector<16x16xf32>
    %188 = vector.shape_cast %187 : vector<16x16xf32> to vector<2x8x16xf32>
    %cst_86 = arith.constant dense<0.000000e+00> : vector<2x8x8xf32>
    %189 = tpu.matmul %184, %186, %cst_86 {dimension_numbers = #tpu.dot_dimension_numbers<[2], [2], [1], [1], [0, 0, 0, 1, 1, 1], [0], [0]>} : vector<2x8x16xf32>, vector<2x8x16xf32>, vector<2x8x8xf32> -> vector<2x8x8xf32>
    %cst_87 = arith.constant 2.500000e-01 : f32
    %190 = vector.broadcast %cst_87 : f32 to vector<2x8x8xf32>
    %191 = arith.mulf %189, %190 : vector<2x8x8xf32>
    %cst_88 = arith.constant 0.000000e+00 : f32
    %192 = vector.broadcast %cst_88 : f32 to vector<2x8x8xf32>
    %193 = arith.cmpf ogt, %22, %192 : vector<2x8x8xf32>
    %cst_89 = arith.constant -1.000000e+09 : f32
    %194 = vector.broadcast %cst_89 : f32 to vector<2x8x8xf32>
    %195 = arith.select %193, %191, %194 : vector<2x8x8xi1>, vector<2x8x8xf32>
    %cst_90 = arith.constant dense<0xFF800000> : vector<2x8xf32>
    %196 = vector.multi_reduction <maximumf>, %195, %cst_90 [2] : vector<2x8x8xf32> to vector<2x8xf32>
    %197 = vector.shape_cast %196 : vector<2x8xf32> to vector<2x8x1xf32>
    %198 = vector.broadcast %197 : vector<2x8x1xf32> to vector<2x8x8xf32>
    %199 = arith.subf %195, %198 : vector<2x8x8xf32>
    %200 = math.exp %199 : vector<2x8x8xf32>
    %cst_91 = arith.constant dense<0.000000e+00> : vector<2x8xf32>
    %201 = vector.multi_reduction <add>, %200, %cst_91 [2] : vector<2x8x8xf32> to vector<2x8xf32>
    %202 = vector.shape_cast %201 : vector<2x8xf32> to vector<2x8x1xf32>
    %203 = tpu.reciprocal %202 : vector<2x8x1xf32> -> vector<2x8x1xf32>
    %204 = vector.broadcast %203 : vector<2x8x1xf32> to vector<2x8x8xf32>
    %205 = arith.mulf %200, %204 : vector<2x8x8xf32>
    %cst_92 = arith.constant dense<0.000000e+00> : vector<2x8x16xf32>
    %206 = tpu.matmul %205, %188, %cst_92 {dimension_numbers = #tpu.dot_dimension_numbers<[2], [1], [1], [2], [0, 0, 0, 1, 1, 2], [0], [0]>} : vector<2x8x8xf32>, vector<2x8x16xf32>, vector<2x8x16xf32> -> vector<2x8x16xf32>
    %207 = vector.shape_cast %206 : vector<2x8x16xf32> to vector<16x16xf32>
    %c0_93 = arith.constant 0 : index
    %c0_94 = arith.constant 0 : index
    %208 = vector.load %arg17[%c0_93, %c0_94] : memref<32x32xf32, #tpu.memory_space<vmem>>, vector<16x32xf32>
    %cst_95 = arith.constant dense<0.000000e+00> : vector<16x32xf32>
    %209 = tpu.matmul %207, %208, %cst_95 {dimension_numbers = #tpu.dot_dimension_numbers<[1], [0], [0], [1], [0, 0, 1, 1], [], []>} : vector<16x16xf32>, vector<16x32xf32>, vector<16x32xf32> -> vector<16x32xf32>
    %210 = vector.extract_strided_slice %182 {offsets = [0, 16], sizes = [16, 16], strides = [1, 1]} : vector<16x32xf32> to vector<16x16xf32>
    %211 = vector.shape_cast %210 : vector<16x16xf32> to vector<2x8x16xf32>
    %212 = vector.extract_strided_slice %16 {offsets = [0, 16], sizes = [16, 16], strides = [1, 1]} : vector<16x32xf32> to vector<16x16xf32>
    %213 = vector.shape_cast %212 : vector<16x16xf32> to vector<2x8x16xf32>
    %214 = vector.extract_strided_slice %17 {offsets = [0, 16], sizes = [16, 16], strides = [1, 1]} : vector<16x32xf32> to vector<16x16xf32>
    %215 = vector.shape_cast %214 : vector<16x16xf32> to vector<2x8x16xf32>
    %cst_96 = arith.constant dense<0.000000e+00> : vector<2x8x8xf32>
    %216 = tpu.matmul %211, %213, %cst_96 {dimension_numbers = #tpu.dot_dimension_numbers<[2], [2], [1], [1], [0, 0, 0, 1, 1, 1], [0], [0]>} : vector<2x8x16xf32>, vector<2x8x16xf32>, vector<2x8x8xf32> -> vector<2x8x8xf32>
    %cst_97 = arith.constant 2.500000e-01 : f32
    %217 = vector.broadcast %cst_97 : f32 to vector<2x8x8xf32>
    %218 = arith.mulf %216, %217 : vector<2x8x8xf32>
    %cst_98 = arith.constant 0.000000e+00 : f32
    %219 = vector.broadcast %cst_98 : f32 to vector<2x8x8xf32>
    %220 = arith.cmpf ogt, %22, %219 : vector<2x8x8xf32>
    %cst_99 = arith.constant -1.000000e+09 : f32
    %221 = vector.broadcast %cst_99 : f32 to vector<2x8x8xf32>
    %222 = arith.select %220, %218, %221 : vector<2x8x8xi1>, vector<2x8x8xf32>
    %cst_100 = arith.constant dense<0xFF800000> : vector<2x8xf32>
    %223 = vector.multi_reduction <maximumf>, %222, %cst_100 [2] : vector<2x8x8xf32> to vector<2x8xf32>
    %224 = vector.shape_cast %223 : vector<2x8xf32> to vector<2x8x1xf32>
    %225 = vector.broadcast %224 : vector<2x8x1xf32> to vector<2x8x8xf32>
    %226 = arith.subf %222, %225 : vector<2x8x8xf32>
    %227 = math.exp %226 : vector<2x8x8xf32>
    %cst_101 = arith.constant dense<0.000000e+00> : vector<2x8xf32>
    %228 = vector.multi_reduction <add>, %227, %cst_101 [2] : vector<2x8x8xf32> to vector<2x8xf32>
    %229 = vector.shape_cast %228 : vector<2x8xf32> to vector<2x8x1xf32>
    %230 = tpu.reciprocal %229 : vector<2x8x1xf32> -> vector<2x8x1xf32>
    %231 = vector.broadcast %230 : vector<2x8x1xf32> to vector<2x8x8xf32>
    %232 = arith.mulf %227, %231 : vector<2x8x8xf32>
    %cst_102 = arith.constant dense<0.000000e+00> : vector<2x8x16xf32>
    %233 = tpu.matmul %232, %215, %cst_102 {dimension_numbers = #tpu.dot_dimension_numbers<[2], [1], [1], [2], [0, 0, 0, 1, 1, 2], [0], [0]>} : vector<2x8x8xf32>, vector<2x8x16xf32>, vector<2x8x16xf32> -> vector<2x8x16xf32>
    %234 = vector.shape_cast %233 : vector<2x8x16xf32> to vector<16x16xf32>
    %c16_103 = arith.constant 16 : index
    %c0_104 = arith.constant 0 : index
    %235 = vector.load %arg17[%c16_103, %c0_104] : memref<32x32xf32, #tpu.memory_space<vmem>>, vector<16x32xf32>
    %cst_105 = arith.constant dense<0.000000e+00> : vector<16x32xf32>
    %236 = tpu.matmul %234, %235, %cst_105 {dimension_numbers = #tpu.dot_dimension_numbers<[1], [0], [0], [1], [0, 0, 1, 1], [], []>} : vector<16x16xf32>, vector<16x32xf32>, vector<16x32xf32> -> vector<16x32xf32>
    %237 = arith.addf %209, %236 : vector<16x32xf32>
    %c0_106 = arith.constant 0 : index
    %c0_107 = arith.constant 0 : index
    %238 = vector.load %arg18[%c0_106, %c0_107] : memref<1x32xf32, #tpu.memory_space<vmem>>, vector<1x32xf32>
    %239 = vector.broadcast %238 : vector<1x32xf32> to vector<16x32xf32>
    %240 = arith.addf %237, %239 : vector<16x32xf32>
    %241 = arith.addf %181, %240 : vector<16x32xf32>
    %cst_108 = arith.constant 5.000000e-01 : f32
    %242 = vector.broadcast %cst_108 : f32 to vector<16x32xf32>
    %243 = arith.mulf %242, %241 : vector<16x32xf32>
    %244 = arith.addf %117, %243 : vector<16x32xf32>
    %cst_109 = arith.constant dense<0.000000e+00> : vector<16xf32>
    %245 = vector.multi_reduction <add>, %244, %cst_109 [1] : vector<16x32xf32> to vector<16xf32>
    %246 = vector.shape_cast %245 : vector<16xf32> to vector<16x1xf32>
    %cst_110 = arith.constant 3.200000e+01 : f32
    %247 = vector.broadcast %cst_110 : f32 to vector<16x1xf32>
    %248 = arith.divf %246, %247 : vector<16x1xf32>
    %249 = vector.broadcast %248 : vector<16x1xf32> to vector<16x32xf32>
    %250 = arith.subf %244, %249 : vector<16x32xf32>
    %251 = arith.mulf %250, %250 : vector<16x32xf32>
    %cst_111 = arith.constant dense<0.000000e+00> : vector<16xf32>
    %252 = vector.multi_reduction <add>, %251, %cst_111 [1] : vector<16x32xf32> to vector<16xf32>
    %253 = vector.shape_cast %252 : vector<16xf32> to vector<16x1xf32>
    %cst_112 = arith.constant 3.200000e+01 : f32
    %254 = vector.broadcast %cst_112 : f32 to vector<16x1xf32>
    %255 = arith.divf %253, %254 : vector<16x1xf32>
    %256 = vector.broadcast %248 : vector<16x1xf32> to vector<16x32xf32>
    %257 = arith.subf %244, %256 : vector<16x32xf32>
    %cst_113 = arith.constant 9.99999974E-6 : f32
    %258 = vector.broadcast %cst_113 : f32 to vector<16x1xf32>
    %259 = arith.addf %255, %258 : vector<16x1xf32>
    %260 = math.rsqrt %259 : vector<16x1xf32>
    %261 = vector.broadcast %260 : vector<16x1xf32> to vector<16x32xf32>
    %262 = arith.mulf %257, %261 : vector<16x32xf32>
    %c0_114 = arith.constant 0 : index
    %c0_115 = arith.constant 0 : index
    %263 = vector.load %arg21[%c0_114, %c0_115] : memref<1x32xf32, #tpu.memory_space<vmem>>, vector<1x32xf32>
    %264 = vector.broadcast %263 : vector<1x32xf32> to vector<16x32xf32>
    %265 = arith.mulf %262, %264 : vector<16x32xf32>
    %c0_116 = arith.constant 0 : index
    %c0_117 = arith.constant 0 : index
    %266 = vector.load %arg22[%c0_116, %c0_117] : memref<1x32xf32, #tpu.memory_space<vmem>>, vector<1x32xf32>
    %267 = vector.broadcast %266 : vector<1x32xf32> to vector<16x32xf32>
    %268 = arith.addf %265, %267 : vector<16x32xf32>
    %c0_118 = arith.constant 0 : index
    %c0_119 = arith.constant 0 : index
    %269 = vector.load %arg25[%c0_118, %c0_119] : memref<32x64xf32, #tpu.memory_space<vmem>>, vector<32x64xf32>
    %cst_120 = arith.constant dense<0.000000e+00> : vector<16x64xf32>
    %270 = tpu.matmul %268, %269, %cst_120 {dimension_numbers = #tpu.dot_dimension_numbers<[1], [0], [0], [1], [0, 0, 1, 1], [], []>} : vector<16x32xf32>, vector<32x64xf32>, vector<16x64xf32> -> vector<16x64xf32>
    %c0_121 = arith.constant 0 : index
    %c0_122 = arith.constant 0 : index
    %271 = vector.load %arg26[%c0_121, %c0_122] : memref<1x64xf32, #tpu.memory_space<vmem>>, vector<1x64xf32>
    %272 = vector.broadcast %271 : vector<1x64xf32> to vector<16x64xf32>
    %273 = arith.addf %270, %272 : vector<16x64xf32>
    %cst_123 = arith.constant 0.000000e+00 : f32
    %274 = vector.broadcast %cst_123 : f32 to vector<16x64xf32>
    %275 = arith.maximumf %273, %274 : vector<16x64xf32>
    %c0_124 = arith.constant 0 : index
    %c0_125 = arith.constant 0 : index
    %276 = vector.load %arg27[%c0_124, %c0_125] : memref<64x32xf32, #tpu.memory_space<vmem>>, vector<64x32xf32>
    %cst_126 = arith.constant dense<0.000000e+00> : vector<16x32xf32>
    %277 = tpu.matmul %275, %276, %cst_126 {dimension_numbers = #tpu.dot_dimension_numbers<[1], [0], [0], [1], [0, 0, 1, 1], [], []>} : vector<16x64xf32>, vector<64x32xf32>, vector<16x32xf32> -> vector<16x32xf32>
    %c0_127 = arith.constant 0 : index
    %c0_128 = arith.constant 0 : index
    %278 = vector.load %arg28[%c0_127, %c0_128] : memref<1x32xf32, #tpu.memory_space<vmem>>, vector<1x32xf32>
    %279 = vector.broadcast %278 : vector<1x32xf32> to vector<16x32xf32>
    %280 = arith.addf %277, %279 : vector<16x32xf32>
    %281 = arith.addf %268, %280 : vector<16x32xf32>
    %cst_129 = arith.constant dense<0.000000e+00> : vector<16xf32>
    %282 = vector.multi_reduction <add>, %281, %cst_129 [1] : vector<16x32xf32> to vector<16xf32>
    %283 = vector.shape_cast %282 : vector<16xf32> to vector<16x1xf32>
    %cst_130 = arith.constant 3.200000e+01 : f32
    %284 = vector.broadcast %cst_130 : f32 to vector<16x1xf32>
    %285 = arith.divf %283, %284 : vector<16x1xf32>
    %286 = vector.broadcast %285 : vector<16x1xf32> to vector<16x32xf32>
    %287 = arith.subf %281, %286 : vector<16x32xf32>
    %288 = arith.mulf %287, %287 : vector<16x32xf32>
    %cst_131 = arith.constant dense<0.000000e+00> : vector<16xf32>
    %289 = vector.multi_reduction <add>, %288, %cst_131 [1] : vector<16x32xf32> to vector<16xf32>
    %290 = vector.shape_cast %289 : vector<16xf32> to vector<16x1xf32>
    %cst_132 = arith.constant 3.200000e+01 : f32
    %291 = vector.broadcast %cst_132 : f32 to vector<16x1xf32>
    %292 = arith.divf %290, %291 : vector<16x1xf32>
    %293 = vector.broadcast %285 : vector<16x1xf32> to vector<16x32xf32>
    %294 = arith.subf %281, %293 : vector<16x32xf32>
    %cst_133 = arith.constant 9.99999974E-6 : f32
    %295 = vector.broadcast %cst_133 : f32 to vector<16x1xf32>
    %296 = arith.addf %292, %295 : vector<16x1xf32>
    %297 = math.rsqrt %296 : vector<16x1xf32>
    %298 = vector.broadcast %297 : vector<16x1xf32> to vector<16x32xf32>
    %299 = arith.mulf %294, %298 : vector<16x32xf32>
    %c0_134 = arith.constant 0 : index
    %c0_135 = arith.constant 0 : index
    %300 = vector.load %arg23[%c0_134, %c0_135] : memref<1x32xf32, #tpu.memory_space<vmem>>, vector<1x32xf32>
    %301 = vector.broadcast %300 : vector<1x32xf32> to vector<16x32xf32>
    %302 = arith.mulf %299, %301 : vector<16x32xf32>
    %c0_136 = arith.constant 0 : index
    %c0_137 = arith.constant 0 : index
    %303 = vector.load %arg24[%c0_136, %c0_137] : memref<1x32xf32, #tpu.memory_space<vmem>>, vector<1x32xf32>
    %304 = vector.broadcast %303 : vector<1x32xf32> to vector<16x32xf32>
    %305 = arith.addf %302, %304 : vector<16x32xf32>
    %c1_i32 = arith.constant 1 : i32
    %c0_138 = arith.constant 0 : index
    %c0_139 = arith.constant 0 : index
    %306 = vector.load %arg5[%c0_138, %c0_139] : memref<32x96xf32, #tpu.memory_space<vmem>>, vector<32x96xf32>
    %cst_140 = arith.constant dense<0.000000e+00> : vector<16x96xf32>
    %307 = tpu.matmul %305, %306, %cst_140 {dimension_numbers = #tpu.dot_dimension_numbers<[1], [0], [0], [1], [0, 0, 1, 1], [], []>} : vector<16x32xf32>, vector<32x96xf32>, vector<16x96xf32> -> vector<16x96xf32>
    %c0_141 = arith.constant 0 : index
    %c0_142 = arith.constant 0 : index
    %308 = vector.load %arg6[%c0_141, %c0_142] : memref<1x96xf32, #tpu.memory_space<vmem>>, vector<1x96xf32>
    %309 = vector.broadcast %308 : vector<1x96xf32> to vector<16x96xf32>
    %310 = arith.addf %307, %309 : vector<16x96xf32>
    %311 = vector.extract_strided_slice %310 {offsets = [0, 0], sizes = [16, 32], strides = [1, 1]} : vector<16x96xf32> to vector<16x32xf32>
    %312 = vector.extract_strided_slice %310 {offsets = [0, 32], sizes = [16, 32], strides = [1, 1]} : vector<16x96xf32> to vector<16x32xf32>
    %313 = vector.extract_strided_slice %310 {offsets = [0, 64], sizes = [16, 32], strides = [1, 1]} : vector<16x96xf32> to vector<16x32xf32>
    %314 = vector.extract_strided_slice %311 {offsets = [0, 0], sizes = [16, 16], strides = [1, 1]} : vector<16x32xf32> to vector<16x16xf32>
    %315 = vector.shape_cast %314 : vector<16x16xf32> to vector<2x8x16xf32>
    %316 = vector.extract_strided_slice %312 {offsets = [0, 0], sizes = [16, 16], strides = [1, 1]} : vector<16x32xf32> to vector<16x16xf32>
    %317 = vector.shape_cast %316 : vector<16x16xf32> to vector<2x8x16xf32>
    %318 = vector.extract_strided_slice %313 {offsets = [0, 0], sizes = [16, 16], strides = [1, 1]} : vector<16x32xf32> to vector<16x16xf32>
    %319 = vector.shape_cast %318 : vector<16x16xf32> to vector<2x8x16xf32>
    %cst_143 = arith.constant dense<0.000000e+00> : vector<2x8x8xf32>
    %320 = tpu.matmul %315, %317, %cst_143 {dimension_numbers = #tpu.dot_dimension_numbers<[2], [2], [1], [1], [0, 0, 0, 1, 1, 1], [0], [0]>} : vector<2x8x16xf32>, vector<2x8x16xf32>, vector<2x8x8xf32> -> vector<2x8x8xf32>
    %cst_144 = arith.constant 2.500000e-01 : f32
    %321 = vector.broadcast %cst_144 : f32 to vector<2x8x8xf32>
    %322 = arith.mulf %320, %321 : vector<2x8x8xf32>
    %cst_145 = arith.constant 0.000000e+00 : f32
    %323 = vector.broadcast %cst_145 : f32 to vector<2x8x8xf32>
    %324 = arith.cmpf ogt, %18, %323 : vector<2x8x8xf32>
    %cst_146 = arith.constant -1.000000e+09 : f32
    %325 = vector.broadcast %cst_146 : f32 to vector<2x8x8xf32>
    %326 = arith.select %324, %322, %325 : vector<2x8x8xi1>, vector<2x8x8xf32>
    %cst_147 = arith.constant dense<0xFF800000> : vector<2x8xf32>
    %327 = vector.multi_reduction <maximumf>, %326, %cst_147 [2] : vector<2x8x8xf32> to vector<2x8xf32>
    %328 = vector.shape_cast %327 : vector<2x8xf32> to vector<2x8x1xf32>
    %329 = vector.broadcast %328 : vector<2x8x1xf32> to vector<2x8x8xf32>
    %330 = arith.subf %326, %329 : vector<2x8x8xf32>
    %331 = math.exp %330 : vector<2x8x8xf32>
    %cst_148 = arith.constant dense<0.000000e+00> : vector<2x8xf32>
    %332 = vector.multi_reduction <add>, %331, %cst_148 [2] : vector<2x8x8xf32> to vector<2x8xf32>
    %333 = vector.shape_cast %332 : vector<2x8xf32> to vector<2x8x1xf32>
    %334 = tpu.reciprocal %333 : vector<2x8x1xf32> -> vector<2x8x1xf32>
    %335 = vector.broadcast %334 : vector<2x8x1xf32> to vector<2x8x8xf32>
    %336 = arith.mulf %331, %335 : vector<2x8x8xf32>
    %cst_149 = arith.constant dense<0.000000e+00> : vector<2x8x16xf32>
    %337 = tpu.matmul %336, %319, %cst_149 {dimension_numbers = #tpu.dot_dimension_numbers<[2], [1], [1], [2], [0, 0, 0, 1, 1, 2], [0], [0]>} : vector<2x8x8xf32>, vector<2x8x16xf32>, vector<2x8x16xf32> -> vector<2x8x16xf32>
    %338 = vector.shape_cast %337 : vector<2x8x16xf32> to vector<16x16xf32>
    %c0_150 = arith.constant 0 : index
    %c0_151 = arith.constant 0 : index
    %339 = vector.load %arg7[%c0_150, %c0_151] : memref<32x32xf32, #tpu.memory_space<vmem>>, vector<16x32xf32>
    %cst_152 = arith.constant dense<0.000000e+00> : vector<16x32xf32>
    %340 = tpu.matmul %338, %339, %cst_152 {dimension_numbers = #tpu.dot_dimension_numbers<[1], [0], [0], [1], [0, 0, 1, 1], [], []>} : vector<16x16xf32>, vector<16x32xf32>, vector<16x32xf32> -> vector<16x32xf32>
    %341 = vector.extract_strided_slice %311 {offsets = [0, 16], sizes = [16, 16], strides = [1, 1]} : vector<16x32xf32> to vector<16x16xf32>
    %342 = vector.shape_cast %341 : vector<16x16xf32> to vector<2x8x16xf32>
    %343 = vector.extract_strided_slice %312 {offsets = [0, 16], sizes = [16, 16], strides = [1, 1]} : vector<16x32xf32> to vector<16x16xf32>
    %344 = vector.shape_cast %343 : vector<16x16xf32> to vector<2x8x16xf32>
    %345 = vector.extract_strided_slice %313 {offsets = [0, 16], sizes = [16, 16], strides = [1, 1]} : vector<16x32xf32> to vector<16x16xf32>
    %346 = vector.shape_cast %345 : vector<16x16xf32> to vector<2x8x16xf32>
    %cst_153 = arith.constant dense<0.000000e+00> : vector<2x8x8xf32>
    %347 = tpu.matmul %342, %344, %cst_153 {dimension_numbers = #tpu.dot_dimension_numbers<[2], [2], [1], [1], [0, 0, 0, 1, 1, 1], [0], [0]>} : vector<2x8x16xf32>, vector<2x8x16xf32>, vector<2x8x8xf32> -> vector<2x8x8xf32>
    %cst_154 = arith.constant 2.500000e-01 : f32
    %348 = vector.broadcast %cst_154 : f32 to vector<2x8x8xf32>
    %349 = arith.mulf %347, %348 : vector<2x8x8xf32>
    %cst_155 = arith.constant 0.000000e+00 : f32
    %350 = vector.broadcast %cst_155 : f32 to vector<2x8x8xf32>
    %351 = arith.cmpf ogt, %18, %350 : vector<2x8x8xf32>
    %cst_156 = arith.constant -1.000000e+09 : f32
    %352 = vector.broadcast %cst_156 : f32 to vector<2x8x8xf32>
    %353 = arith.select %351, %349, %352 : vector<2x8x8xi1>, vector<2x8x8xf32>
    %cst_157 = arith.constant dense<0xFF800000> : vector<2x8xf32>
    %354 = vector.multi_reduction <maximumf>, %353, %cst_157 [2] : vector<2x8x8xf32> to vector<2x8xf32>
    %355 = vector.shape_cast %354 : vector<2x8xf32> to vector<2x8x1xf32>
    %356 = vector.broadcast %355 : vector<2x8x1xf32> to vector<2x8x8xf32>
    %357 = arith.subf %353, %356 : vector<2x8x8xf32>
    %358 = math.exp %357 : vector<2x8x8xf32>
    %cst_158 = arith.constant dense<0.000000e+00> : vector<2x8xf32>
    %359 = vector.multi_reduction <add>, %358, %cst_158 [2] : vector<2x8x8xf32> to vector<2x8xf32>
    %360 = vector.shape_cast %359 : vector<2x8xf32> to vector<2x8x1xf32>
    %361 = tpu.reciprocal %360 : vector<2x8x1xf32> -> vector<2x8x1xf32>
    %362 = vector.broadcast %361 : vector<2x8x1xf32> to vector<2x8x8xf32>
    %363 = arith.mulf %358, %362 : vector<2x8x8xf32>
    %cst_159 = arith.constant dense<0.000000e+00> : vector<2x8x16xf32>
    %364 = tpu.matmul %363, %346, %cst_159 {dimension_numbers = #tpu.dot_dimension_numbers<[2], [1], [1], [2], [0, 0, 0, 1, 1, 2], [0], [0]>} : vector<2x8x8xf32>, vector<2x8x16xf32>, vector<2x8x16xf32> -> vector<2x8x16xf32>
    %365 = vector.shape_cast %364 : vector<2x8x16xf32> to vector<16x16xf32>
    %c16_160 = arith.constant 16 : index
    %c0_161 = arith.constant 0 : index
    %366 = vector.load %arg7[%c16_160, %c0_161] : memref<32x32xf32, #tpu.memory_space<vmem>>, vector<16x32xf32>
    %cst_162 = arith.constant dense<0.000000e+00> : vector<16x32xf32>
    %367 = tpu.matmul %365, %366, %cst_162 {dimension_numbers = #tpu.dot_dimension_numbers<[1], [0], [0], [1], [0, 0, 1, 1], [], []>} : vector<16x16xf32>, vector<16x32xf32>, vector<16x32xf32> -> vector<16x32xf32>
    %368 = arith.addf %340, %367 : vector<16x32xf32>
    %c0_163 = arith.constant 0 : index
    %c0_164 = arith.constant 0 : index
    %369 = vector.load %arg8[%c0_163, %c0_164] : memref<1x32xf32, #tpu.memory_space<vmem>>, vector<1x32xf32>
    %370 = vector.broadcast %369 : vector<1x32xf32> to vector<16x32xf32>
    %371 = arith.addf %368, %370 : vector<16x32xf32>
    %372 = arith.addf %305, %371 : vector<16x32xf32>
    %cst_165 = arith.constant dense<0.000000e+00> : vector<16xf32>
    %373 = vector.multi_reduction <add>, %372, %cst_165 [1] : vector<16x32xf32> to vector<16xf32>
    %374 = vector.shape_cast %373 : vector<16xf32> to vector<16x1xf32>
    %cst_166 = arith.constant 3.200000e+01 : f32
    %375 = vector.broadcast %cst_166 : f32 to vector<16x1xf32>
    %376 = arith.divf %374, %375 : vector<16x1xf32>
    %377 = vector.broadcast %376 : vector<16x1xf32> to vector<16x32xf32>
    %378 = arith.subf %372, %377 : vector<16x32xf32>
    %379 = arith.mulf %378, %378 : vector<16x32xf32>
    %cst_167 = arith.constant dense<0.000000e+00> : vector<16xf32>
    %380 = vector.multi_reduction <add>, %379, %cst_167 [1] : vector<16x32xf32> to vector<16xf32>
    %381 = vector.shape_cast %380 : vector<16xf32> to vector<16x1xf32>
    %cst_168 = arith.constant 3.200000e+01 : f32
    %382 = vector.broadcast %cst_168 : f32 to vector<16x1xf32>
    %383 = arith.divf %381, %382 : vector<16x1xf32>
    %384 = vector.broadcast %376 : vector<16x1xf32> to vector<16x32xf32>
    %385 = arith.subf %372, %384 : vector<16x32xf32>
    %cst_169 = arith.constant 9.99999974E-6 : f32
    %386 = vector.broadcast %cst_169 : f32 to vector<16x1xf32>
    %387 = arith.addf %383, %386 : vector<16x1xf32>
    %388 = math.rsqrt %387 : vector<16x1xf32>
    %389 = vector.broadcast %388 : vector<16x1xf32> to vector<16x32xf32>
    %390 = arith.mulf %385, %389 : vector<16x32xf32>
    %c0_170 = arith.constant 0 : index
    %c0_171 = arith.constant 0 : index
    %391 = vector.load %arg19[%c0_170, %c0_171] : memref<1x32xf32, #tpu.memory_space<vmem>>, vector<1x32xf32>
    %392 = vector.broadcast %391 : vector<1x32xf32> to vector<16x32xf32>
    %393 = arith.mulf %390, %392 : vector<16x32xf32>
    %c0_172 = arith.constant 0 : index
    %c0_173 = arith.constant 0 : index
    %394 = vector.load %arg20[%c0_172, %c0_173] : memref<1x32xf32, #tpu.memory_space<vmem>>, vector<1x32xf32>
    %395 = vector.broadcast %394 : vector<1x32xf32> to vector<16x32xf32>
    %396 = arith.addf %393, %395 : vector<16x32xf32>
    %c0_174 = arith.constant 0 : index
    %c0_175 = arith.constant 0 : index
    %397 = vector.load %arg9[%c0_174, %c0_175] : memref<32x64xf32, #tpu.memory_space<vmem>>, vector<32x64xf32>
    %cst_176 = arith.constant dense<0.000000e+00> : vector<16x64xf32>
    %398 = tpu.matmul %396, %397, %cst_176 {dimension_numbers = #tpu.dot_dimension_numbers<[1], [0], [0], [1], [0, 0, 1, 1], [], []>} : vector<16x32xf32>, vector<32x64xf32>, vector<16x64xf32> -> vector<16x64xf32>
    %c0_177 = arith.constant 0 : index
    %c0_178 = arith.constant 0 : index
    %399 = vector.load %arg10[%c0_177, %c0_178] : memref<1x64xf32, #tpu.memory_space<vmem>>, vector<1x64xf32>
    %400 = vector.broadcast %399 : vector<1x64xf32> to vector<16x64xf32>
    %401 = arith.addf %398, %400 : vector<16x64xf32>
    %402 = vector.extract_strided_slice %401 {offsets = [0, 0], sizes = [16, 32], strides = [1, 1]} : vector<16x64xf32> to vector<16x32xf32>
    %403 = vector.extract_strided_slice %402 {offsets = [0, 0], sizes = [16, 16], strides = [1, 1]} : vector<16x32xf32> to vector<16x16xf32>
    %404 = vector.shape_cast %403 : vector<16x16xf32> to vector<2x8x16xf32>
    %405 = vector.extract_strided_slice %14 {offsets = [0, 0], sizes = [16, 16], strides = [1, 1]} : vector<16x32xf32> to vector<16x16xf32>
    %406 = vector.shape_cast %405 : vector<16x16xf32> to vector<2x8x16xf32>
    %407 = vector.extract_strided_slice %15 {offsets = [0, 0], sizes = [16, 16], strides = [1, 1]} : vector<16x32xf32> to vector<16x16xf32>
    %408 = vector.shape_cast %407 : vector<16x16xf32> to vector<2x8x16xf32>
    %cst_179 = arith.constant dense<0.000000e+00> : vector<2x8x8xf32>
    %409 = tpu.matmul %404, %406, %cst_179 {dimension_numbers = #tpu.dot_dimension_numbers<[2], [2], [1], [1], [0, 0, 0, 1, 1, 1], [0], [0]>} : vector<2x8x16xf32>, vector<2x8x16xf32>, vector<2x8x8xf32> -> vector<2x8x8xf32>
    %cst_180 = arith.constant 2.500000e-01 : f32
    %410 = vector.broadcast %cst_180 : f32 to vector<2x8x8xf32>
    %411 = arith.mulf %409, %410 : vector<2x8x8xf32>
    %cst_181 = arith.constant 0.000000e+00 : f32
    %412 = vector.broadcast %cst_181 : f32 to vector<2x8x8xf32>
    %413 = arith.cmpf ogt, %22, %412 : vector<2x8x8xf32>
    %cst_182 = arith.constant -1.000000e+09 : f32
    %414 = vector.broadcast %cst_182 : f32 to vector<2x8x8xf32>
    %415 = arith.select %413, %411, %414 : vector<2x8x8xi1>, vector<2x8x8xf32>
    %cst_183 = arith.constant dense<0xFF800000> : vector<2x8xf32>
    %416 = vector.multi_reduction <maximumf>, %415, %cst_183 [2] : vector<2x8x8xf32> to vector<2x8xf32>
    %417 = vector.shape_cast %416 : vector<2x8xf32> to vector<2x8x1xf32>
    %418 = vector.broadcast %417 : vector<2x8x1xf32> to vector<2x8x8xf32>
    %419 = arith.subf %415, %418 : vector<2x8x8xf32>
    %420 = math.exp %419 : vector<2x8x8xf32>
    %cst_184 = arith.constant dense<0.000000e+00> : vector<2x8xf32>
    %421 = vector.multi_reduction <add>, %420, %cst_184 [2] : vector<2x8x8xf32> to vector<2x8xf32>
    %422 = vector.shape_cast %421 : vector<2x8xf32> to vector<2x8x1xf32>
    %423 = tpu.reciprocal %422 : vector<2x8x1xf32> -> vector<2x8x1xf32>
    %424 = vector.broadcast %423 : vector<2x8x1xf32> to vector<2x8x8xf32>
    %425 = arith.mulf %420, %424 : vector<2x8x8xf32>
    %cst_185 = arith.constant dense<0.000000e+00> : vector<2x8x16xf32>
    %426 = tpu.matmul %425, %408, %cst_185 {dimension_numbers = #tpu.dot_dimension_numbers<[2], [1], [1], [2], [0, 0, 0, 1, 1, 2], [0], [0]>} : vector<2x8x8xf32>, vector<2x8x16xf32>, vector<2x8x16xf32> -> vector<2x8x16xf32>
    %427 = vector.shape_cast %426 : vector<2x8x16xf32> to vector<16x16xf32>
    %c0_186 = arith.constant 0 : index
    %c0_187 = arith.constant 0 : index
    %428 = vector.load %arg15[%c0_186, %c0_187] : memref<32x32xf32, #tpu.memory_space<vmem>>, vector<16x32xf32>
    %cst_188 = arith.constant dense<0.000000e+00> : vector<16x32xf32>
    %429 = tpu.matmul %427, %428, %cst_188 {dimension_numbers = #tpu.dot_dimension_numbers<[1], [0], [0], [1], [0, 0, 1, 1], [], []>} : vector<16x16xf32>, vector<16x32xf32>, vector<16x32xf32> -> vector<16x32xf32>
    %430 = vector.extract_strided_slice %402 {offsets = [0, 16], sizes = [16, 16], strides = [1, 1]} : vector<16x32xf32> to vector<16x16xf32>
    %431 = vector.shape_cast %430 : vector<16x16xf32> to vector<2x8x16xf32>
    %432 = vector.extract_strided_slice %14 {offsets = [0, 16], sizes = [16, 16], strides = [1, 1]} : vector<16x32xf32> to vector<16x16xf32>
    %433 = vector.shape_cast %432 : vector<16x16xf32> to vector<2x8x16xf32>
    %434 = vector.extract_strided_slice %15 {offsets = [0, 16], sizes = [16, 16], strides = [1, 1]} : vector<16x32xf32> to vector<16x16xf32>
    %435 = vector.shape_cast %434 : vector<16x16xf32> to vector<2x8x16xf32>
    %cst_189 = arith.constant dense<0.000000e+00> : vector<2x8x8xf32>
    %436 = tpu.matmul %431, %433, %cst_189 {dimension_numbers = #tpu.dot_dimension_numbers<[2], [2], [1], [1], [0, 0, 0, 1, 1, 1], [0], [0]>} : vector<2x8x16xf32>, vector<2x8x16xf32>, vector<2x8x8xf32> -> vector<2x8x8xf32>
    %cst_190 = arith.constant 2.500000e-01 : f32
    %437 = vector.broadcast %cst_190 : f32 to vector<2x8x8xf32>
    %438 = arith.mulf %436, %437 : vector<2x8x8xf32>
    %cst_191 = arith.constant 0.000000e+00 : f32
    %439 = vector.broadcast %cst_191 : f32 to vector<2x8x8xf32>
    %440 = arith.cmpf ogt, %22, %439 : vector<2x8x8xf32>
    %cst_192 = arith.constant -1.000000e+09 : f32
    %441 = vector.broadcast %cst_192 : f32 to vector<2x8x8xf32>
    %442 = arith.select %440, %438, %441 : vector<2x8x8xi1>, vector<2x8x8xf32>
    %cst_193 = arith.constant dense<0xFF800000> : vector<2x8xf32>
    %443 = vector.multi_reduction <maximumf>, %442, %cst_193 [2] : vector<2x8x8xf32> to vector<2x8xf32>
    %444 = vector.shape_cast %443 : vector<2x8xf32> to vector<2x8x1xf32>
    %445 = vector.broadcast %444 : vector<2x8x1xf32> to vector<2x8x8xf32>
    %446 = arith.subf %442, %445 : vector<2x8x8xf32>
    %447 = math.exp %446 : vector<2x8x8xf32>
    %cst_194 = arith.constant dense<0.000000e+00> : vector<2x8xf32>
    %448 = vector.multi_reduction <add>, %447, %cst_194 [2] : vector<2x8x8xf32> to vector<2x8xf32>
    %449 = vector.shape_cast %448 : vector<2x8xf32> to vector<2x8x1xf32>
    %450 = tpu.reciprocal %449 : vector<2x8x1xf32> -> vector<2x8x1xf32>
    %451 = vector.broadcast %450 : vector<2x8x1xf32> to vector<2x8x8xf32>
    %452 = arith.mulf %447, %451 : vector<2x8x8xf32>
    %cst_195 = arith.constant dense<0.000000e+00> : vector<2x8x16xf32>
    %453 = tpu.matmul %452, %435, %cst_195 {dimension_numbers = #tpu.dot_dimension_numbers<[2], [1], [1], [2], [0, 0, 0, 1, 1, 2], [0], [0]>} : vector<2x8x8xf32>, vector<2x8x16xf32>, vector<2x8x16xf32> -> vector<2x8x16xf32>
    %454 = vector.shape_cast %453 : vector<2x8x16xf32> to vector<16x16xf32>
    %c16_196 = arith.constant 16 : index
    %c0_197 = arith.constant 0 : index
    %455 = vector.load %arg15[%c16_196, %c0_197] : memref<32x32xf32, #tpu.memory_space<vmem>>, vector<16x32xf32>
    %cst_198 = arith.constant dense<0.000000e+00> : vector<16x32xf32>
    %456 = tpu.matmul %454, %455, %cst_198 {dimension_numbers = #tpu.dot_dimension_numbers<[1], [0], [0], [1], [0, 0, 1, 1], [], []>} : vector<16x16xf32>, vector<16x32xf32>, vector<16x32xf32> -> vector<16x32xf32>
    %457 = arith.addf %429, %456 : vector<16x32xf32>
    %c0_199 = arith.constant 0 : index
    %c0_200 = arith.constant 0 : index
    %458 = vector.load %arg16[%c0_199, %c0_200] : memref<1x32xf32, #tpu.memory_space<vmem>>, vector<1x32xf32>
    %459 = vector.broadcast %458 : vector<1x32xf32> to vector<16x32xf32>
    %460 = arith.addf %457, %459 : vector<16x32xf32>
    %461 = vector.extract_strided_slice %401 {offsets = [0, 32], sizes = [16, 32], strides = [1, 1]} : vector<16x64xf32> to vector<16x32xf32>
    %462 = vector.extract_strided_slice %461 {offsets = [0, 0], sizes = [16, 16], strides = [1, 1]} : vector<16x32xf32> to vector<16x16xf32>
    %463 = vector.shape_cast %462 : vector<16x16xf32> to vector<2x8x16xf32>
    %464 = vector.extract_strided_slice %16 {offsets = [0, 0], sizes = [16, 16], strides = [1, 1]} : vector<16x32xf32> to vector<16x16xf32>
    %465 = vector.shape_cast %464 : vector<16x16xf32> to vector<2x8x16xf32>
    %466 = vector.extract_strided_slice %17 {offsets = [0, 0], sizes = [16, 16], strides = [1, 1]} : vector<16x32xf32> to vector<16x16xf32>
    %467 = vector.shape_cast %466 : vector<16x16xf32> to vector<2x8x16xf32>
    %cst_201 = arith.constant dense<0.000000e+00> : vector<2x8x8xf32>
    %468 = tpu.matmul %463, %465, %cst_201 {dimension_numbers = #tpu.dot_dimension_numbers<[2], [2], [1], [1], [0, 0, 0, 1, 1, 1], [0], [0]>} : vector<2x8x16xf32>, vector<2x8x16xf32>, vector<2x8x8xf32> -> vector<2x8x8xf32>
    %cst_202 = arith.constant 2.500000e-01 : f32
    %469 = vector.broadcast %cst_202 : f32 to vector<2x8x8xf32>
    %470 = arith.mulf %468, %469 : vector<2x8x8xf32>
    %cst_203 = arith.constant 0.000000e+00 : f32
    %471 = vector.broadcast %cst_203 : f32 to vector<2x8x8xf32>
    %472 = arith.cmpf ogt, %22, %471 : vector<2x8x8xf32>
    %cst_204 = arith.constant -1.000000e+09 : f32
    %473 = vector.broadcast %cst_204 : f32 to vector<2x8x8xf32>
    %474 = arith.select %472, %470, %473 : vector<2x8x8xi1>, vector<2x8x8xf32>
    %cst_205 = arith.constant dense<0xFF800000> : vector<2x8xf32>
    %475 = vector.multi_reduction <maximumf>, %474, %cst_205 [2] : vector<2x8x8xf32> to vector<2x8xf32>
    %476 = vector.shape_cast %475 : vector<2x8xf32> to vector<2x8x1xf32>
    %477 = vector.broadcast %476 : vector<2x8x1xf32> to vector<2x8x8xf32>
    %478 = arith.subf %474, %477 : vector<2x8x8xf32>
    %479 = math.exp %478 : vector<2x8x8xf32>
    %cst_206 = arith.constant dense<0.000000e+00> : vector<2x8xf32>
    %480 = vector.multi_reduction <add>, %479, %cst_206 [2] : vector<2x8x8xf32> to vector<2x8xf32>
    %481 = vector.shape_cast %480 : vector<2x8xf32> to vector<2x8x1xf32>
    %482 = tpu.reciprocal %481 : vector<2x8x1xf32> -> vector<2x8x1xf32>
    %483 = vector.broadcast %482 : vector<2x8x1xf32> to vector<2x8x8xf32>
    %484 = arith.mulf %479, %483 : vector<2x8x8xf32>
    %cst_207 = arith.constant dense<0.000000e+00> : vector<2x8x16xf32>
    %485 = tpu.matmul %484, %467, %cst_207 {dimension_numbers = #tpu.dot_dimension_numbers<[2], [1], [1], [2], [0, 0, 0, 1, 1, 2], [0], [0]>} : vector<2x8x8xf32>, vector<2x8x16xf32>, vector<2x8x16xf32> -> vector<2x8x16xf32>
    %486 = vector.shape_cast %485 : vector<2x8x16xf32> to vector<16x16xf32>
    %c0_208 = arith.constant 0 : index
    %c0_209 = arith.constant 0 : index
    %487 = vector.load %arg17[%c0_208, %c0_209] : memref<32x32xf32, #tpu.memory_space<vmem>>, vector<16x32xf32>
    %cst_210 = arith.constant dense<0.000000e+00> : vector<16x32xf32>
    %488 = tpu.matmul %486, %487, %cst_210 {dimension_numbers = #tpu.dot_dimension_numbers<[1], [0], [0], [1], [0, 0, 1, 1], [], []>} : vector<16x16xf32>, vector<16x32xf32>, vector<16x32xf32> -> vector<16x32xf32>
    %489 = vector.extract_strided_slice %461 {offsets = [0, 16], sizes = [16, 16], strides = [1, 1]} : vector<16x32xf32> to vector<16x16xf32>
    %490 = vector.shape_cast %489 : vector<16x16xf32> to vector<2x8x16xf32>
    %491 = vector.extract_strided_slice %16 {offsets = [0, 16], sizes = [16, 16], strides = [1, 1]} : vector<16x32xf32> to vector<16x16xf32>
    %492 = vector.shape_cast %491 : vector<16x16xf32> to vector<2x8x16xf32>
    %493 = vector.extract_strided_slice %17 {offsets = [0, 16], sizes = [16, 16], strides = [1, 1]} : vector<16x32xf32> to vector<16x16xf32>
    %494 = vector.shape_cast %493 : vector<16x16xf32> to vector<2x8x16xf32>
    %cst_211 = arith.constant dense<0.000000e+00> : vector<2x8x8xf32>
    %495 = tpu.matmul %490, %492, %cst_211 {dimension_numbers = #tpu.dot_dimension_numbers<[2], [2], [1], [1], [0, 0, 0, 1, 1, 1], [0], [0]>} : vector<2x8x16xf32>, vector<2x8x16xf32>, vector<2x8x8xf32> -> vector<2x8x8xf32>
    %cst_212 = arith.constant 2.500000e-01 : f32
    %496 = vector.broadcast %cst_212 : f32 to vector<2x8x8xf32>
    %497 = arith.mulf %495, %496 : vector<2x8x8xf32>
    %cst_213 = arith.constant 0.000000e+00 : f32
    %498 = vector.broadcast %cst_213 : f32 to vector<2x8x8xf32>
    %499 = arith.cmpf ogt, %22, %498 : vector<2x8x8xf32>
    %cst_214 = arith.constant -1.000000e+09 : f32
    %500 = vector.broadcast %cst_214 : f32 to vector<2x8x8xf32>
    %501 = arith.select %499, %497, %500 : vector<2x8x8xi1>, vector<2x8x8xf32>
    %cst_215 = arith.constant dense<0xFF800000> : vector<2x8xf32>
    %502 = vector.multi_reduction <maximumf>, %501, %cst_215 [2] : vector<2x8x8xf32> to vector<2x8xf32>
    %503 = vector.shape_cast %502 : vector<2x8xf32> to vector<2x8x1xf32>
    %504 = vector.broadcast %503 : vector<2x8x1xf32> to vector<2x8x8xf32>
    %505 = arith.subf %501, %504 : vector<2x8x8xf32>
    %506 = math.exp %505 : vector<2x8x8xf32>
    %cst_216 = arith.constant dense<0.000000e+00> : vector<2x8xf32>
    %507 = vector.multi_reduction <add>, %506, %cst_216 [2] : vector<2x8x8xf32> to vector<2x8xf32>
    %508 = vector.shape_cast %507 : vector<2x8xf32> to vector<2x8x1xf32>
    %509 = tpu.reciprocal %508 : vector<2x8x1xf32> -> vector<2x8x1xf32>
    %510 = vector.broadcast %509 : vector<2x8x1xf32> to vector<2x8x8xf32>
    %511 = arith.mulf %506, %510 : vector<2x8x8xf32>
    %cst_217 = arith.constant dense<0.000000e+00> : vector<2x8x16xf32>
    %512 = tpu.matmul %511, %494, %cst_217 {dimension_numbers = #tpu.dot_dimension_numbers<[2], [1], [1], [2], [0, 0, 0, 1, 1, 2], [0], [0]>} : vector<2x8x8xf32>, vector<2x8x16xf32>, vector<2x8x16xf32> -> vector<2x8x16xf32>
    %513 = vector.shape_cast %512 : vector<2x8x16xf32> to vector<16x16xf32>
    %c16_218 = arith.constant 16 : index
    %c0_219 = arith.constant 0 : index
    %514 = vector.load %arg17[%c16_218, %c0_219] : memref<32x32xf32, #tpu.memory_space<vmem>>, vector<16x32xf32>
    %cst_220 = arith.constant dense<0.000000e+00> : vector<16x32xf32>
    %515 = tpu.matmul %513, %514, %cst_220 {dimension_numbers = #tpu.dot_dimension_numbers<[1], [0], [0], [1], [0, 0, 1, 1], [], []>} : vector<16x16xf32>, vector<16x32xf32>, vector<16x32xf32> -> vector<16x32xf32>
    %516 = arith.addf %488, %515 : vector<16x32xf32>
    %c0_221 = arith.constant 0 : index
    %c0_222 = arith.constant 0 : index
    %517 = vector.load %arg18[%c0_221, %c0_222] : memref<1x32xf32, #tpu.memory_space<vmem>>, vector<1x32xf32>
    %518 = vector.broadcast %517 : vector<1x32xf32> to vector<16x32xf32>
    %519 = arith.addf %516, %518 : vector<16x32xf32>
    %520 = arith.addf %460, %519 : vector<16x32xf32>
    %cst_223 = arith.constant 5.000000e-01 : f32
    %521 = vector.broadcast %cst_223 : f32 to vector<16x32xf32>
    %522 = arith.mulf %521, %520 : vector<16x32xf32>
    %523 = arith.addf %396, %522 : vector<16x32xf32>
    %cst_224 = arith.constant dense<0.000000e+00> : vector<16xf32>
    %524 = vector.multi_reduction <add>, %523, %cst_224 [1] : vector<16x32xf32> to vector<16xf32>
    %525 = vector.shape_cast %524 : vector<16xf32> to vector<16x1xf32>
    %cst_225 = arith.constant 3.200000e+01 : f32
    %526 = vector.broadcast %cst_225 : f32 to vector<16x1xf32>
    %527 = arith.divf %525, %526 : vector<16x1xf32>
    %528 = vector.broadcast %527 : vector<16x1xf32> to vector<16x32xf32>
    %529 = arith.subf %523, %528 : vector<16x32xf32>
    %530 = arith.mulf %529, %529 : vector<16x32xf32>
    %cst_226 = arith.constant dense<0.000000e+00> : vector<16xf32>
    %531 = vector.multi_reduction <add>, %530, %cst_226 [1] : vector<16x32xf32> to vector<16xf32>
    %532 = vector.shape_cast %531 : vector<16xf32> to vector<16x1xf32>
    %cst_227 = arith.constant 3.200000e+01 : f32
    %533 = vector.broadcast %cst_227 : f32 to vector<16x1xf32>
    %534 = arith.divf %532, %533 : vector<16x1xf32>
    %535 = vector.broadcast %527 : vector<16x1xf32> to vector<16x32xf32>
    %536 = arith.subf %523, %535 : vector<16x32xf32>
    %cst_228 = arith.constant 9.99999974E-6 : f32
    %537 = vector.broadcast %cst_228 : f32 to vector<16x1xf32>
    %538 = arith.addf %534, %537 : vector<16x1xf32>
    %539 = math.rsqrt %538 : vector<16x1xf32>
    %540 = vector.broadcast %539 : vector<16x1xf32> to vector<16x32xf32>
    %541 = arith.mulf %536, %540 : vector<16x32xf32>
    %c0_229 = arith.constant 0 : index
    %c0_230 = arith.constant 0 : index
    %542 = vector.load %arg21[%c0_229, %c0_230] : memref<1x32xf32, #tpu.memory_space<vmem>>, vector<1x32xf32>
    %543 = vector.broadcast %542 : vector<1x32xf32> to vector<16x32xf32>
    %544 = arith.mulf %541, %543 : vector<16x32xf32>
    %c0_231 = arith.constant 0 : index
    %c0_232 = arith.constant 0 : index
    %545 = vector.load %arg22[%c0_231, %c0_232] : memref<1x32xf32, #tpu.memory_space<vmem>>, vector<1x32xf32>
    %546 = vector.broadcast %545 : vector<1x32xf32> to vector<16x32xf32>
    %547 = arith.addf %544, %546 : vector<16x32xf32>
    %c0_233 = arith.constant 0 : index
    %c0_234 = arith.constant 0 : index
    %548 = vector.load %arg25[%c0_233, %c0_234] : memref<32x64xf32, #tpu.memory_space<vmem>>, vector<32x64xf32>
    %cst_235 = arith.constant dense<0.000000e+00> : vector<16x64xf32>
    %549 = tpu.matmul %547, %548, %cst_235 {dimension_numbers = #tpu.dot_dimension_numbers<[1], [0], [0], [1], [0, 0, 1, 1], [], []>} : vector<16x32xf32>, vector<32x64xf32>, vector<16x64xf32> -> vector<16x64xf32>
    %c0_236 = arith.constant 0 : index
    %c0_237 = arith.constant 0 : index
    %550 = vector.load %arg26[%c0_236, %c0_237] : memref<1x64xf32, #tpu.memory_space<vmem>>, vector<1x64xf32>
    %551 = vector.broadcast %550 : vector<1x64xf32> to vector<16x64xf32>
    %552 = arith.addf %549, %551 : vector<16x64xf32>
    %cst_238 = arith.constant 0.000000e+00 : f32
    %553 = vector.broadcast %cst_238 : f32 to vector<16x64xf32>
    %554 = arith.maximumf %552, %553 : vector<16x64xf32>
    %c0_239 = arith.constant 0 : index
    %c0_240 = arith.constant 0 : index
    %555 = vector.load %arg27[%c0_239, %c0_240] : memref<64x32xf32, #tpu.memory_space<vmem>>, vector<64x32xf32>
    %cst_241 = arith.constant dense<0.000000e+00> : vector<16x32xf32>
    %556 = tpu.matmul %554, %555, %cst_241 {dimension_numbers = #tpu.dot_dimension_numbers<[1], [0], [0], [1], [0, 0, 1, 1], [], []>} : vector<16x64xf32>, vector<64x32xf32>, vector<16x32xf32> -> vector<16x32xf32>
    %c0_242 = arith.constant 0 : index
    %c0_243 = arith.constant 0 : index
    %557 = vector.load %arg28[%c0_242, %c0_243] : memref<1x32xf32, #tpu.memory_space<vmem>>, vector<1x32xf32>
    %558 = vector.broadcast %557 : vector<1x32xf32> to vector<16x32xf32>
    %559 = arith.addf %556, %558 : vector<16x32xf32>
    %560 = arith.addf %547, %559 : vector<16x32xf32>
    %cst_244 = arith.constant dense<0.000000e+00> : vector<16xf32>
    %561 = vector.multi_reduction <add>, %560, %cst_244 [1] : vector<16x32xf32> to vector<16xf32>
    %562 = vector.shape_cast %561 : vector<16xf32> to vector<16x1xf32>
    %cst_245 = arith.constant 3.200000e+01 : f32
    %563 = vector.broadcast %cst_245 : f32 to vector<16x1xf32>
    %564 = arith.divf %562, %563 : vector<16x1xf32>
    %565 = vector.broadcast %564 : vector<16x1xf32> to vector<16x32xf32>
    %566 = arith.subf %560, %565 : vector<16x32xf32>
    %567 = arith.mulf %566, %566 : vector<16x32xf32>
    %cst_246 = arith.constant dense<0.000000e+00> : vector<16xf32>
    %568 = vector.multi_reduction <add>, %567, %cst_246 [1] : vector<16x32xf32> to vector<16xf32>
    %569 = vector.shape_cast %568 : vector<16xf32> to vector<16x1xf32>
    %cst_247 = arith.constant 3.200000e+01 : f32
    %570 = vector.broadcast %cst_247 : f32 to vector<16x1xf32>
    %571 = arith.divf %569, %570 : vector<16x1xf32>
    %572 = vector.broadcast %564 : vector<16x1xf32> to vector<16x32xf32>
    %573 = arith.subf %560, %572 : vector<16x32xf32>
    %cst_248 = arith.constant 9.99999974E-6 : f32
    %574 = vector.broadcast %cst_248 : f32 to vector<16x1xf32>
    %575 = arith.addf %571, %574 : vector<16x1xf32>
    %576 = math.rsqrt %575 : vector<16x1xf32>
    %577 = vector.broadcast %576 : vector<16x1xf32> to vector<16x32xf32>
    %578 = arith.mulf %573, %577 : vector<16x32xf32>
    %c0_249 = arith.constant 0 : index
    %c0_250 = arith.constant 0 : index
    %579 = vector.load %arg23[%c0_249, %c0_250] : memref<1x32xf32, #tpu.memory_space<vmem>>, vector<1x32xf32>
    %580 = vector.broadcast %579 : vector<1x32xf32> to vector<16x32xf32>
    %581 = arith.mulf %578, %580 : vector<16x32xf32>
    %c0_251 = arith.constant 0 : index
    %c0_252 = arith.constant 0 : index
    %582 = vector.load %arg24[%c0_251, %c0_252] : memref<1x32xf32, #tpu.memory_space<vmem>>, vector<1x32xf32>
    %583 = vector.broadcast %582 : vector<1x32xf32> to vector<16x32xf32>
    %584 = arith.addf %581, %583 : vector<16x32xf32>
    %585 = vector.shape_cast %584 : vector<16x32xf32> to vector<2x8x32xf32>
    %c0_253 = arith.constant 0 : index
    %c0_254 = arith.constant 0 : index
    %c0_255 = arith.constant 0 : index
    %586 = vector.load %arg29[%c0_253, %c0_254, %c0_255] : memref<2x8x32xf32, #tpu.memory_space<vmem>>, vector<2x8x32xf32>
    tpu.vector_store %arg29[%c0_253, %c0_254, %c0_255], %585 {strides = array<i32>} : memref<2x8x32xf32, #tpu.memory_space<vmem>>, vector<2x8x32xf32>,
    %c0_256 = arith.constant 0 : index
    %c0_257 = arith.constant 0 : index
    %c0_258 = arith.constant 0 : index
    %587 = vector.load %arg30[%c0_256, %c0_257, %c0_258] : memref<2x8x8xf32, #tpu.memory_space<vmem>>, vector<2x8x8xf32>
    tpu.vector_store %arg30[%c0_256, %c0_257, %c0_258], %425 {strides = array<i32>} : memref<2x8x8xf32, #tpu.memory_space<vmem>>, vector<2x8x8xf32>,
    %c0_259 = arith.constant 0 : index
    %c0_260 = arith.constant 0 : index
    %c0_261 = arith.constant 0 : index
    %588 = vector.load %arg31[%c0_259, %c0_260, %c0_261] : memref<2x8x8xf32, #tpu.memory_space<vmem>>, vector<2x8x8xf32>
    tpu.vector_store %arg31[%c0_259, %c0_260, %c0_261], %452 {strides = array<i32>} : memref<2x8x8xf32, #tpu.memory_space<vmem>>, vector<2x8x8xf32>,
    return
  }
}

</mosaic_0001>

<bundles_post_ra>
// kernel: decoder_pallas.1
= control target key start
LH: loop header
LB: loop body
LE: loop exit
PB: predicated region body
PF: predicated region fallthrough
CT: control target
= control target key end

     0   :  { %s7484_s6 = smov 1   ;;  %s7485_s10 = smov 2   ;;  %s8509_s0 = inlined_call_operand.smem [shape: u32[32], index: -1, kind: input, shape index: {}] }
   0x1   :  { %s7534_s5 = sld [smem:[%s8509_s0]]   ;;  %s7486_s14 = smov 3  }
   0x2   :  { %s7539_s9 = sld [smem:[%s8509_s0 + %s7484_s6]]   ;;  %s7487_s18 = smov 4  }
   0x3   :  { %s7544_s13 = sld [smem:[%s8509_s0 + %s7485_s10]]   ;;  %s7488_s22 = smov 5  }
   0x4   :  { %s7549_s17 = sld [smem:[%s8509_s0 + %s7486_s14]]   ;;  %s7489_s26 = smov 6  }
   0x5   :  { %s7554_s21 = sld [smem:[%s8509_s0 + %s7487_s18]]   ;;  %s7490_s30 = smov 7  }
   0x6   :  { %s7559_s25 = sld [smem:[%s8509_s0 + %s7488_s22]]   ;;  %s7491_s4 = smov 8  }
   0x7   :  { %s7564_s29 = sld [smem:[%s8509_s0 + %s7489_s26]]   ;;  %s7492_s10 = smov 9  }
   0x8   :  { %s7569_s3 = sld [smem:[%s8509_s0 + %s7490_s30]]   ;;  %s7493_s15 = smov 10  }
   0x9   :  { %s7574_s8 = sld [smem:[%s8509_s0 + %s7491_s4]]   ;;  %s7494_s20 = smov 11  }
   0xa   :  { %8522 = sst [smem:[#allocation5_spill]] %s7549_s17  ;;  %s7495_s26 = smov 12  }
   0xb   :  { %s7579_s14 = sld [smem:[%s8509_s0 + %s7492_s10]]   ;;  %s7496_s1 = smov 13  }
   0xc   :  { %s7584_s19 = sld [smem:[%s8509_s0 + %s7493_s15]]   ;;  %s7497_s7 = smov 14  }
   0xd   :  { %s7589_s24 = sld [smem:[%s8509_s0 + %s7494_s20]]   ;;  %s7498_s15 = smov 15  }
   0xe   :  { %s7594_s30 = sld [smem:[%s8509_s0 + %s7495_s26]]   ;;  %s7499_s22 = smov 16  }
   0xf   :  { %s7599_s6 = sld [smem:[%s8509_s0 + %s7496_s1]]   ;;  %s7500_s28 = smov 17  }
  0x10   :  { %s7604_s12 = sld [smem:[%s8509_s0 + %s7497_s7]]   ;;  %s7501_s7 = smov 18  }
  0x11   :  { %s7609_s20 = sld [smem:[%s8509_s0 + %s7498_s15]]   ;;  %s7502_s15 = smov 19  }
  0x12   :  { %8523 = sst [smem:[#allocation6_spill]] %s7584_s19 }
  0x13   :  { %s7614_s27 = sld [smem:[%s8509_s0 + %s7499_s22]]   ;;  %s7503_s22 = smov 20  }
  0x14   :  { %s7619_s4 = sld [smem:[%s8509_s0 + %s7500_s28]]   ;;  %s7504_s28 = smov 21  }
  0x16   :  { %8524 = sst [smem:[#allocation7_spill]] %s7604_s12 }
  0x17   :  { %8525 = sst [smem:[#allocation8_spill]] %s7609_s20 }
  0x18   :  { %s7624_s12 = sld [smem:[%s8509_s0 + %s7501_s7]]   ;;  %s7505_s7 = smov 22  }
  0x19   :  { %8526 = sst [smem:[#allocation9_spill]] %s7614_s27 }
  0x1a   :  { %8527 = sst [smem:[#allocation10_spill]] %s7619_s4 }
  0x1b   :  { %s7629_s20 = sld [smem:[%s8509_s0 + %s7502_s15]]   ;;  %s7506_s15 = smov 23  }
  0x1c   :  { %s7634_s27 = sld [smem:[%s8509_s0 + %s7503_s22]]   ;;  %s7507_s22 = smov 24  }
  0x1d   :  { %s7639_s4 = sld [smem:[%s8509_s0 + %s7504_s28]]   ;;  %s7508_s28 = smov 25  }
  0x1e   :  { %8528 = sst [smem:[#allocation11_spill]] %s7624_s12 }
  0x1f   :  { %s7644_s12 = sld [smem:[%s8509_s0 + %s7505_s7]]   ;;  %s7509_s7 = smov 26  }
  0x20   :  { %s7649_s17 = sld [smem:[%s8509_s0 + %s7506_s15]]   ;;  %s7510_s15 = smov 27  }
  0x21   :  { %s7654_s19 = sld [smem:[%s8509_s0 + %s7507_s22]]   ;;  %s7511_s22 = smov 28  }
  0x23   :  { %8529 = sst [smem:[#allocation12_spill]] %s7639_s4 }
  0x24   :  { %s7659_s4 = sld [smem:[%s8509_s0 + %s7508_s28]]   ;;  %s7512_s28 = smov 29  }
  0x25   :  { %8530 = sst [smem:[#allocation13_spill]] %s7644_s12 }
  0x26   :  { %8531 = sst [smem:[#allocation14_spill]] %s7649_s17 }
  0x27   :  { %8532 = sst [smem:[#allocation15_spill]] %s7654_s19 }
  0x28   :  { %s7664_s12 = sld [smem:[%s8509_s0 + %s7509_s7]]   ;;  %s7513_s7 = smov 30  }
  0x29   :  { %s7669_s17 = sld [smem:[%s8509_s0 + %s7510_s15]]   ;;  %s7514_s15 = smov 31  }
  0x2a   :  { %8533 = sst [smem:[#allocation16_spill]] %s7659_s4 }
  0x2b   :  { %s7674_s19 = sld [smem:[%s8509_s0 + %s7511_s22]]  }
  0x2c   :  { %s7679_s4 = sld [smem:[%s8509_s0 + %s7512_s28]]  }
  0x2e   :  { %8534 = sst [smem:[#allocation17_spill]] %s7664_s12 }
  0x2f   :  { %8535 = sst [smem:[#allocation18_spill]] %s7669_s17 }
  0x30   :  { %s7684_s12 = sld [smem:[%s8509_s0 + %s7513_s7]]  }
  0x31   :  { %s7689_s17 = sld [smem:[%s8509_s0 + %s7514_s15]]  }
  0x32   :  { %v355_v0 = vld [vmem:[%s7559_s25] sm:$0xff]  ;;  %v356_v1 = vld [vmem:[%s7559_s25 + $0x8] sm:$0xff]  ;;  %v357_v2 = vld [vmem:[%s7559_s25 + $0x10] sm:$0xff]  ;;  %vm143_vm0 = vcmask 261120  }
  0x33   :  { %v7694_v3 = vpack.c.bf16 %v356_v1, %v355_v0  ;;  %v358_v4 = vld [vmem:[%s7559_s25 + $0x18] sm:$0xff]  ;;  %v7698_v5 = vld [vmem:[%s7539_s9] sm:$0xff] }
  0x34   :  { %v7700_v6 = vpack.c.bf16 %v358_v4, %v357_v2  ;;  %6697 = vmatprep.mubr.msk.f32.mxu0 %vm143_vm0, %v7698_v5 }
  0x35   :  { %69 = vsyncpa [#allocation3], 0  ;;  %7134 = vmatprep.subr.bf16.mxu0 %v7694_v3  ;;  %v7709_v7 = vld [vmem:[%s7539_s9 + $0x8] sm:$0xff]  ;;  %v132_v8 = vld [vmem:[%s7589_s24] sm:$0xff]  ;;  %v7515_v24 = vmov 0.0   ;;  %vm7516_vm1 = vmmov 0  }
  0x36   :  { %7136 = vmatpush3.bf16.msra.mxu0 %v7694_v3  ;;  %v133_v9 = vld [vmem:[%s7589_s24 + $0x8] sm:$0xff]  ;;  %v134_v10 = vld [vmem:[%s7589_s24 + $0x10] sm:$0xff]  ;;  %v135_v12 = vld [vmem:[%s7589_s24 + $0x18] sm:$0xff]  ;;  %s7517_s0 = smov 96   ;;  %vm450_vm2 = vcmask 130048   ;;  %vm608_vm4 = vcmask 64512  }
  0x37   :  { %7138 = vmatprep.subr.bf16.mxu0 %v7700_v6  ;;  %v7117_v11 = vpack.c.bf16 %v133_v9, %v132_v8  ;;  %v128_v13 = vld [vmem:[%s7534_s5] sm:$0xff]  ;;  %v7121_v14 = vpack.c.bf16 %v135_v12, %v134_v10  ;;  %v226_v16 = vld [vmem:[%s7599_s6 + $0x8] sm:$0xff]  ;;  %v227_v18 = vld [vmem:[%s7599_s6 + $0x10] sm:$0xff]  ;;  %s7519_s9 = smov 80   ;;  %s8536_s25 = sld [smem:[#allocation6_spill]]  ;;  %vm3272_vm8 = vcmask 523264  }
  0x38   :  { %6675 = vmatprep.mubr.msk.f32.mxu1 %vm143_vm0, %v128_v13  ;;  %v225_v15 = vld [vmem:[%s7599_s6] sm:$0xff]  ;;  %v228_v19 = vld [vmem:[%s7599_s6 + $0x18] sm:$0xff]  ;;  %v129_v20 = vld [vmem:[%s7534_s5 + $0x8] sm:$0xff]  ;;  %s7518_s5 = smov 64   ;;  %s8539_s24 = sld [smem:[#allocation8_spill]] }
  0x39   :  { %7118 = vmatprep.subr.bf16.mxu1 %v7117_v11  ;;  %v7125_v17 = vpack.c.bf16 %v226_v16, %v225_v15  ;;  %v7129_v21 = vpack.c.bf16 %v228_v19, %v227_v18  ;;  %v130_v22 = vld [vmem:[%s7544_s13] sm:$0xff]  ;;  %v131_v23 = vld [vmem:[%s7544_s13 + $0x8] sm:$0xff]  ;;  %s7520_s13 = smov 112   ;;  %s8541_s6 = sld [smem:[#allocation9_spill]] }
  0x3a   :  { %7140 = vmatpush3.bf16.msra.mxu0 %v7700_v6  ;;  %7120 = vmatpush3.bf16.msra.mxu1 %v7117_v11  ;;  %v6330_v25 = vld [vmem:[%s7564_s29] ss:$0 sm:$0xff]  ;;  %v7773_v42 = vld [vmem:[%s7554_s21 + $0x8] sm:$0xff]  ;;  %s8542_s22 = sld [smem:[#allocation11_spill]]  ;;  %s8543_s23 = sld [smem:[#allocation16_spill]] }
  0x3b   :  { %7122 = vmatprep.subr.bf16.mxu1 %v7121_v14  ;;  %6710 = vmatprep.subr.mxu0 %v7515_v24  ;;  %v7745_v30 = vld [vmem:[%s7594_s30] ss:$0 sm:$0xff]  ;;  %vm605_vm5 = vcmp.gt.f32.partialorder %v7773_v42, 0.0  ;;  %s8540_s30 = sld [smem:[#allocation10_spill]]  ;;  %s8545_s28 = sld [smem:[#allocation12_spill]] }
  0x3c   :  { %v7769_v38 = vld [vmem:[%s7554_s21] sm:$0xff]  ;;  %s7521_s21 = smov 48   ;;  %s8544_s26 = sld [smem:[#allocation18_spill]] }
  0x3d   :  { %6698 = vmatmul.mubr.msk.f32.vlgmr.msra.gmra.mrb[0].mxu0 %vm143_vm0, %v7709_v7  ;;  %vm604_vm3 = vcmp.gt.f32.partialorder %v7769_v38, 0.0  ;;  %s8546_s1 = sld [smem:[#allocation13_spill]]  ;;  %s8547_s2 = sld [smem:[#allocation17_spill]] }
  0x3e   :  { %7124 = vmatpush3.bf16.msra.mxu1 %v7121_v14  ;;  %6712 = vmatprep.mubr.msk.f32.mxu0 %vm7516_vm1, %v7515_v24  ;;  %s8548_s7 = sld [smem:[#allocation14_spill]]  ;;  %s8549_s10 = sld [smem:[#allocation15_spill]] }
  0x3f   :  { %7126 = vmatprep.subr.bf16.mxu1 %v7125_v17 }
  0x41   :  { %6676 = vmatmul.mubr.msk.f32.vlgmr.msra.gmra.mrb[0].mxu1 %vm143_vm0, %v129_v20 }
  0x42   :  { %7128 = vmatpush3.bf16.msra.mxu1 %v7125_v17  ;;  %6686 = vmatprep.mubr.msk.f32.mxu1 %vm143_vm0, %v130_v22 }
  0x43   :  { %7130 = vmatprep.subr.bf16.mxu1 %v7129_v21 }
  0x46   :  { %7132 = vmatpush3.bf16.msra.mxu1 %v7129_v21 }
  0x47   :  { %6700 = vmatprep.subr.mxu1 %v7515_v24 }
  0x49   :  { %6687 = vmatmul.mubr.msk.f32.vlgmr.msra.gmra.mrb[2].mxu1 %vm143_vm0, %v131_v23 }
  0x4a   :  { %6702 = vmatprep.mubr.msk.f32.mxu1 %vm7516_vm1, %v7515_v24 }
 0x110   :  { %v6699_v26 = vpop.f32.mrb[0].mxu0 }
 0x111   :  { %v438_v27 = vpop.f32.mrb[1].mxu0  ;;  %v7740_v29 = vadd.f32 %v6699_v26, %v6330_v25 }
 0x112   :  { %v7736_v28 = vadd.f32 %v6330_v25, %v438_v27 }
 0x114   :  { %448 = vrot.lane.b32.xlu0 %v7736_v28, %s7517_s0  ;;  %v6677_v31 = vpop.f32.mrb[0].mxu1 }
 0x115   :  { %v7748_v32 = vadd.f32 %v6677_v31, %v7745_v30  ;;  %v7750_v33 = vpop.f32.mrb[1].mxu1 }
 0x118   :  { %526 = vrot.lane.b32.xlu0 %v7740_v29, %s7517_s0 }
 0x11c   :  { %v7752_v34 = vpop.f32.mrb[2].mxu1 }
 0x11d   :  { %v7754_v35 = vpop.f32.mrb[3].mxu1 }
 0x186   :  { %v449_v36 = vpop.permute.xlu0 %448 }
 0x187   :  { %6701 = vmatpush3.xpose.msk.msra.mxu1 %vm450_vm2, %v449_v36 }
 0x188   :  { %6705 = vmatprep.subr.mxu1 %v7515_v24 }
 0x18a   :  { %v527_v37 = vpop.permute.xlu0 %526  ;;  %6703 = vmatmul.mubr.msk.f32.vlgmr.msra.gmra.mrb[4].mxu1 %vm450_vm2, %v7736_v28 }
 0x18b   :  { %6706 = vmatpush3.xpose.msk.msra.mxu1 %vm450_vm2, %v527_v37  ;;  %6707 = vmatprep.mubr.msk.f32.mxu1 %vm7516_vm1, %v7515_v24 }
 0x18c   :  { %6715 = vmatprep.subr.mxu1 %v7515_v24 }
 0x18e   :  { %6708 = vmatmul.mubr.msk.f32.vlgmr.msra.gmra.mrb[6].mxu1 %vm450_vm2, %v7740_v29 }
 0x18f   :  { %6717 = vmatprep.mubr.msk.f32.mxu1 %vm7516_vm1, %v7515_v24 }
 0x25d   :  { %v521_v39 = vpop.f32.mrb[4].mxu1 }
 0x25e   :  { %v602_v40 = vmul.f32 0.25, %v521_v39  ;;  %v6704_v41 = vpop.f32.mrb[5].mxu1 }
 0x260   :  { %v606_v43 = vsel %vm604_vm3, %v602_v40, -1e+09 }
 0x261   :  { %v598_v44 = vpop.f32.mrb[6].mxu1  ;;  %v609_v45 = vsel %vm608_vm4, %v606_v43, -inf }
 0x262   :  { %v603_v46 = vmul.f32 0.25, %v598_v44  ;;  %610 = vmax.xlane.f32.xlu1 %v609_v45  ;;  %v6709_v47 = vpop.f32.mrb[7].mxu1 }
 0x264   :  { %v607_v48 = vsel %vm605_vm5, %v603_v46, -1e+09 }
 0x265   :  { %v612_v49 = vsel %vm608_vm4, %v607_v48, -inf }
 0x266   :  { %613 = vmax.xlane.f32.xlu1 %v612_v49 }
 0x277   :  { %631 = vrot.lane.b32.xlu1 %v7736_v28, %s7518_s5 }
 0x27b   :  { %707 = vrot.lane.b32.xlu1 %v7740_v29, %s7518_s5 }
 0x27f   :  { %787 = vrot.lane.b32.xlu1 %v7736_v28, %s7519_s9 }
 0x283   :  { %865 = vrot.lane.b32.xlu1 %v7740_v29, %s7519_s9 }
 0x2ef   :  { %v611_v50 = vpop.xlane.xlu1 %610 }
 0x2f0   :  { %v615_v51 = vsub.f32 %v606_v43, %v611_v50 }
 0x2f2   :  { %v617_v52 = vmul.f32 1.442695, %v615_v51 }
 0x2f3   :  { %v614_v53 = vpop.xlane.xlu1 %613 }
 0x2f4   :  { %7327 = vpow2.f32 %v617_v52  ;;  %v616_v54 = vsub.f32 %v607_v48, %v614_v53  ;;  %v1119_v53 = vld [vmem:[%s7569_s3 + $0x10] sm:$0xff] }
 0x2f6   :  { %v619_v55 = vmul.f32 1.442695, %v616_v54  ;;  %v1120_v54 = vld [vmem:[%s7569_s3 + $0x18] sm:$0xff] }
 0x2f7   :  { %v632_v56 = vpop.permute.xlu1 %631 }
 0x2f8   :  { %7329 = vpow2.f32 %v619_v55  ;;  %6711 = vmatpush3.msra.mxu0 %v632_v56  ;;  %v7834_v55 = vpack.c.bf16 %v1120_v54, %v1119_v53  ;;  %v784_v56 = vld [vmem:[%s7569_s3 + $0x8] sm:$0xff]  ;;  %v7522_v54 = vmov 1966171168  }
 0x2f9   :  { %6720 = vmatprep.subr.mxu0 %v7515_v24 }
 0x2fb   :  { %v708_v57 = vpop.permute.xlu1 %707 }
 0x2fc   :  { %6716 = vmatpush3.msra.mxu1 %v708_v57 }
 0x2fd   :  { %6725 = vmatprep.subr.mxu1 %v7515_v24 }
 0x2fe   :  { %v7328_v58 = vpop.eup %7327 }
 0x2ff   :  { %v621_v59 = vsel %vm608_vm4, %v7328_v58, 0.0  ;;  %v788_v62 = vpop.permute.xlu1 %787 }
 0x300   :  { %622 = vadd.xlane.f32.xlu0 %v621_v59 }
 0x302   :  { %v7330_v60 = vpop.eup %7329 }
 0x303   :  { %v624_v61 = vsel %vm608_vm4, %v7330_v60, 0.0  ;;  %v866_v63 = vpop.permute.xlu1 %865 }
 0x304   :  { %625 = vadd.xlane.f32.xlu1 %v624_v61 }
 0x315   :  { %863 = vrot.lane.b32.xlu1 %v7740_v29, %s7520_s13 }
 0x316   :  { %785 = vrot.lane.b32.xlu0 %v7736_v28, %s7520_s13 }
 0x38d   :  { %v623_v0 = vpop.xlane.xlu0 %622 }
 0x38e   :  { %7331 = vrcp.f32 %v623_v0 }
 0x391   :  { %v626_v1 = vpop.xlane.xlu1 %625  ;;  %v786_v10 = vpop.permute.xlu0 %785 }
 0x392   :  { %7333 = vrcp.f32 %v626_v1 }
 0x395   :  { %v864_v11 = vpop.permute.xlu1 %863 }
 0x398   :  { %v7332_v2 = vpop.eup %7331 }
 0x399   :  { %v629_v4 = vmul.f32 %v7332_v2, %v7328_v58 }
 0x39b   :  { %6713 = vmatmul.mubr.msk.f32.vlgmr.msra.gmra.mrb[2].mxu0 %vm608_vm4, %v629_v4 }
 0x39c   :  { %v7334_v8 = vpop.eup %7333  ;;  %6721 = vmatpush3.xpose.msk.msra.mxu0 %vm450_vm2, %v788_v62  ;;  %6722 = vmatprep.mubr.msk.f32.mxu0 %vm7516_vm1, %v7515_v24  ;;  %v7851_v62 = vadd.f32 %v7745_v30, %v7750_v33 }
 0x39d   :  { %v630_v9 = vmul.f32 %v7334_v8, %v7330_v60  ;;  %6730 = vmatprep.subr.mxu0 %v7515_v24 }
 0x39f   :  { %6718 = vmatmul.mubr.msk.f32.vlgmr.msra.gmra.mrb[8].mxu1 %vm608_vm4, %v630_v9  ;;  %6723 = vmatmul.mubr.msk.f32.vlgmr.msra.gmra.mrb[4].mxu0 %vm450_vm2, %v786_v10 }
 0x3a0   :  { %6726 = vmatpush3.xpose.msk.msra.mxu1 %vm450_vm2, %v866_v63  ;;  %6727 = vmatprep.mubr.msk.f32.mxu1 %vm7516_vm1, %v7515_v24  ;;  %v6349_v63 = vld [vmem:[%s7574_s8] ss:$0 sm:$0xff] }
 0x3a1   :  { %6735 = vmatprep.subr.mxu1 %v7515_v24  ;;  %6732 = vmatprep.mubr.msk.f32.mxu0 %vm7516_vm1, %v7515_v24 }
 0x3a3   :  { %6728 = vmatmul.mubr.msk.f32.vlgmr.msra.gmra.mrb[10].mxu1 %vm450_vm2, %v864_v11 }
 0x3a4   :  { %6737 = vmatprep.mubr.msk.f32.mxu1 %vm7516_vm1, %v7515_v24 }
 0x46e   :  { %v7814_v12 = vpop.f32.mrb[2].mxu0 }
 0x46f   :  { %v6714_v13 = vpop.f32.mrb[3].mxu0 }
 0x472   :  { %v7816_v14 = vpop.f32.mrb[8].mxu1  ;;  %v859_v15 = vpop.f32.mrb[4].mxu0 }
 0x473   :  { %v941_v16 = vmul.f32 0.25, %v859_v15  ;;  %v6719_v17 = vpop.f32.mrb[9].mxu1  ;;  %v6724_v18 = vpop.f32.mrb[5].mxu0 }
 0x474   :  { %v1339_v18 = vld [vmem:[%s7579_s14] sm:$0xff] }
 0x475   :  { %v943_v19 = vsel %vm604_vm3, %v941_v16, -1e+09 }
 0x476   :  { %v937_v20 = vpop.f32.mrb[10].mxu1  ;;  %v945_v21 = vsel %vm608_vm4, %v943_v19, -inf }
 0x477   :  { %v942_v22 = vmul.f32 0.25, %v937_v20  ;;  %946 = vmax.xlane.f32.xlu1 %v945_v21  ;;  %v6729_v23 = vpop.f32.mrb[11].mxu1  ;;  %v1341_v21 = vld [vmem:[%s7579_s14 + $0x10] sm:$0xff] }
 0x479   :  { %v944_v25 = vsel %vm605_vm5, %v942_v22, -1e+09  ;;  %v1342_v22 = vld [vmem:[%s7579_s14 + $0x18] sm:$0xff] }
 0x47a   :  { %v948_v26 = vsel %vm608_vm4, %v944_v25, -inf  ;;  %v7875_v23 = vpack.c.bf16 %v1342_v22, %v1341_v21 }
 0x47b   :  { %949 = vmax.xlane.f32.xlu0 %v948_v26 }
 0x491   :  { %1043 = vrot.lane.b32.xlu0 %v7740_v29, %s7521_s21 }
 0x504   :  { %v947_v27 = vpop.xlane.xlu1 %946 }
 0x505   :  { %v951_v31 = vsub.f32 %v943_v19, %v947_v27  ;;  %v1340_v19 = vld [vmem:[%s7579_s14 + $0x8] sm:$0xff]  ;;  %s8538_s14 = sld [smem:[#allocation7_spill]] }
 0x506   :  { %v7869_v20 = vpack.c.bf16 %v1340_v19, %v1339_v18 }
 0x507   :  { %v953_v36 = vmul.f32 1.442695, %v951_v31 }
 0x508   :  { %v950_v37 = vpop.xlane.xlu0 %949 }
 0x509   :  { %7335 = vpow2.f32 %v953_v36  ;;  %v952_v39 = vsub.f32 %v944_v25, %v950_v37 }
 0x50b   :  { %v955_v40 = vmul.f32 1.442695, %v952_v39 }
 0x50c   :  { %v1044_v41 = vpop.permute.xlu0 %1043 }
 0x50d   :  { %7337 = vpow2.f32 %v955_v40  ;;  %6736 = vmatpush3.msra.mxu1 %v1044_v41  ;;  %v6350_v40 = vld [vmem:[%s7629_s20] ss:$0 sm:$0xff] }
 0x50e   :  { %7150 = vmatprep.subr.bf16.mxu1 %v7869_v20 }
 0x513   :  { %v7336_v43 = vpop.eup %7335 }
 0x514   :  { %v957_v44 = vsel %vm608_vm4, %v7336_v43, 0.0 }
 0x515   :  { %958 = vadd.xlane.f32.xlu1 %v957_v44 }
 0x517   :  { %v7338_v45 = vpop.eup %7337 }
 0x518   :  { %v960_v46 = vsel %vm608_vm4, %v7338_v45, 0.0 }
 0x519   :  { %961 = vadd.xlane.f32.xlu1 %v960_v46 }
 0x52a   :  { %967 = vrot.lane.b32.xlu1 %v7736_v28, %s7521_s21  ;;  %v783_v28 = vld [vmem:[%s7569_s3] sm:$0xff]  ;;  %s8537_s3 = sld [smem:[#allocation5_spill]] }
 0x52b   :  { %v7840_v57 = vpack.c.bf16 %v784_v56, %v783_v28  ;;  %v330_v28 = vunpack.c.l.s4 %v7522_v54  ;;  %v332_v56 = vlaneseq }
 0x5a2   :  { %v959_v29 = vpop.xlane.xlu1 %958 }
 0x5a3   :  { %7339 = vrcp.f32 %v959_v29 }
 0x5a6   :  { %v962_v47 = vpop.xlane.xlu1 %961 }
 0x5a7   :  { %7341 = vrcp.f32 %v962_v47 }
 0x5aa   :  { %v968_v48 = vpop.permute.xlu1 %967 }
 0x5ab   :  { %6731 = vmatpush3.msra.mxu0 %v968_v48 }
 0x5ac   :  { %7142 = vmatprep.subr.bf16.mxu0 %v7834_v55 }
 0x5ad   :  { %v7340_v49 = vpop.eup %7339 }
 0x5ae   :  { %v965_v50 = vmul.f32 %v7340_v49, %v7336_v43  ;;  %v6352_v49 = vld [vmem:[%s8536_s25] ss:$0 sm:$0xff] }
 0x5b0   :  { %6733 = vmatmul.mubr.msk.f32.vlgmr.msra.gmra.mrb[6].mxu0 %vm608_vm4, %v965_v50 }
 0x5b1   :  { %v7342_v51 = vpop.eup %7341  ;;  %7144 = vmatpush3.bf16.msra.mxu0 %v7834_v55 }
 0x5b2   :  { %v966_v52 = vmul.f32 %v7342_v51, %v7338_v45  ;;  %7146 = vmatprep.subr.bf16.mxu0 %v7840_v57  ;;  %v6351_v45 = vld [vmem:[%s7634_s27] ss:$0 sm:$0xff] }
 0x5b4   :  { %6738 = vmatmul.mubr.msk.f32.vlgmr.msra.gmra.mrb[12].mxu1 %vm608_vm4, %v966_v52 }
 0x5b5   :  { %7152 = vmatpush3.bf16.msra.mxu1 %v7869_v20 }
 0x5b6   :  { %7154 = vmatprep.subr.bf16.mxu1 %v7875_v23 }
 0x5b9   :  { %7156 = vmatpush3.bf16.msra.mxu1 %v7875_v23 }
 0x5ba   :  { %6770 = vmatprep.subr.mxu1 %v7515_v24 }
 0x683   :  { %v1039_v58 = vpop.f32.mrb[6].mxu0 }
 0x684   :  { %v6734_v59 = vpop.f32.mrb[7].mxu0  ;;  %6744 = vmatprep.mubr.msk.f32.mxu0 %vm450_vm2, %v1039_v58  ;;  %v331_v58 = vunpack.c.0.s8 %v330_v28 }
 0x685   :  { %v333_v59 = vshrl.u32 %v332_v56, 7 }
 0x687   :  { %v1115_v60 = vpop.f32.mrb[12].mxu1 }
 0x688   :  { %v6739_v61 = vpop.f32.mrb[13].mxu1  ;;  %6745 = vmatmul.mubr.msk.f32.vlgmr.msra.gmra.mrb[8].mxu0 %vm450_vm2, %v1115_v60  ;;  %v6329_v60 = vld.sshfl [vmem:[%s8537_s3] sm:$0x11 pattern:$0x75316420] }
 0x689   :  { %7148 = vmatpush3.bf16.msra.mxu0 %v7840_v57  ;;  %6751 = vmatprep.mubr.msk.f32.mxu0 %vm450_vm2, %v7814_v12  ;;  %v328_v61 = vcombine.high %v6329_v60, %v6329_v60 }
 0x68a   :  { %6765 = vmatprep.subr.mxu0 %v7515_v24 }
 0x690   :  { %6752 = vmatmul.mubr.msk.f32.vlgmr.msra.gmra.mrb[8].mxu0 %vm450_vm2, %v7816_v14 }
 0x691   :  { %6767 = vmatprep.mubr.msk.f32.mxu0 %vm7516_vm1, %v7515_v24 }
 0x692   :  { %6766 = vmatpush3.xpose.msk.msra.mxu0 %vm450_vm2, %v7851_v62 }
 0x693   :  { %6775 = vmatprep.subr.mxu0 %v7515_v24 }
 0x763   :  { %v6753_v0 = vpop.f32.mrb[8].mxu0 }
 0x764   :  { %v1291_v1 = vadd.f32 %v6753_v0, %v6349_v63  ;;  %v1274_v2 = vpop.f32.mrb[9].mxu0 }
 0x765   :  { %v1290_v4 = vadd.f32 %v6349_v63, %v1274_v2  ;;  %v334_v63 = vsub.s32 %v331_v58, %v333_v59 }
 0x766   :  { %v1293_v8 = vadd.f32 %v1291_v1, %v7709_v7  ;;  %v345_v1 = vsub.s32 0, %v333_v59 }
 0x767   :  { %v1292_v30 = vadd.f32 %v1290_v4, %v7698_v5  ;;  %v342_v0 = vrot.slane %v328_v61, %v334_v63 }
 0x768   :  { %v1297_v33 = vsel %vm143_vm0, %v1293_v8, 0.0 }
 0x769   :  { %1298 = vadd.xlane.f32.xlu0 %v1297_v33  ;;  %v1294_v9 = vsel %vm143_vm0, %v1292_v30, 0.0  ;;  %v7909_v2 = vrot.slane %v342_v0, %v345_v1 }
 0x76a   :  { %1295 = vadd.xlane.f32.xlu1 %v1294_v9 }
 0x76b   :  { %vm1586_vm6 = vcmp.gt.f32.partialorder %v7909_v2, 0.0 }
 0x7f6   :  { %v1299_v10 = vpop.xlane.xlu0 %1298 }
 0x7f7   :  { %v1302_v11 = vmul.f32 0.03125, %v1299_v10  ;;  %v1296_v12 = vpop.xlane.xlu1 %1295 }
 0x7f8   :  { %v1301_v13 = vmul.f32 0.03125, %v1296_v12  ;;  %v335_v12 = vrot.slane %v6329_v60, %v334_v63 }
 0x7f9   :  { %v1304_v14 = vsub.f32 %v1293_v8, %v1302_v11 }
 0x7fa   :  { %v1303_v15 = vsub.f32 %v1292_v30, %v1301_v13  ;;  %v7919_v13 = vrot.slane %v335_v12, %v345_v1 }
 0x7fb   :  { %v1306_v16 = vmul.f32 %v1304_v14, %v1304_v14 }
 0x7fc   :  { %v1305_v7 = vmul.f32 %v1303_v15, %v1303_v15  ;;  %vm1585_vm7 = vcmp.gt.f32.partialorder %v7919_v13, 0.0 }
 0x7fd   :  { %v1310_v5 = vsel %vm143_vm0, %v1306_v16, 0.0 }
 0x7fe   :  { %1311 = vadd.xlane.f32.xlu0 %v1310_v5  ;;  %v1307_v17 = vsel %vm143_vm0, %v1305_v7, 0.0 }
 0x7ff   :  { %1308 = vadd.xlane.f32.xlu1 %v1307_v17 }
 0x88b   :  { %v1312_v25 = vpop.xlane.xlu0 %1311 }
 0x88c   :  { %v1314_v26 = vmul.f32 0.03125, %v1312_v25  ;;  %v1309_v27 = vpop.xlane.xlu1 %1308 }
 0x88d   :  { %v1313_v31 = vmul.f32 0.03125, %v1309_v27 }
 0x88e   :  { %v1316_v36 = vadd.f32 1e-05, %v1314_v26 }
 0x88f   :  { %v1315_v37 = vadd.f32 1e-05, %v1313_v31 }
 0x890   :  { %7343 = vrsqrt.f32 %v1316_v36 }
 0x891   :  { %7345 = vrsqrt.f32 %v1315_v37 }
 0x89a   :  { %v7344_v39 = vpop.eup %7343 }
 0x89b   :  { %v7346_v41 = vpop.eup %7345  ;;  %v1320_v43 = vmul.f32 %v7344_v39, %v1304_v14 }
 0x89c   :  { %v1319_v44 = vmul.f32 %v7346_v41, %v1303_v15 }
 0x89d   :  { %v1329_v46 = vmul.f32 %v6350_v40, %v1320_v43 }
 0x89e   :  { %v1328_v29 = vmul.f32 %v6350_v40, %v1319_v44 }
 0x89f   :  { %v7884_v48 = vadd.f32 %v6351_v45, %v1329_v46 }
 0x8a0   :  { %v7882_v47 = vadd.f32 %v6351_v45, %v1328_v29 }
 0x8a2   :  { %6762 = vmatprep.mubr.msk.f32.mxu1 %vm143_vm0, %v7882_v47 }
 0x8a3   :  { %6763 = vmatmul.mubr.msk.f32.vlgmr.msra.gmra.mrb[14].mxu1 %vm143_vm0, %v7884_v48 }
 0x8a4   :  { %6771 = vmatpush3.xpose.msk.msra.mxu1 %vm450_vm2, %v7748_v32  ;;  %6772 = vmatprep.mubr.msk.f32.mxu1 %vm7516_vm1, %v7515_v24 }
 0x8a5   :  { %6780 = vmatprep.subr.mxu1 %v7515_v24 }
 0x976   :  { %v6764_v50 = vpop.f32.mrb[14].mxu1 }
 0x977   :  { %v7896_v51 = vadd.f32 %v6764_v50, %v6352_v49  ;;  %v1422_v52 = vpop.f32.mrb[15].mxu1 }
 0x978   :  { %v7898_v53 = vadd.f32 %v6352_v49, %v1422_v52 }
 0x979   :  { %6773 = vmatmul.mubr.msk.f32.vlgmr.msra.gmra.mrb[16].mxu1 %vm450_vm2, %v7896_v51 }
 0x97a   :  { %6768 = vmatmul.mubr.msk.f32.vlgmr.msra.gmra.mrb[10].mxu0 %vm450_vm2, %v7898_v53  ;;  %6782 = vmatprep.mubr.msk.f32.mxu1 %vm7516_vm1, %v7515_v24 }
 0x97b   :  { %6777 = vmatprep.mubr.msk.f32.mxu0 %vm7516_vm1, %v7515_v24 }
 0xa4c   :  { %v1579_v4 = vpop.f32.mrb[16].mxu1 }
 0xa4d   :  { %v1584_v8 = vmul.f32 0.25, %v1579_v4  ;;  %v1503_v30 = vpop.f32.mrb[10].mxu0  ;;  %v6774_v33 = vpop.f32.mrb[17].mxu1 }
 0xa4e   :  { %v6769_v9 = vpop.f32.mrb[11].mxu0  ;;  %v1583_v14 = vmul.f32 0.25, %v1503_v30 }
 0xa4f   :  { %v1588_v10 = vsel %vm1586_vm6, %v1584_v8, -1e+09 }
 0xa50   :  { %v1592_v11 = vsel %vm608_vm4, %v1588_v10, -inf  ;;  %v1587_v15 = vsel %vm1585_vm7, %v1583_v14, -1e+09 }
 0xa51   :  { %1593 = vmax.xlane.f32.xlu1 %v1592_v11  ;;  %v1589_v16 = vsel %vm608_vm4, %v1587_v15, -inf }
 0xa62   :  { %1687 = vrot.lane.b32.xlu1 %v7748_v32, %s7517_s0 }
 0xa66   :  { %1843 = vrot.lane.b32.xlu1 %v7896_v51, %s7520_s13 }
 0xa8a   :  { %1590 = vmax.xlane.f32.xlu1 %v1589_v16 }
 0xa9b   :  { %1767 = vrot.lane.b32.xlu1 %v7851_v62, %s7520_s13 }
 0xa9f   :  { %1765 = vrot.lane.b32.xlu1 %v7898_v53, %s7520_s13 }
 0xade   :  { %v1594_v7 = vpop.xlane.xlu1 %1593 }
 0xadf   :  { %v1596_v5 = vsub.f32 %v1588_v10, %v1594_v7 }
 0xae1   :  { %v1599_v17 = vmul.f32 1.442695, %v1596_v5 }
 0xae2   :  { %v7929_v18 = vpop.permute.xlu1 %1687 }
 0xae3   :  { %7347 = vpow2.f32 %v1599_v17  ;;  %6781 = vmatpush3.msra.mxu1 %v7929_v18 }
 0xae4   :  { %6790 = vmatprep.subr.mxu1 %v7515_v24 }
 0xae6   :  { %v1844_v22 = vpop.permute.xlu1 %1843 }
 0xaed   :  { %v7348_v19 = vpop.eup %7347 }
 0xaee   :  { %v1604_v21 = vsel %vm608_vm4, %v7348_v19, 0.0 }
 0xaef   :  { %1605 = vadd.xlane.f32.xlu0 %v1604_v21 }
 0xb05   :  { %1845 = vrot.lane.b32.xlu0 %v7748_v32, %s7520_s13 }
 0xb17   :  { %v1591_v25 = vpop.xlane.xlu1 %1590 }
 0xb18   :  { %v1595_v26 = vsub.f32 %v1587_v15, %v1591_v25  ;;  %v6326_v15 = vld [vmem:[%s8538_s14] ss:$0 sm:$0xff] }
 0xb19   :  { %v7988_v5 = vadd.f32 %v6326_v15, %v7754_v35  ;;  %v7997_v17 = vadd.f32 %v7752_v34, %v6326_v15 }
 0xb1a   :  { %v1597_v27 = vmul.f32 1.442695, %v1595_v26 }
 0xb1b   :  { %v7954_v46 = vpop.permute.xlu1 %1767 }
 0xb1c   :  { %7349 = vpow2.f32 %v1597_v27 }
 0xb1f   :  { %v1766_v49 = vpop.permute.xlu1 %1765 }
 0xb26   :  { %v7350_v31 = vpop.eup %7349 }
 0xb27   :  { %v1601_v36 = vsel %vm608_vm4, %v7350_v31, 0.0 }
 0xb28   :  { %1602 = vadd.xlane.f32.xlu0 %v1601_v36 }
 0xb3e   :  { %1611 = vrot.lane.b32.xlu0 %v7851_v62, %s7517_s0 }
 0xb7c   :  { %v1606_v37 = vpop.xlane.xlu0 %1605 }
 0xb7d   :  { %7351 = vrcp.f32 %v1606_v37 }
 0xb80   :  { %v7939_v41 = vpop.permute.xlu0 %1845 }
 0xb87   :  { %v7352_v39 = vpop.eup %7351 }
 0xb88   :  { %v1610_v40 = vmul.f32 %v7352_v39, %v7348_v19 }
 0xb8a   :  { %6783 = vmatmul.mubr.msk.f32.vlgmr.msra.gmra.mrb[18].mxu1 %vm608_vm4, %v1610_v40 }
 0xb8b   :  { %6791 = vmatpush3.xpose.msk.msra.mxu1 %vm450_vm2, %v7939_v41  ;;  %6792 = vmatprep.mubr.msk.f32.mxu1 %vm7516_vm1, %v7515_v24 }
 0xb8c   :  { %6800 = vmatprep.subr.mxu1 %v7515_v24 }
 0xb8e   :  { %6793 = vmatmul.mubr.msk.f32.vlgmr.msra.gmra.mrb[20].mxu1 %vm450_vm2, %v1844_v22 }
 0xb8f   :  { %6802 = vmatprep.mubr.msk.f32.mxu1 %vm7516_vm1, %v7515_v24 }
 0xbb5   :  { %v1603_v43 = vpop.xlane.xlu0 %1602 }
 0xbb6   :  { %7353 = vrcp.f32 %v1603_v43 }
 0xbb9   :  { %v7950_v44 = vpop.permute.xlu0 %1611 }
 0xbba   :  { %6776 = vmatpush3.msra.mxu0 %v7950_v44 }
 0xbbb   :  { %6785 = vmatprep.subr.mxu0 %v7515_v24 }
 0xbc0   :  { %v7354_v45 = vpop.eup %7353 }
 0xbc1   :  { %v1609_v29 = vmul.f32 %v7354_v45, %v7350_v31 }
 0xbc3   :  { %6778 = vmatmul.mubr.msk.f32.vlgmr.msra.gmra.mrb[12].mxu0 %vm608_vm4, %v1609_v29 }
 0xbc4   :  { %6786 = vmatpush3.xpose.msk.msra.mxu0 %vm450_vm2, %v7954_v46  ;;  %6787 = vmatprep.mubr.msk.f32.mxu0 %vm7516_vm1, %v7515_v24 }
 0xbc5   :  { %6795 = vmatprep.subr.mxu0 %v7515_v24 }
 0xbc7   :  { %6788 = vmatmul.mubr.msk.f32.vlgmr.msra.gmra.mrb[14].mxu0 %vm450_vm2, %v1766_v49 }
 0xbc8   :  { %6797 = vmatprep.mubr.msk.f32.mxu0 %vm7516_vm1, %v7515_v24 }
 0xc5d   :  { %v7965_v50 = vpop.f32.mrb[18].mxu1 }
 0xc5e   :  { %v6784_v52 = vpop.f32.mrb[19].mxu1 }
 0xc61   :  { %v1917_v54 = vpop.f32.mrb[20].mxu1 }
 0xc62   :  { %v1922_v28 = vmul.f32 0.25, %v1917_v54  ;;  %v6794_v56 = vpop.f32.mrb[21].mxu1 }
 0xc64   :  { %v1924_v58 = vsel %vm1586_vm6, %v1922_v28, -1e+09 }
 0xc65   :  { %v1928_v59 = vsel %vm608_vm4, %v1924_v58, -inf }
 0xc66   :  { %1929 = vmax.xlane.f32.xlu0 %v1928_v59 }
 0xc7c   :  { %2023 = vrot.lane.b32.xlu0 %v7748_v32, %s7519_s9 }
 0xc80   :  { %2349 = vrot.lane.b32.xlu0 %v7896_v51, %s7517_s0 }
 0xc96   :  { %v7974_v60 = vpop.f32.mrb[12].mxu0 }
 0xc97   :  { %v6779_v61 = vpop.f32.mrb[13].mxu0 }
 0xc98   :  { %v2099_v61 = vld [vmem:[%s8539_s24 + $0x10] sm:$0xff] }
 0xc9a   :  { %v1839_v63 = vpop.f32.mrb[14].mxu0 }
 0xc9b   :  { %v6789_v0 = vpop.f32.mrb[15].mxu0  ;;  %v1921_v10 = vmul.f32 0.25, %v1839_v63  ;;  %v2100_v63 = vld [vmem:[%s8539_s24 + $0x18] sm:$0xff] }
 0xc9c   :  { %v8037_v0 = vpack.c.bf16 %v2100_v63, %v2099_v61 }
 0xc9d   :  { %v1923_v11 = vsel %vm1585_vm7, %v1921_v10, -1e+09 }
 0xc9e   :  { %v1925_v12 = vsel %vm608_vm4, %v1923_v11, -inf }
 0xcf3   :  { %v1930_v1 = vpop.xlane.xlu0 %1929 }
 0xcf4   :  { %v1932_v4 = vsub.f32 %v1924_v58, %v1930_v1  ;;  %v1763_v1 = vld [vmem:[%s8539_s24] sm:$0xff] }
 0xcf6   :  { %v1935_v8 = vmul.f32 1.442695, %v1932_v4  ;;  %v1764_v4 = vld [vmem:[%s8539_s24 + $0x8] sm:$0xff] }
 0xcf7   :  { %v7976_v30 = vpop.permute.xlu0 %2023 }
 0xcf8   :  { %7355 = vpow2.f32 %v1935_v8  ;;  %6801 = vmatpush3.msra.mxu1 %v7976_v30  ;;  %v8043_v8 = vpack.c.bf16 %v1764_v4, %v1763_v1 }
 0xcf9   :  { %6819 = vmatprep.subr.mxu1 %v7515_v24 }
 0xcfb   :  { %v2350_v35 = vpop.permute.xlu0 %2349 }
 0xd02   :  { %v7356_v33 = vpop.eup %7355 }
 0xd03   :  { %v1940_v9 = vsel %vm608_vm4, %v7356_v33, 0.0 }
 0xd04   :  { %1941 = vadd.xlane.f32.xlu1 %v1940_v9 }
 0xd15   :  { %2272 = vrot.lane.b32.xlu1 %v7898_v53, %s7517_s0 }
 0xd39   :  { %1926 = vmax.xlane.f32.xlu1 %v1925_v12 }
 0xd91   :  { %v1942_v14 = vpop.xlane.xlu1 %1941 }
 0xd92   :  { %7357 = vrcp.f32 %v1942_v14 }
 0xd95   :  { %v2273_v19 = vpop.permute.xlu1 %2272 }
 0xd9c   :  { %v7358_v16 = vpop.eup %7357 }
 0xd9d   :  { %v1946_v7 = vmul.f32 %v7358_v16, %v7356_v33 }
 0xd9f   :  { %6803 = vmatmul.mubr.msk.f32.vlgmr.msra.gmra.mrb[22].mxu1 %vm608_vm4, %v1946_v7 }
 0xda0   :  { %6820 = vmatpush3.xpose.msk.msra.mxu1 %vm450_vm2, %v7988_v5  ;;  %6821 = vmatprep.mubr.msk.f32.mxu1 %vm7516_vm1, %v7515_v24 }
 0xda1   :  { %6824 = vmatprep.subr.mxu1 %v7515_v24 }
 0xda3   :  { %6822 = vmatmul.mubr.msk.f32.vlgmr.msra.gmra.mrb[24].mxu1 %vm450_vm2, %v2273_v19 }
 0xda4   :  { %6825 = vmatpush3.xpose.msk.msra.mxu1 %vm450_vm2, %v7997_v17  ;;  %6826 = vmatprep.mubr.msk.f32.mxu1 %vm7516_vm1, %v7515_v24 }
 0xda5   :  { %6834 = vmatprep.subr.mxu1 %v7515_v24 }
 0xda7   :  { %6827 = vmatmul.mubr.msk.f32.vlgmr.msra.gmra.mrb[26].mxu1 %vm450_vm2, %v2350_v35 }
 0xda8   :  { %6836 = vmatprep.mubr.msk.f32.mxu1 %vm7516_vm1, %v7515_v24 }
 0xdc6   :  { %v1927_v21 = vpop.xlane.xlu1 %1926 }
 0xdc7   :  { %v1931_v34 = vsub.f32 %v1923_v11, %v1927_v21 }
 0xdc9   :  { %v1933_v22 = vmul.f32 1.442695, %v1931_v34 }
 0xdcb   :  { %7359 = vpow2.f32 %v1933_v22 }
 0xdd5   :  { %v7360_v25 = vpop.eup %7359 }
 0xdd6   :  { %v1937_v26 = vsel %vm608_vm4, %v7360_v25, 0.0 }
 0xdd7   :  { %1938 = vadd.xlane.f32.xlu0 %v1937_v26 }
 0xded   :  { %1947 = vrot.lane.b32.xlu0 %v7851_v62, %s7519_s9 }
 0xdf1   :  { %2528 = vrot.lane.b32.xlu0 %v7997_v17, %s7517_s0 }
 0xdf5   :  { %2608 = vrot.lane.b32.xlu0 %v7988_v5, %s7520_s13 }
 0xdf9   :  { %2686 = vrot.lane.b32.xlu0 %v7997_v17, %s7520_s13 }
 0xdfd   :  { %2606 = vrot.lane.b32.xlu0 %v7898_v53, %s7519_s9 }
 0xe64   :  { %v1939_v27 = vpop.xlane.xlu0 %1938 }
 0xe65   :  { %7361 = vrcp.f32 %v1939_v27 }
 0xe68   :  { %v8019_v31 = vpop.permute.xlu0 %1947 }
 0xe69   :  { %6796 = vmatpush3.msra.mxu0 %v8019_v31 }
 0xe6a   :  { %7158 = vmatprep.subr.bf16.mxu0 %v8037_v0 }
 0xe6c   :  { %v8022_v36 = vpop.permute.xlu0 %2528 }
 0xe6d   :  { %6835 = vmatpush3.msra.mxu1 %v8022_v36 }
 0xe6e   :  { %6844 = vmatprep.subr.mxu1 %v7515_v24 }
 0xe6f   :  { %v7362_v37 = vpop.eup %7361 }
 0xe70   :  { %v1945_v39 = vmul.f32 %v7362_v37, %v7360_v25 }
 0xe72   :  { %6798 = vmatmul.mubr.msk.f32.vlgmr.msra.gmra.mrb[16].mxu0 %vm608_vm4, %v1945_v39  ;;  %v2095_v40 = vpop.f32.mrb[22].mxu1 }
 0xe73   :  { %v6804_v53 = vpop.f32.mrb[23].mxu1  ;;  %7160 = vmatpush3.bf16.msra.mxu0 %v8037_v0 }
 0xe74   :  { %7162 = vmatprep.subr.bf16.mxu0 %v8043_v8 }
 0xe76   :  { %v2345_v43 = vpop.f32.mrb[24].mxu1 }
 0xe77   :  { %v2426_v45 = vmul.f32 0.25, %v2345_v43  ;;  %v6823_v29 = vpop.f32.mrb[25].mxu1 }
 0xe79   :  { %v2428_v49 = vsel %vm1585_vm7, %v2426_v45, -1e+09 }
 0xe7a   :  { %v2422_v52 = vpop.f32.mrb[26].mxu1  ;;  %v2430_v54 = vsel %vm608_vm4, %v2428_v49, -inf }
 0xe7b   :  { %v2427_v28 = vmul.f32 0.25, %v2422_v52  ;;  %v6828_v56 = vpop.f32.mrb[27].mxu1  ;;  %2431 = vmax.xlane.f32.xlu1 %v2430_v54 }
 0xe7d   :  { %v2429_v58 = vsel %vm1586_vm6, %v2427_v28, -1e+09 }
 0xe7e   :  { %v2433_v59 = vsel %vm608_vm4, %v2429_v58, -inf }
 0xe7f   :  { %2434 = vmax.xlane.f32.xlu1 %v2433_v59 }
 0xe90   :  { %2452 = vrot.lane.b32.xlu1 %v7988_v5, %s7517_s0 }
 0xf08   :  { %v2432_v33 = vpop.xlane.xlu1 %2431 }
 0xf09   :  { %v2436_v9 = vsub.f32 %v2428_v49, %v2432_v33 }
 0xf0b   :  { %v2438_v10 = vmul.f32 1.442695, %v2436_v9 }
 0xf0c   :  { %v2435_v11 = vpop.xlane.xlu1 %2434 }
 0xf0d   :  { %7363 = vpow2.f32 %v2438_v10  ;;  %v2437_v12 = vsub.f32 %v2429_v58, %v2435_v11 }
 0xf0f   :  { %v2440_v14 = vmul.f32 1.442695, %v2437_v12 }
 0xf10   :  { %v8056_v34 = vpop.permute.xlu1 %2452 }
 0xf11   :  { %7365 = vpow2.f32 %v2440_v14 }
 0xf17   :  { %v7364_v15 = vpop.eup %7363 }
 0xf18   :  { %v2442_v16 = vsel %vm608_vm4, %v7364_v15, 0.0 }
 0xf19   :  { %2443 = vadd.xlane.f32.xlu1 %v2442_v16 }
 0xf1b   :  { %v7366_v7 = vpop.eup %7365 }
 0xf1c   :  { %v2445_v19 = vsel %vm608_vm4, %v7366_v7, 0.0 }
 0xf1d   :  { %2446 = vadd.xlane.f32.xlu1 %v2445_v19 }
 0xf2e   :  { %2684 = vrot.lane.b32.xlu1 %v7896_v51, %s7519_s9 }
 0xf45   :  { %v2019_v35 = vpop.f32.mrb[16].mxu0 }
 0xf46   :  { %v6799_v21 = vpop.f32.mrb[17].mxu0  ;;  %6809 = vmatprep.mubr.msk.f32.mxu0 %vm450_vm2, %v2019_v35 }
 0xf47   :  { %6810 = vmatmul.mubr.msk.f32.vlgmr.msra.gmra.mrb[18].mxu0 %vm450_vm2, %v2095_v40 }
 0xf48   :  { %6816 = vmatprep.mubr.msk.f32.mxu0 %vm450_vm2, %v7974_v60  ;;  %7164 = vmatpush3.bf16.msra.mxu0 %v8043_v8  ;;  %v8064_v60 = vpop.permute.xlu0 %2608 }
 0xf49   :  { %6829 = vmatprep.subr.mxu0 %v7515_v24 }
 0xf4c   :  { %v8066_v26 = vpop.permute.xlu0 %2686 }
 0xf4f   :  { %6817 = vmatmul.mubr.msk.f32.vlgmr.msra.gmra.mrb[18].mxu0 %vm450_vm2, %v7965_v50 }
 0xf50   :  { %6830 = vmatpush3.msra.mxu0 %v8056_v34  ;;  %6831 = vmatprep.mubr.msk.f32.mxu0 %vm7516_vm1, %v7515_v24  ;;  %v2607_v39 = vpop.permute.xlu0 %2606 }
 0xf51   :  { %6839 = vmatprep.subr.mxu0 %v7515_v24 }
 0xfa6   :  { %v2444_v51 = vpop.xlane.xlu1 %2443 }
 0xfa7   :  { %7367 = vrcp.f32 %v2444_v51 }
 0xfaa   :  { %v2447_v22 = vpop.xlane.xlu1 %2446 }
 0xfab   :  { %7369 = vrcp.f32 %v2447_v22 }
 0xfae   :  { %v2685_v40 = vpop.permute.xlu1 %2684 }
 0xfb1   :  { %v7368_v25 = vpop.eup %7367 }
 0xfb2   :  { %v2450_v27 = vmul.f32 %v7368_v25, %v7364_v15 }
 0xfb4   :  { %6832 = vmatmul.mubr.msk.f32.vlgmr.msra.gmra.mrb[20].mxu0 %vm608_vm4, %v2450_v27 }
 0xfb5   :  { %v7370_v50 = vpop.eup %7369  ;;  %6840 = vmatpush3.xpose.msk.msra.mxu0 %vm450_vm2, %v8064_v60  ;;  %6841 = vmatprep.mubr.msk.f32.mxu0 %vm7516_vm1, %v7515_v24 }
 0xfb6   :  { %v2451_v37 = vmul.f32 %v7370_v50, %v7366_v7  ;;  %6849 = vmatprep.subr.mxu0 %v7515_v24 }
 0xfb8   :  { %6837 = vmatmul.mubr.msk.f32.vlgmr.msra.gmra.mrb[28].mxu1 %vm608_vm4, %v2451_v37  ;;  %6842 = vmatmul.mubr.msk.f32.vlgmr.msra.gmra.mrb[22].mxu0 %vm450_vm2, %v2607_v39  ;;  %v2940_v37 = vld [vmem:[%s8540_s30 + $0x10] sm:$0xff]  ;;  %v2941_v39 = vld [vmem:[%s8540_s30 + $0x18] sm:$0xff] }
 0xfb9   :  { %6845 = vmatpush3.xpose.msk.msra.mxu1 %vm450_vm2, %v8066_v26  ;;  %6846 = vmatprep.mubr.msk.f32.mxu1 %vm7516_vm1, %v7515_v24 }
 0xfba   :  { %6854 = vmatprep.subr.mxu1 %v7515_v24  ;;  %6851 = vmatprep.mubr.msk.f32.mxu0 %vm7516_vm1, %v7515_v24 }
 0xfbc   :  { %6847 = vmatmul.mubr.msk.f32.vlgmr.msra.gmra.mrb[30].mxu1 %vm450_vm2, %v2685_v40  ;;  %v8108_v40 = vpack.c.bf16 %v2941_v39, %v2940_v37  ;;  %v3164_v37 = vld [vmem:[%s8543_s23 + $0x8] sm:$0xff] }
 0xfbd   :  { %6856 = vmatprep.mubr.msk.f32.mxu1 %vm7516_vm1, %v7515_v24 }
0x1087   :  { %v2524_v53 = vpop.f32.mrb[20].mxu0 }
0x1088   :  { %v6833_v43 = vpop.f32.mrb[21].mxu0 }
0x1089   :  { %v2604_v43 = vld [vmem:[%s8540_s30] sm:$0xff] }
0x108b   :  { %v2600_v45 = vpop.f32.mrb[28].mxu1  ;;  %v2680_v29 = vpop.f32.mrb[22].mxu0 }
0x108c   :  { %v2762_v49 = vmul.f32 0.25, %v2680_v29  ;;  %v6838_v52 = vpop.f32.mrb[29].mxu1  ;;  %v6843_v54 = vpop.f32.mrb[23].mxu0  ;;  %v2605_v29 = vld [vmem:[%s8540_s30 + $0x8] sm:$0xff] }
0x108e   :  { %v2764_v28 = vsel %vm1585_vm7, %v2762_v49, -1e+09  ;;  %v8114_v49 = vpack.c.bf16 %v2605_v29, %v2604_v43  ;;  %v3165_v43 = vld [vmem:[%s8543_s23 + $0x10] sm:$0xff]  ;;  %v3166_v29 = vld [vmem:[%s8543_s23 + $0x18] sm:$0xff] }
0x108f   :  { %v2758_v56 = vpop.f32.mrb[30].mxu1  ;;  %v2766_v58 = vsel %vm608_vm4, %v2764_v28, -inf }
0x1090   :  { %v2763_v59 = vmul.f32 0.25, %v2758_v56  ;;  %v6848_v61 = vpop.f32.mrb[31].mxu1  ;;  %2767 = vmax.xlane.f32.xlu0 %v2766_v58  ;;  %v6371_v58 = vld [vmem:[%s8541_s6] ss:$0 sm:$0xff] }
0x1091   :  { %v6388_v61 = vld [vmem:[%s8542_s22] ss:$0 sm:$0xff] }
0x1092   :  { %v2765_v63 = vsel %vm1586_vm6, %v2763_v59, -1e+09 }
0x1093   :  { %v2769_v1 = vsel %vm608_vm4, %v2765_v63, -inf }
0x1094   :  { %2770 = vmax.xlane.f32.xlu1 %v2769_v1 }
0x10a5   :  { %2788 = vrot.lane.b32.xlu1 %v7988_v5, %s7519_s9 }
0x111d   :  { %v2768_v4 = vpop.xlane.xlu0 %2767 }
0x111e   :  { %v2772_v33 = vsub.f32 %v2764_v28, %v2768_v4 }
0x1120   :  { %v2774_v9 = vmul.f32 1.442695, %v2772_v33 }
0x1121   :  { %v2771_v10 = vpop.xlane.xlu1 %2770 }
0x1122   :  { %7371 = vpow2.f32 %v2774_v9  ;;  %v2773_v11 = vsub.f32 %v2765_v63, %v2771_v10 }
0x1124   :  { %v2776_v12 = vmul.f32 1.442695, %v2773_v11 }
0x1125   :  { %v8094_v14 = vpop.permute.xlu1 %2788 }
0x1126   :  { %7373 = vpow2.f32 %v2776_v12  ;;  %6850 = vmatpush3.msra.mxu0 %v8094_v14 }
0x1127   :  { %7166 = vmatprep.subr.bf16.mxu0 %v8108_v40 }
0x112c   :  { %v7372_v15 = vpop.eup %7371 }
0x112d   :  { %v2778_v16 = vsel %vm608_vm4, %v7372_v15, 0.0 }
0x112e   :  { %2779 = vadd.xlane.f32.xlu0 %v2778_v16 }
0x1130   :  { %v7374_v7 = vpop.eup %7373 }
0x1131   :  { %v2781_v19 = vsel %vm608_vm4, %v7374_v7, 0.0 }
0x1132   :  { %2782 = vadd.xlane.f32.xlu0 %v2781_v19 }
0x1148   :  { %2864 = vrot.lane.b32.xlu0 %v7997_v17, %s7519_s9 }
0x11bb   :  { %v2780_v35 = vpop.xlane.xlu0 %2779 }
0x11bc   :  { %7375 = vrcp.f32 %v2780_v35 }
0x11bf   :  { %v2783_v21 = vpop.xlane.xlu0 %2782 }
0x11c0   :  { %7377 = vrcp.f32 %v2783_v21 }
0x11c3   :  { %v8101_v51 = vpop.permute.xlu0 %2864 }
0x11c4   :  { %6855 = vmatpush3.msra.mxu1 %v8101_v51 }
0x11c6   :  { %v7376_v22 = vpop.eup %7375 }
0x11c7   :  { %v2786_v25 = vmul.f32 %v7376_v22, %v7372_v15 }
0x11c9   :  { %6852 = vmatmul.mubr.msk.f32.vlgmr.msra.gmra.mrb[24].mxu0 %vm608_vm4, %v2786_v25 }
0x11ca   :  { %v7378_v27 = vpop.eup %7377  ;;  %7168 = vmatpush3.bf16.msra.mxu0 %v8108_v40 }
0x11cb   :  { %v2787_v50 = vmul.f32 %v7378_v27, %v7374_v7  ;;  %7170 = vmatprep.subr.bf16.mxu0 %v8114_v49 }
0x11cd   :  { %6857 = vmatmul.mubr.msk.f32.vlgmr.msra.gmra.mrb[32].mxu1 %vm608_vm4, %v2787_v50  ;;  %v3163_v50 = vld [vmem:[%s8543_s23] sm:$0xff] }
0x11ce   :  { %v8132_v39 = vpack.c.bf16 %v3164_v37, %v3163_v50  ;;  %v6391_v37 = vld [vmem:[%s8547_s2] ss:$0 sm:$0xff] }
0x11d0   :  { %7174 = vmatprep.subr.bf16.mxu1 %v8132_v39 }
0x11d1   :  { %7176 = vmatpush3.bf16.msra.mxu1 %v8132_v39 }
0x129c   :  { %v2860_v52 = vpop.f32.mrb[24].mxu0 }
0x129d   :  { %v6853_v54 = vpop.f32.mrb[25].mxu0  ;;  %6863 = vmatprep.mubr.msk.f32.mxu0 %vm450_vm2, %v2860_v52  ;;  %v8137_v52 = vpack.c.bf16 %v3166_v29, %v3165_v43 }
0x129e   :  { %v3257_v54 = vld [vmem:[%s8544_s26] sm:$0xff] }
0x129f   :  { %7178 = vmatprep.subr.bf16.mxu1 %v8137_v52 }
0x12a0   :  { %v2936_v28 = vpop.f32.mrb[32].mxu1  ;;  %7180 = vmatpush3.bf16.msra.mxu1 %v8137_v52 }
0x12a1   :  { %v6858_v56 = vpop.f32.mrb[33].mxu1  ;;  %6864 = vmatmul.mubr.msk.f32.vlgmr.msra.gmra.mrb[18].mxu0 %vm450_vm2, %v2936_v28  ;;  %7198 = vmatprep.subr.bf16.mxu1 %v7694_v3  ;;  %v3258_v28 = vld [vmem:[%s8544_s26 + $0x8] sm:$0xff] }
0x12a2   :  { %7172 = vmatpush3.bf16.msra.mxu0 %v8114_v49  ;;  %6870 = vmatprep.mubr.msk.f32.mxu0 %vm450_vm2, %v2524_v53  ;;  %v3259_v56 = vld [vmem:[%s8544_s26 + $0x10] sm:$0xff] }
0x12a9   :  { %6871 = vmatmul.mubr.msk.f32.vlgmr.msra.gmra.mrb[18].mxu0 %vm450_vm2, %v2600_v45 }
0x137c   :  { %v6872_v59 = vpop.f32.mrb[18].mxu0 }
0x137d   :  { %v7261_v63 = vadd.f32 %v6872_v59, %v6371_v58  ;;  %v3095_v1 = vpop.f32.mrb[19].mxu0  ;;  %v3260_v59 = vld [vmem:[%s8544_s26 + $0x18] sm:$0xff] }
0x137e   :  { %v7263_v4 = vadd.f32 %v6371_v58, %v3095_v1  ;;  %v8146_v58 = vpack.c.bf16 %v3258_v28, %v3257_v54  ;;  %v3262_v1 = vld [vmem:[%s8544_s26 + $0x28] sm:$0xff] }
0x137f   :  { %v7262_v33 = vadd.f32 %v7261_v63, %v6388_v61  ;;  %v3261_v63 = vld [vmem:[%s8544_s26 + $0x20] sm:$0xff] }
0x1380   :  { %v7264_v9 = vadd.f32 %v7263_v4, %v6388_v61  ;;  %v8149_v61 = vpack.c.bf16 %v3260_v59, %v3259_v56  ;;  %7182 = vmatprep.subr.bf16.mxu0 %v8146_v58  ;;  %v8156_v4 = vpack.c.bf16 %v3262_v1, %v3261_v63  ;;  %v6394_v56 = vld [vmem:[%s7674_s19] ss:$0 sm:$0xff] }
0x1381   :  { %v3116_v10 = vmul.f32 0.5, %v7262_v33  ;;  %7184 = vmatpush3.bf16.msra.mxu0 %v8146_v58 }
0x1382   :  { %v3115_v11 = vmul.f32 0.5, %v7264_v9  ;;  %7186 = vmatprep.subr.bf16.mxu0 %v8149_v61 }
0x1383   :  { %v3118_v12 = vadd.f32 %v3116_v10, %v7884_v48 }
0x1384   :  { %v3117_v15 = vadd.f32 %v3115_v11, %v7882_v47 }
0x1385   :  { %v3122_v16 = vsel %vm143_vm0, %v3118_v12, 0.0  ;;  %7188 = vmatpush3.bf16.msra.mxu0 %v8149_v61 }
0x1386   :  { %3123 = vadd.xlane.f32.xlu0 %v3122_v16  ;;  %v3119_v53 = vsel %vm143_vm0, %v3117_v15, 0.0  ;;  %7190 = vmatprep.subr.bf16.mxu0 %v8156_v4 }
0x1387   :  { %3120 = vadd.xlane.f32.xlu1 %v3119_v53  ;;  %v6389_v53 = vld [vmem:[%s8545_s28] ss:$0 sm:$0xff] }
0x1389   :  { %7192 = vmatpush3.bf16.msra.mxu0 %v8156_v4 }
0x1413   :  { %v3124_v45 = vpop.xlane.xlu0 %3123 }
0x1414   :  { %v3126_v7 = vmul.f32 0.03125, %v3124_v45  ;;  %v3121_v19 = vpop.xlane.xlu1 %3120 }
0x1415   :  { %v3125_v35 = vmul.f32 0.03125, %v3121_v19 }
0x1416   :  { %v3128_v21 = vsub.f32 %v3118_v12, %v3126_v7 }
0x1417   :  { %v3127_v22 = vsub.f32 %v3117_v15, %v3125_v35  ;;  %v6390_v35 = vld [vmem:[%s8546_s1] ss:$0 sm:$0xff] }
0x1418   :  { %v3130_v25 = vmul.f32 %v3128_v21, %v3128_v21 }
0x1419   :  { %v3129_v48 = vmul.f32 %v3127_v22, %v3127_v22 }
0x141a   :  { %v3134_v47 = vsel %vm143_vm0, %v3130_v25, 0.0 }
0x141b   :  { %3135 = vadd.xlane.f32.xlu0 %v3134_v47  ;;  %v3131_v27 = vsel %vm143_vm0, %v3129_v48, 0.0 }
0x141c   :  { %3132 = vadd.xlane.f32.xlu1 %v3131_v27 }
0x14a8   :  { %v3136_v33 = vpop.xlane.xlu0 %3135 }
0x14a9   :  { %v3138_v9 = vmul.f32 0.03125, %v3136_v33  ;;  %v3133_v10 = vpop.xlane.xlu1 %3132 }
0x14aa   :  { %v3137_v11 = vmul.f32 0.03125, %v3133_v10 }
0x14ab   :  { %v3140_v12 = vadd.f32 1e-05, %v3138_v9 }
0x14ac   :  { %v3139_v15 = vadd.f32 1e-05, %v3137_v11 }
0x14ad   :  { %7379 = vrsqrt.f32 %v3140_v12 }
0x14ae   :  { %7381 = vrsqrt.f32 %v3139_v15 }
0x14b7   :  { %v7380_v16 = vpop.eup %7379 }
0x14b8   :  { %v7382_v45 = vpop.eup %7381  ;;  %v3144_v7 = vmul.f32 %v7380_v16, %v3128_v21  ;;  %v3263_v21 = vld [vmem:[%s8544_s26 + $0x30] sm:$0xff] }
0x14b9   :  { %v3143_v19 = vmul.f32 %v7382_v45, %v3127_v22  ;;  %v3264_v22 = vld [vmem:[%s8544_s26 + $0x38] sm:$0xff] }
0x14ba   :  { %v3153_v25 = vmul.f32 %v6389_v53, %v3144_v7  ;;  %v8171_v50 = vpack.c.bf16 %v3264_v22, %v3263_v21 }
0x14bb   :  { %v3152_v48 = vmul.f32 %v6389_v53, %v3143_v19 }
0x14bc   :  { %v3162_v27 = vadd.f32 %v6390_v35, %v3153_v25  ;;  %7194 = vmatprep.subr.bf16.mxu0 %v8171_v50 }
0x14bd   :  { %v3161_v47 = vadd.f32 %v6390_v35, %v3152_v48  ;;  %7196 = vmatpush3.bf16.msra.mxu0 %v8171_v50 }
0x14be   :  { %6924 = vmatprep.subr.mxu0 %v7515_v24 }
0x14bf   :  { %6881 = vmatprep.mubr.msk.f32.mxu1 %vm143_vm0, %v3161_v47 }
0x14c0   :  { %6882 = vmatmul.mubr.msk.f32.vlgmr.msra.gmra.mrb[34].mxu1 %vm143_vm0, %v3162_v27 }
0x14c1   :  { %7200 = vmatpush3.bf16.msra.mxu1 %v7694_v3 }
0x14c2   :  { %7202 = vmatprep.subr.bf16.mxu1 %v7700_v6 }
0x14c5   :  { %7204 = vmatpush3.bf16.msra.mxu1 %v7700_v6 }
0x14c6   :  { %6914 = vmatprep.subr.mxu1 %v7515_v24 }
0x1593   :  { %v6883_v43 = vpop.f32.mrb[34].mxu1 }
0x1594   :  { %v3252_v3 = vadd.f32 %v6883_v43, %v6391_v37  ;;  %v3246_v29 = vpop.f32.mrb[35].mxu1 }
0x1595   :  { %v3247_v54 = vadd.f32 %v6391_v37, %v3246_v29 }
0x1596   :  { %v3256_v28 = vmax.f32 %v3252_v3, 0.0 }
0x1597   :  { %v3255_v6 = vmax.f32 %v3247_v54, 0.0  ;;  %v6397_v54 = vld [vmem:[%s8548_s7] ss:$0 sm:$0xff] }
0x1599   :  { %6900 = vmatprep.mubr.msk.f32.mxu0 %vm3272_vm8, %v3255_v6 }
0x159a   :  { %6901 = vmatmul.mubr.msk.f32.vlgmr.msra.gmra.mrb[26].mxu0 %vm3272_vm8, %v3256_v28 }
0x159b   :  { %6926 = vmatprep.mubr.msk.f32.mxu0 %vm7516_vm1, %v7515_v24 }
0x166d   :  { %v6902_v59 = vpop.f32.mrb[26].mxu0 }
0x166e   :  { %v3351_v63 = vadd.f32 %v6902_v59, %v6394_v56  ;;  %v3345_v1 = vpop.f32.mrb[27].mxu0  ;;  %v6398_v59 = vld [vmem:[%s8549_s10] ss:$0 sm:$0xff] }
0x166f   :  { %v3346_v33 = vadd.f32 %v6394_v56, %v3345_v1 }
0x1670   :  { %v3355_v9 = vadd.f32 %v3351_v63, %v3162_v27 }
0x1671   :  { %v3354_v10 = vadd.f32 %v3346_v33, %v3161_v47 }
0x1672   :  { %v3359_v11 = vsel %vm143_vm0, %v3355_v9, 0.0 }
0x1673   :  { %3360 = vadd.xlane.f32.xlu0 %v3359_v11  ;;  %v3356_v12 = vsel %vm143_vm0, %v3354_v10, 0.0  ;;  %v7447_v11 = vld [vmem:[%s7564_s29] ss:$0 sm:$0xff] }
0x1674   :  { %3357 = vadd.xlane.f32.xlu1 %v3356_v12 }
0x1700   :  { %v3361_v15 = vpop.xlane.xlu0 %3360 }
0x1701   :  { %v3363_v16 = vmul.f32 0.03125, %v3361_v15  ;;  %v3358_v53 = vpop.xlane.xlu1 %3357 }
0x1702   :  { %v3362_v45 = vmul.f32 0.03125, %v3358_v53 }
0x1703   :  { %v3365_v7 = vsub.f32 %v3355_v9, %v3363_v16 }
0x1704   :  { %v3364_v19 = vsub.f32 %v3354_v10, %v3362_v45 }
0x1705   :  { %v3367_v35 = vmul.f32 %v3365_v7, %v3365_v7 }
0x1706   :  { %v3366_v25 = vmul.f32 %v3364_v19, %v3364_v19 }
0x1707   :  { %v3371_v48 = vsel %vm143_vm0, %v3367_v35, 0.0 }
0x1708   :  { %3372 = vadd.xlane.f32.xlu0 %v3371_v48  ;;  %v3368_v47 = vsel %vm143_vm0, %v3366_v25, 0.0 }
0x1709   :  { %3369 = vadd.xlane.f32.xlu1 %v3368_v47 }
0x1795   :  { %v3373_v27 = vpop.xlane.xlu0 %3372 }
0x1796   :  { %v3375_v21 = vmul.f32 0.03125, %v3373_v27  ;;  %v3370_v22 = vpop.xlane.xlu1 %3369 }
0x1797   :  { %v3374_v37 = vmul.f32 0.03125, %v3370_v22 }
0x1798   :  { %v3377_v43 = vadd.f32 1e-05, %v3375_v21 }
0x1799   :  { %v3376_v3 = vadd.f32 1e-05, %v3374_v37 }
0x179a   :  { %7383 = vrsqrt.f32 %v3377_v43 }
0x179b   :  { %7385 = vrsqrt.f32 %v3376_v3 }
0x17a4   :  { %v7384_v29 = vpop.eup %7383 }
0x17a5   :  { %v7386_v6 = vpop.eup %7385  ;;  %v3381_v28 = vmul.f32 %v7384_v29, %v3365_v7 }
0x17a6   :  { %v3380_v56 = vmul.f32 %v7386_v6, %v3364_v19 }
0x17a7   :  { %v3390_v63 = vmul.f32 %v6397_v54, %v3381_v28 }
0x17a8   :  { %v3389_v1 = vmul.f32 %v6397_v54, %v3380_v56 }
0x17a9   :  { %v8190_v9 = vadd.f32 %v6398_v59, %v3390_v63 }
0x17aa   :  { %v8188_v33 = vadd.f32 %v6398_v59, %v3389_v1 }
0x17ac   :  { %6911 = vmatprep.mubr.msk.f32.mxu1 %vm143_vm0, %v8188_v33 }
0x17ad   :  { %6912 = vmatmul.mubr.msk.f32.vlgmr.msra.gmra.mrb[36].mxu1 %vm143_vm0, %v8190_v9 }
0x17ae   :  { %6916 = vmatprep.mubr.msk.f32.mxu1 %vm7516_vm1, %v7515_v24 }
0x1880   :  { %v6913_v10 = vpop.f32.mrb[36].mxu1 }
0x1881   :  { %v8199_v12 = vadd.f32 %v7447_v11, %v6913_v10  ;;  %v3472_v15 = vpop.f32.mrb[37].mxu1 }
0x1882   :  { %v8201_v16 = vadd.f32 %v7447_v11, %v3472_v15 }
0x1883   :  { %3559 = vrot.lane.b32.xlu0 %v8199_v12, %s7517_s0 }
0x1884   :  { %3482 = vrot.lane.b32.xlu1 %v8201_v16, %s7517_s0 }
0x18f5   :  { %v3560_v45 = vpop.permute.xlu0 %3559 }
0x18f6   :  { %v3483_v53 = vpop.permute.xlu1 %3482 }
0x18f7   :  { %6915 = vmatpush3.xpose.msk.msra.mxu1 %vm450_vm2, %v3483_v53 }
0x18f8   :  { %6919 = vmatprep.subr.mxu1 %v7515_v24 }
0x18fa   :  { %6917 = vmatmul.mubr.msk.f32.vlgmr.msra.gmra.mrb[38].mxu1 %vm450_vm2, %v8201_v16 }
0x18fb   :  { %6920 = vmatpush3.xpose.msk.msra.mxu1 %vm450_vm2, %v3560_v45  ;;  %6921 = vmatprep.mubr.msk.f32.mxu1 %vm7516_vm1, %v7515_v24 }
0x18fc   :  { %6929 = vmatprep.subr.mxu1 %v7515_v24 }
0x18fe   :  { %6922 = vmatmul.mubr.msk.f32.vlgmr.msra.gmra.mrb[40].mxu1 %vm450_vm2, %v8199_v12 }
0x18ff   :  { %6931 = vmatprep.mubr.msk.f32.mxu1 %vm7516_vm1, %v7515_v24 }
0x19cd   :  { %v3554_v7 = vpop.f32.mrb[38].mxu1 }
0x19ce   :  { %v3635_v19 = vmul.f32 0.25, %v3554_v7  ;;  %v6918_v35 = vpop.f32.mrb[39].mxu1 }
0x19d0   :  { %v3637_v25 = vsel %vm604_vm3, %v3635_v19, -1e+09 }
0x19d1   :  { %v3631_v48 = vpop.f32.mrb[40].mxu1  ;;  %v3639_v47 = vsel %vm608_vm4, %v3637_v25, -inf }
0x19d2   :  { %v3636_v27 = vmul.f32 0.25, %v3631_v48  ;;  %3640 = vmax.xlane.f32.xlu1 %v3639_v47  ;;  %v6923_v21 = vpop.f32.mrb[41].mxu1 }
0x19d4   :  { %v3638_v22 = vsel %vm605_vm5, %v3636_v27, -1e+09 }
0x19d5   :  { %v3642_v37 = vsel %vm608_vm4, %v3638_v22, -inf }
0x19d6   :  { %3643 = vmax.xlane.f32.xlu0 %v3642_v37 }
0x19e3   :  { %3661 = vrot.lane.b32.xlu1 %v8201_v16, %s7518_s5 }
0x19e7   :  { %3815 = vrot.lane.b32.xlu1 %v8201_v16, %s7519_s9 }
0x19eb   :  { %3893 = vrot.lane.b32.xlu1 %v8199_v12, %s7519_s9 }
0x19ec   :  { %3737 = vrot.lane.b32.xlu0 %v8199_v12, %s7518_s5 }
0x1a5f   :  { %v3641_v43 = vpop.xlane.xlu1 %3640 }
0x1a60   :  { %v3645_v3 = vsub.f32 %v3637_v25, %v3641_v43 }
0x1a62   :  { %v3647_v29 = vmul.f32 1.442695, %v3645_v3 }
0x1a63   :  { %v3662_v54 = vpop.permute.xlu1 %3661  ;;  %v3644_v6 = vpop.xlane.xlu0 %3643 }
0x1a64   :  { %7387 = vpow2.f32 %v3647_v29  ;;  %v3646_v28 = vsub.f32 %v3638_v22, %v3644_v6  ;;  %6925 = vmatpush3.msra.mxu0 %v3662_v54 }
0x1a65   :  { %6934 = vmatprep.subr.mxu0 %v7515_v24 }
0x1a66   :  { %v3649_v56 = vmul.f32 1.442695, %v3646_v28 }
0x1a67   :  { %v3738_v59 = vpop.permute.xlu0 %3737  ;;  %v3816_v15 = vpop.permute.xlu1 %3815 }
0x1a68   :  { %7389 = vpow2.f32 %v3649_v56  ;;  %6930 = vmatpush3.msra.mxu1 %v3738_v59 }
0x1a69   :  { %6939 = vmatprep.subr.mxu1 %v7515_v24 }
0x1a6b   :  { %v3894_v53 = vpop.permute.xlu1 %3893 }
0x1a6e   :  { %v7388_v63 = vpop.eup %7387 }
0x1a6f   :  { %v3651_v1 = vsel %vm608_vm4, %v7388_v63, 0.0 }
0x1a70   :  { %3652 = vadd.xlane.f32.xlu1 %v3651_v1 }
0x1a72   :  { %v7390_v10 = vpop.eup %7389 }
0x1a73   :  { %v3654_v11 = vsel %vm608_vm4, %v7390_v10, 0.0 }
0x1a74   :  { %3655 = vadd.xlane.f32.xlu0 %v3654_v11 }
0x1a81   :  { %3891 = vrot.lane.b32.xlu1 %v8199_v12, %s7520_s13 }
0x1a8a   :  { %3813 = vrot.lane.b32.xlu0 %v8201_v16, %s7520_s13 }
0x1afd   :  { %v3653_v45 = vpop.xlane.xlu1 %3652 }
0x1afe   :  { %7391 = vrcp.f32 %v3653_v45 }
0x1b01   :  { %v3656_v7 = vpop.xlane.xlu0 %3655  ;;  %v3892_v27 = vpop.permute.xlu1 %3891 }
0x1b02   :  { %7393 = vrcp.f32 %v3656_v7 }
0x1b05   :  { %v3814_v47 = vpop.permute.xlu0 %3813 }
0x1b08   :  { %v7392_v19 = vpop.eup %7391 }
0x1b09   :  { %v3659_v35 = vmul.f32 %v7392_v19, %v7388_v63 }
0x1b0b   :  { %6927 = vmatmul.mubr.msk.f32.vlgmr.msra.gmra.mrb[28].mxu0 %vm608_vm4, %v3659_v35 }
0x1b0c   :  { %v7394_v25 = vpop.eup %7393  ;;  %6935 = vmatpush3.xpose.msk.msra.mxu0 %vm450_vm2, %v3816_v15  ;;  %6936 = vmatprep.mubr.msk.f32.mxu0 %vm7516_vm1, %v7515_v24 }
0x1b0d   :  { %v3660_v48 = vmul.f32 %v7394_v25, %v7390_v10  ;;  %6944 = vmatprep.subr.mxu0 %v7515_v24 }
0x1b0f   :  { %6932 = vmatmul.mubr.msk.f32.vlgmr.msra.gmra.mrb[42].mxu1 %vm608_vm4, %v3660_v48  ;;  %6937 = vmatmul.mubr.msk.f32.vlgmr.msra.gmra.mrb[30].mxu0 %vm450_vm2, %v3814_v47 }
0x1b10   :  { %6940 = vmatpush3.xpose.msk.msra.mxu1 %vm450_vm2, %v3894_v53  ;;  %6941 = vmatprep.mubr.msk.f32.mxu1 %vm7516_vm1, %v7515_v24 }
0x1b11   :  { %6949 = vmatprep.subr.mxu1 %v7515_v24  ;;  %6946 = vmatprep.mubr.msk.f32.mxu0 %vm7516_vm1, %v7515_v24 }
0x1b13   :  { %6942 = vmatmul.mubr.msk.f32.vlgmr.msra.gmra.mrb[44].mxu1 %vm450_vm2, %v3892_v27 }
0x1b14   :  { %6951 = vmatprep.mubr.msk.f32.mxu1 %vm7516_vm1, %v7515_v24 }
0x1bde   :  { %v3733_v21 = vpop.f32.mrb[28].mxu0 }
0x1bdf   :  { %v6928_v22 = vpop.f32.mrb[29].mxu0 }
0x1be2   :  { %v3809_v37 = vpop.f32.mrb[42].mxu1  ;;  %v3887_v43 = vpop.f32.mrb[30].mxu0 }
0x1be3   :  { %v3969_v3 = vmul.f32 0.25, %v3887_v43  ;;  %v6933_v29 = vpop.f32.mrb[43].mxu1  ;;  %v6938_v54 = vpop.f32.mrb[31].mxu0 }
0x1be5   :  { %v3971_v6 = vsel %vm604_vm3, %v3969_v3, -1e+09 }
0x1be6   :  { %v3965_v28 = vpop.f32.mrb[44].mxu1  ;;  %v3973_v56 = vsel %vm608_vm4, %v3971_v6, -inf }
0x1be7   :  { %v3970_v59 = vmul.f32 0.25, %v3965_v28  ;;  %3974 = vmax.xlane.f32.xlu0 %v3973_v56  ;;  %v6943_v63 = vpop.f32.mrb[45].mxu1 }
0x1be9   :  { %v3972_v1 = vsel %vm605_vm5, %v3970_v59, -1e+09 }
0x1bea   :  { %v3976_v10 = vsel %vm608_vm4, %v3972_v1, -inf }
0x1beb   :  { %3977 = vmax.xlane.f32.xlu1 %v3976_v10 }
0x1bfc   :  { %3995 = vrot.lane.b32.xlu1 %v8201_v16, %s7521_s21 }
0x1c74   :  { %v3975_v11 = vpop.xlane.xlu0 %3974 }
0x1c75   :  { %v3979_v15 = vsub.f32 %v3971_v6, %v3975_v11 }
0x1c77   :  { %v3981_v53 = vmul.f32 1.442695, %v3979_v15 }
0x1c78   :  { %v3978_v38 = vpop.xlane.xlu1 %3977 }
0x1c79   :  { %7395 = vpow2.f32 %v3981_v53  ;;  %v3980_v45 = vsub.f32 %v3972_v1, %v3978_v38 }
0x1c7b   :  { %v3983_v7 = vmul.f32 1.442695, %v3980_v45 }
0x1c7c   :  { %v3996_v19 = vpop.permute.xlu1 %3995 }
0x1c7d   :  { %7397 = vpow2.f32 %v3983_v7  ;;  %6945 = vmatpush3.msra.mxu0 %v3996_v19 }
0x1c7e   :  { %7206 = vmatprep.subr.bf16.mxu0 %v7834_v55 }
0x1c83   :  { %v7396_v42 = vpop.eup %7395 }
0x1c84   :  { %v3985_v35 = vsel %vm608_vm4, %v7396_v42, 0.0 }
0x1c85   :  { %3986 = vadd.xlane.f32.xlu0 %v3985_v35 }
0x1c87   :  { %v7398_v25 = vpop.eup %7397 }
0x1c88   :  { %v3988_v48 = vsel %vm608_vm4, %v7398_v25, 0.0 }
0x1c89   :  { %3989 = vadd.xlane.f32.xlu0 %v3988_v48 }
0x1c9f   :  { %4071 = vrot.lane.b32.xlu0 %v8199_v12, %s7521_s21 }
0x1d12   :  { %v3987_v16 = vpop.xlane.xlu0 %3986 }
0x1d13   :  { %7399 = vrcp.f32 %v3987_v16 }
0x1d16   :  { %v3990_v47 = vpop.xlane.xlu0 %3989 }
0x1d17   :  { %7401 = vrcp.f32 %v3990_v47 }
0x1d1a   :  { %v4072_v27 = vpop.permute.xlu0 %4071 }
0x1d1b   :  { %6950 = vmatpush3.msra.mxu1 %v4072_v27 }
0x1d1c   :  { %7214 = vmatprep.subr.bf16.mxu1 %v7869_v20 }
0x1d1d   :  { %v7400_v22 = vpop.eup %7399 }
0x1d1e   :  { %v3993_v43 = vmul.f32 %v7400_v22, %v7396_v42 }
0x1d20   :  { %6947 = vmatmul.mubr.msk.f32.vlgmr.msra.gmra.mrb[32].mxu0 %vm608_vm4, %v3993_v43  ;;  %v7449_v43 = vld [vmem:[%s7629_s20] ss:$0 sm:$0xff] }
0x1d21   :  { %v7402_v3 = vpop.eup %7401  ;;  %7208 = vmatpush3.bf16.msra.mxu0 %v7834_v55 }
0x1d22   :  { %v3994_v29 = vmul.f32 %v7402_v3, %v7398_v25  ;;  %7210 = vmatprep.subr.bf16.mxu0 %v7840_v57 }
0x1d24   :  { %6952 = vmatmul.mubr.msk.f32.vlgmr.msra.gmra.mrb[46].mxu1 %vm608_vm4, %v3994_v29 }
0x1d25   :  { %7216 = vmatpush3.bf16.msra.mxu1 %v7869_v20 }
0x1d26   :  { %7218 = vmatprep.subr.bf16.mxu1 %v7875_v23 }
0x1d29   :  { %7220 = vmatpush3.bf16.msra.mxu1 %v7875_v23  ;;  %v7448_v23 = vld [vmem:[%s7574_s8] ss:$0 sm:$0xff] }
0x1d2a   :  { %6984 = vmatprep.subr.mxu1 %v7515_v24 }
0x1df3   :  { %v4067_v12 = vpop.f32.mrb[32].mxu0 }
0x1df4   :  { %v6948_v54 = vpop.f32.mrb[33].mxu0  ;;  %6958 = vmatprep.mubr.msk.f32.mxu0 %vm450_vm2, %v4067_v12  ;;  %v7450_v12 = vld [vmem:[%s7634_s27] ss:$0 sm:$0xff] }
0x1df7   :  { %v4143_v6 = vpop.f32.mrb[46].mxu1 }
0x1df8   :  { %v6953_v55 = vpop.f32.mrb[47].mxu1  ;;  %6959 = vmatmul.mubr.msk.f32.vlgmr.msra.gmra.mrb[34].mxu0 %vm450_vm2, %v4143_v6 }
0x1df9   :  { %7212 = vmatpush3.bf16.msra.mxu0 %v7840_v57  ;;  %6965 = vmatprep.mubr.msk.f32.mxu0 %vm450_vm2, %v3733_v21 }
0x1dfa   :  { %6979 = vmatprep.subr.mxu0 %v7515_v24 }
0x1e00   :  { %6966 = vmatmul.mubr.msk.f32.vlgmr.msra.gmra.mrb[34].mxu0 %vm450_vm2, %v3809_v37 }
0x1e01   :  { %6981 = vmatprep.mubr.msk.f32.mxu0 %vm7516_vm1, %v7515_v24 }
0x1e02   :  { %6980 = vmatpush3.xpose.msk.msra.mxu0 %vm450_vm2, %v7851_v62 }
0x1e03   :  { %6989 = vmatprep.subr.mxu0 %v7515_v24 }
0x1ed3   :  { %v6967_v20 = vpop.f32.mrb[34].mxu0 }
0x1ed4   :  { %v4310_v28 = vadd.f32 %v7448_v23, %v6967_v20  ;;  %v4300_v56 = vpop.f32.mrb[35].mxu0  ;;  %v7451_v20 = vld [vmem:[%s8536_s25] ss:$0 sm:$0xff] }
0x1ed5   :  { %v4309_v59 = vadd.f32 %v7448_v23, %v4300_v56 }
0x1ed6   :  { %v4312_v57 = vadd.f32 %v4310_v28, %v8190_v9 }
0x1ed7   :  { %v4311_v21 = vadd.f32 %v4309_v59, %v8188_v33 }
0x1ed8   :  { %v4316_v63 = vsel %vm143_vm0, %v4312_v57, 0.0 }
0x1ed9   :  { %4317 = vadd.xlane.f32.xlu0 %v4316_v63  ;;  %v4313_v37 = vsel %vm143_vm0, %v4311_v21, 0.0 }
0x1eda   :  { %4314 = vadd.xlane.f32.xlu1 %v4313_v37 }
0x1f66   :  { %v4318_v1 = vpop.xlane.xlu0 %4317 }
0x1f67   :  { %v4320_v10 = vmul.f32 0.03125, %v4318_v1  ;;  %v4315_v62 = vpop.xlane.xlu1 %4314 }
0x1f68   :  { %v4319_v11 = vmul.f32 0.03125, %v4315_v62 }
0x1f69   :  { %v4322_v15 = vsub.f32 %v4312_v57, %v4320_v10 }
0x1f6a   :  { %v4321_v53 = vsub.f32 %v4311_v21, %v4319_v11 }
0x1f6b   :  { %v4324_v38 = vmul.f32 %v4322_v15, %v4322_v15 }
0x1f6c   :  { %v4323_v45 = vmul.f32 %v4321_v53, %v4321_v53 }
0x1f6d   :  { %v4328_v7 = vsel %vm143_vm0, %v4324_v38, 0.0 }
0x1f6e   :  { %4329 = vadd.xlane.f32.xlu0 %v4328_v7  ;;  %v4325_v33 = vsel %vm143_vm0, %v4323_v45, 0.0 }
0x1f6f   :  { %4326 = vadd.xlane.f32.xlu1 %v4325_v33 }
0x1ffb   :  { %v4330_v9 = vpop.xlane.xlu0 %4329 }
0x1ffc   :  { %v4332_v19 = vmul.f32 0.03125, %v4330_v9  ;;  %v4327_v42 = vpop.xlane.xlu1 %4326 }
0x1ffd   :  { %v4331_v35 = vmul.f32 0.03125, %v4327_v42 }
0x1ffe   :  { %v4334_v25 = vadd.f32 1e-05, %v4332_v19 }
0x1fff   :  { %v4333_v48 = vadd.f32 1e-05, %v4331_v35 }
0x2000   :  { %7403 = vrsqrt.f32 %v4334_v25 }
0x2001   :  { %7405 = vrsqrt.f32 %v4333_v48 }
0x200a   :  { %v7404_v16 = vpop.eup %7403 }
0x200b   :  { %v7406_v47 = vpop.eup %7405  ;;  %v4338_v27 = vmul.f32 %v7404_v16, %v4322_v15 }
0x200c   :  { %v4337_v22 = vmul.f32 %v7406_v47, %v4321_v53 }
0x200d   :  { %v4340_v3 = vmul.f32 %v7449_v43, %v4338_v27 }
0x200e   :  { %v4339_v29 = vmul.f32 %v7449_v43, %v4337_v22 }
0x200f   :  { %v8301_v6 = vadd.f32 %v7450_v12, %v4340_v3 }
0x2010   :  { %v8299_v54 = vadd.f32 %v7450_v12, %v4339_v29 }
0x2012   :  { %6976 = vmatprep.mubr.msk.f32.mxu1 %vm143_vm0, %v8299_v54 }
0x2013   :  { %6977 = vmatmul.mubr.msk.f32.vlgmr.msra.gmra.mrb[48].mxu1 %vm143_vm0, %v8301_v6 }
0x2014   :  { %6985 = vmatpush3.xpose.msk.msra.mxu1 %vm450_vm2, %v7748_v32  ;;  %6986 = vmatprep.mubr.msk.f32.mxu1 %vm7516_vm1, %v7515_v24 }
0x2015   :  { %6994 = vmatprep.subr.mxu1 %v7515_v24 }
0x20e6   :  { %v6978_v55 = vpop.f32.mrb[48].mxu1 }
0x20e7   :  { %v8313_v23 = vadd.f32 %v7451_v20, %v6978_v55  ;;  %v4415_v28 = vpop.f32.mrb[49].mxu1 }
0x20e8   :  { %v8315_v56 = vadd.f32 %v7451_v20, %v4415_v28 }
0x20e9   :  { %6987 = vmatmul.mubr.msk.f32.vlgmr.msra.gmra.mrb[50].mxu1 %vm450_vm2, %v8313_v23 }
0x20ea   :  { %6995 = vmatpush3.msra.mxu1 %v7929_v18  ;;  %6982 = vmatmul.mubr.msk.f32.vlgmr.msra.gmra.mrb[36].mxu0 %vm450_vm2, %v8315_v56 }
0x20eb   :  { %6990 = vmatpush3.msra.mxu0 %v7950_v44  ;;  %6996 = vmatprep.mubr.msk.f32.mxu1 %vm7516_vm1, %v7515_v24 }
0x20ec   :  { %7004 = vmatprep.subr.mxu1 %v7515_v24  ;;  %6991 = vmatprep.mubr.msk.f32.mxu0 %vm7516_vm1, %v7515_v24 }
0x20ed   :  { %6999 = vmatprep.subr.mxu0 %v7515_v24 }
0x21bc   :  { %v4566_v32 = vpop.f32.mrb[50].mxu1 }
0x21bd   :  { %v4571_v59 = vmul.f32 0.25, %v4566_v32  ;;  %v4493_v57 = vpop.f32.mrb[36].mxu0  ;;  %v6988_v21 = vpop.f32.mrb[51].mxu1 }
0x21be   :  { %v6983_v18 = vpop.f32.mrb[37].mxu0  ;;  %v4570_v62 = vmul.f32 0.25, %v4493_v57 }
0x21bf   :  { %v4573_v63 = vsel %vm1586_vm6, %v4571_v59, -1e+09 }
0x21c0   :  { %v4577_v44 = vsel %vm608_vm4, %v4573_v63, -inf  ;;  %v4572_v53 = vsel %vm1585_vm7, %v4570_v62, -1e+09 }
0x21c1   :  { %4578 = vmax.xlane.f32.xlu1 %v4577_v44  ;;  %v4574_v38 = vsel %vm608_vm4, %v4572_v53, -inf }
0x21d2   :  { %4816 = vrot.lane.b32.xlu1 %v8313_v23, %s7520_s13 }
0x224e   :  { %v4579_v37 = vpop.xlane.xlu1 %4578 }
0x224f   :  { %v4581_v1 = vsub.f32 %v4573_v63, %v4579_v37 }
0x2251   :  { %v4584_v10 = vmul.f32 1.442695, %v4581_v1 }
0x2252   :  { %v4817_v35 = vpop.permute.xlu1 %4816 }
0x2253   :  { %7407 = vpow2.f32 %v4584_v10 }
0x225d   :  { %v7408_v11 = vpop.eup %7407 }
0x225e   :  { %v4589_v15 = vsel %vm608_vm4, %v7408_v11, 0.0 }
0x225f   :  { %4590 = vadd.xlane.f32.xlu0 %v4589_v15 }
0x2263   :  { %4575 = vmax.xlane.f32.xlu0 %v4574_v38 }
0x22ec   :  { %v4591_v45 = vpop.xlane.xlu0 %4590 }
0x22ed   :  { %7409 = vrcp.f32 %v4591_v45 }
0x22f0   :  { %v4576_v7 = vpop.xlane.xlu0 %4575 }
0x22f1   :  { %v4580_v33 = vsub.f32 %v4572_v53, %v4576_v7 }
0x22f3   :  { %v4582_v9 = vmul.f32 1.442695, %v4580_v33 }
0x22f5   :  { %7411 = vpow2.f32 %v4582_v9 }
0x22f7   :  { %v7410_v19 = vpop.eup %7409 }
0x22f8   :  { %v4595_v42 = vmul.f32 %v7410_v19, %v7408_v11 }
0x22fa   :  { %6265 = vst.msk [vmem:[%s7684_s12 + $0x8] sm:$0xff] %vm608_vm4, %v4595_v42  ;;  %6997 = vmatmul.mubr.msk.f32.vlgmr.msra.gmra.mrb[52].mxu1 %vm608_vm4, %v4595_v42 }
0x22fb   :  { %7005 = vmatpush3.xpose.msk.msra.mxu1 %vm450_vm2, %v7939_v41  ;;  %7006 = vmatprep.mubr.msk.f32.mxu1 %vm7516_vm1, %v7515_v24 }
0x22fc   :  { %7014 = vmatprep.subr.mxu1 %v7515_v24 }
0x22fe   :  { %7007 = vmatmul.mubr.msk.f32.vlgmr.msra.gmra.mrb[54].mxu1 %vm450_vm2, %v4817_v35 }
0x22ff   :  { %v7412_v25 = vpop.eup %7411  ;;  %7015 = vmatpush3.msra.mxu1 %v7976_v30  ;;  %7016 = vmatprep.mubr.msk.f32.mxu1 %vm7516_vm1, %v7515_v24 }
0x2300   :  { %v4586_v48 = vsel %vm608_vm4, %v7412_v25, 0.0  ;;  %7033 = vmatprep.subr.mxu1 %v7515_v24 }
0x2301   :  { %4587 = vadd.xlane.f32.xlu0 %v4586_v48 }
0x2317   :  { %4742 = vrot.lane.b32.xlu0 %v8315_v56, %s7520_s13 }
0x238e   :  { %v4588_v41 = vpop.xlane.xlu0 %4587 }
0x238f   :  { %7413 = vrcp.f32 %v4588_v41 }
0x2392   :  { %v4743_v30 = vpop.permute.xlu0 %4742 }
0x2399   :  { %v7414_v16 = vpop.eup %7413 }
0x239a   :  { %v4594_v47 = vmul.f32 %v7414_v16, %v7412_v25 }
0x239c   :  { %6264 = vst.msk [vmem:[%s7684_s12] sm:$0xff] %vm608_vm4, %v4594_v47  ;;  %6992 = vmatmul.mubr.msk.f32.vlgmr.msra.gmra.mrb[38].mxu0 %vm608_vm4, %v4594_v47 }
0x239d   :  { %7000 = vmatpush3.xpose.msk.msra.mxu0 %vm450_vm2, %v7954_v46  ;;  %7001 = vmatprep.mubr.msk.f32.mxu0 %vm7516_vm1, %v7515_v24 }
0x239e   :  { %7009 = vmatprep.subr.mxu0 %v7515_v24 }
0x23a0   :  { %7002 = vmatmul.mubr.msk.f32.vlgmr.msra.gmra.mrb[40].mxu0 %vm450_vm2, %v4743_v30 }
0x23a1   :  { %7010 = vmatpush3.msra.mxu0 %v8019_v31  ;;  %7011 = vmatprep.mubr.msk.f32.mxu0 %vm7516_vm1, %v7515_v24 }
0x23a2   :  { %7222 = vmatprep.subr.bf16.mxu0 %v8037_v0 }
0x23cd   :  { %v8367_v27 = vpop.f32.mrb[52].mxu1 }
0x23ce   :  { %v6998_v22 = vpop.f32.mrb[53].mxu1 }
0x23d1   :  { %v4886_v43 = vpop.f32.mrb[54].mxu1 }
0x23d2   :  { %v4891_v46 = vmul.f32 0.25, %v4886_v43  ;;  %v7008_v3 = vpop.f32.mrb[55].mxu1 }
0x23d4   :  { %v4893_v29 = vsel %vm1586_vm6, %v4891_v46, -1e+09 }
0x23d5   :  { %v4897_v12 = vsel %vm608_vm4, %v4893_v29, -inf }
0x23d6   :  { %4898 = vmax.xlane.f32.xlu1 %v4897_v12 }
0x23e7   :  { %5226 = vrot.lane.b32.xlu1 %v8315_v56, %s7517_s0 }
0x2463   :  { %v4899_v31 = vpop.xlane.xlu1 %4898 }
0x2464   :  { %v4901_v55 = vsub.f32 %v4893_v29, %v4899_v31 }
0x2466   :  { %v4904_v20 = vmul.f32 1.442695, %v4901_v55 }
0x2467   :  { %v5227_v1 = vpop.permute.xlu1 %5226 }
0x2468   :  { %7415 = vpow2.f32 %v4904_v20 }
0x246f   :  { %v8374_v28 = vpop.f32.mrb[38].mxu0 }
0x2470   :  { %v6993_v32 = vpop.f32.mrb[39].mxu0 }
0x2472   :  { %v7416_v59 = vpop.eup %7415 }
0x2473   :  { %v4812_v57 = vpop.f32.mrb[40].mxu0  ;;  %v4909_v21 = vsel %vm608_vm4, %v7416_v59, 0.0 }
0x2474   :  { %v4890_v18 = vmul.f32 0.25, %v4812_v57  ;;  %4910 = vadd.xlane.f32.xlu0 %v4909_v21  ;;  %v7003_v63 = vpop.f32.mrb[41].mxu0 }
0x2476   :  { %v4892_v44 = vsel %vm1585_vm7, %v4890_v18, -1e+09 }
0x2477   :  { %v4894_v37 = vsel %vm608_vm4, %v4892_v44, -inf }
0x2478   :  { %4895 = vmax.xlane.f32.xlu1 %v4894_v37 }
0x248a   :  { %5300 = vrot.lane.b32.xlu0 %v8313_v23, %s7517_s0 }
0x2501   :  { %v4911_v10 = vpop.xlane.xlu0 %4910 }
0x2502   :  { %7417 = vrcp.f32 %v4911_v10 }
0x2505   :  { %v4896_v62 = vpop.xlane.xlu1 %4895 }
0x2506   :  { %v4900_v11 = vsub.f32 %v4892_v44, %v4896_v62 }
0x2508   :  { %v4902_v15 = vmul.f32 1.442695, %v4900_v11 }
0x250a   :  { %7419 = vpow2.f32 %v4902_v15 }
0x250c   :  { %v7418_v53 = vpop.eup %7417 }
0x250d   :  { %v4915_v38 = vmul.f32 %v7418_v53, %v7416_v59 }
0x250f   :  { %6267 = vst.msk [vmem:[%s7689_s17 + $0x8] sm:$0xff] %vm608_vm4, %v4915_v38  ;;  %7017 = vmatmul.mubr.msk.f32.vlgmr.msra.gmra.mrb[56].mxu1 %vm608_vm4, %v4915_v38 }
0x2510   :  { %7034 = vmatpush3.xpose.msk.msra.mxu1 %vm450_vm2, %v7988_v5  ;;  %7035 = vmatprep.mubr.msk.f32.mxu1 %vm7516_vm1, %v7515_v24  ;;  %v5301_v5 = vpop.permute.xlu0 %5300 }
0x2511   :  { %7038 = vmatprep.subr.mxu1 %v7515_v24 }
0x2513   :  { %7036 = vmatmul.mubr.msk.f32.vlgmr.msra.gmra.mrb[58].mxu1 %vm450_vm2, %v5227_v1 }
0x2514   :  { %v7420_v45 = vpop.eup %7419  ;;  %7039 = vmatpush3.xpose.msk.msra.mxu1 %vm450_vm2, %v7997_v17  ;;  %7040 = vmatprep.mubr.msk.f32.mxu1 %vm7516_vm1, %v7515_v24 }
0x2515   :  { %7048 = vmatprep.subr.mxu1 %v7515_v24  ;;  %v4906_v7 = vsel %vm608_vm4, %v7420_v45, 0.0 }
0x2516   :  { %4907 = vadd.xlane.f32.xlu0 %v4906_v7 }
0x2517   :  { %7041 = vmatmul.mubr.msk.f32.vlgmr.msra.gmra.mrb[60].mxu1 %vm450_vm2, %v5301_v5 }
0x2518   :  { %7049 = vmatpush3.msra.mxu1 %v8022_v36  ;;  %7050 = vmatprep.mubr.msk.f32.mxu1 %vm7516_vm1, %v7515_v24 }
0x2519   :  { %7058 = vmatprep.subr.mxu1 %v7515_v24 }
0x25a3   :  { %v4908_v33 = vpop.xlane.xlu0 %4907 }
0x25a4   :  { %7421 = vrcp.f32 %v4908_v33 }
0x25ae   :  { %v7422_v17 = vpop.eup %7421 }
0x25af   :  { %v4914_v9 = vmul.f32 %v7422_v17, %v7420_v45 }
0x25b1   :  { %6266 = vst.msk [vmem:[%s7689_s17] sm:$0xff] %vm608_vm4, %v4914_v9  ;;  %7012 = vmatmul.mubr.msk.f32.vlgmr.msra.gmra.mrb[42].mxu0 %vm608_vm4, %v4914_v9  ;;  %s7523_s17 = smov [#allocation2]  }
0x25b2   :  { %7224 = vmatpush3.bf16.msra.mxu0 %v8037_v0  ;;  %s6273_s29 = sshll.u32 %s7523_s17, 4  ;;  %s6274_s29 = int_to_ptr.vmem [resolvable:$true] %s6273_s29 }
0x25b3   :  { %7226 = vmatprep.subr.bf16.mxu0 %v8043_v8  ;;  %s7460_s8 = scalar_lea.vmem %s6274_s29, 256  ;;  %p7465_p1 = scmp.lt.s32.totalorder %s6274_s29, %s6274_s29 }
0x25b4   :  { %p7461_p0 = scmp.ne.s32.totalorder %s6274_s29, %s7460_s8  ;;  %p7466_p2 = scmp.lt.s32.totalorder %s7460_s8, %s7460_s8 }
0x25b6   :  { %p7467_p3 = por %p7466_p2, %p7465_p1 }
0x25b8   :  { %p7468_p4 = pnand %p7467_p3, %p7461_p0 }
0x25e2   :  { %v5058_v19 = vpop.f32.mrb[56].mxu1 }
0x25e3   :  { %v7018_v42 = vpop.f32.mrb[57].mxu1 }
0x25e6   :  { %v5296_v36 = vpop.f32.mrb[58].mxu1 }
0x25e7   :  { %v5374_v35 = vmul.f32 0.25, %v5296_v36  ;;  %v7037_v25 = vpop.f32.mrb[59].mxu1 }
0x25e9   :  { %v5376_v48 = vsel %vm1585_vm7, %v5374_v35, -1e+09 }
0x25ea   :  { %v5370_v41 = vpop.f32.mrb[60].mxu1  ;;  %v5378_v16 = vsel %vm608_vm4, %v5376_v48, -inf }
0x25eb   :  { %v5375_v47 = vmul.f32 0.25, %v5370_v41  ;;  %v7042_v30 = vpop.f32.mrb[61].mxu1  ;;  %5379 = vmax.xlane.f32.xlu1 %v5378_v16 }
0x25ed   :  { %v5377_v22 = vsel %vm1586_vm6, %v5375_v47, -1e+09 }
0x25ee   :  { %v5381_v0 = vsel %vm608_vm4, %v5377_v22, -inf }
0x25ef   :  { %5382 = vmax.xlane.f32.xlu1 %v5381_v0 }
0x2678   :  { %v5380_v43 = vpop.xlane.xlu1 %5379 }
0x2679   :  { %v5384_v46 = vsub.f32 %v5376_v48, %v5380_v43 }
0x267b   :  { %v5386_v3 = vmul.f32 1.442695, %v5384_v46 }
0x267c   :  { %v5383_v29 = vpop.xlane.xlu1 %5382 }
0x267d   :  { %7423 = vpow2.f32 %v5386_v3  ;;  %v5385_v12 = vsub.f32 %v5377_v22, %v5383_v29 }
0x267f   :  { %v5388_v31 = vmul.f32 1.442695, %v5385_v12 }
0x2681   :  { %7425 = vpow2.f32 %v5388_v31 }
0x2684   :  { %v4985_v55 = vpop.f32.mrb[42].mxu0 }
0x2685   :  { %v7013_v20 = vpop.f32.mrb[43].mxu0  ;;  %7023 = vmatprep.mubr.msk.f32.mxu0 %vm450_vm2, %v4985_v55 }
0x2686   :  { %7024 = vmatmul.mubr.msk.f32.vlgmr.msra.gmra.mrb[44].mxu0 %vm450_vm2, %v5058_v19 }
0x2687   :  { %v7424_v32 = vpop.eup %7423  ;;  %7030 = vmatprep.mubr.msk.f32.mxu0 %vm450_vm2, %v8374_v28  ;;  %7228 = vmatpush3.bf16.msra.mxu0 %v8043_v8 }
0x2688   :  { %v5390_v59 = vsel %vm608_vm4, %v7424_v32, 0.0  ;;  %7043 = vmatprep.subr.mxu0 %v7515_v24 }
0x2689   :  { %5391 = vadd.xlane.f32.xlu1 %v5390_v59 }
0x268b   :  { %v7426_v57 = vpop.eup %7425 }
0x268c   :  { %v5393_v21 = vsel %vm608_vm4, %v7426_v57, 0.0 }
0x268d   :  { %5394 = vadd.xlane.f32.xlu0 %v5393_v21 }
0x268e   :  { %7031 = vmatmul.mubr.msk.f32.vlgmr.msra.gmra.mrb[44].mxu0 %vm450_vm2, %v8367_v27 }
0x268f   :  { %7044 = vmatpush3.msra.mxu0 %v8056_v34  ;;  %7045 = vmatprep.mubr.msk.f32.mxu0 %vm7516_vm1, %v7515_v24 }
0x2690   :  { %7053 = vmatprep.subr.mxu0 %v7515_v24 }
0x269a   :  { %5546 = vrot.lane.b32.xlu1 %v8315_v56, %s7519_s9 }
0x26a3   :  { %5620 = vrot.lane.b32.xlu0 %v8313_v23, %s7519_s9 }
0x2716   :  { %v5392_v8 = vpop.xlane.xlu1 %5391 }
0x2717   :  { %7427 = vrcp.f32 %v5392_v8 }
0x271a   :  { %v5395_v28 = vpop.xlane.xlu0 %5394  ;;  %v5547_v56 = vpop.permute.xlu1 %5546 }
0x271b   :  { %7429 = vrcp.f32 %v5395_v28 }
0x2721   :  { %v7428_v18 = vpop.eup %7427 }
0x2722   :  { %v5398_v63 = vmul.f32 %v7428_v18, %v7424_v32 }
0x2724   :  { %7046 = vmatmul.mubr.msk.f32.vlgmr.msra.gmra.mrb[46].mxu0 %vm608_vm4, %v5398_v63 }
0x2725   :  { %v7430_v34 = vpop.eup %7429  ;;  %7054 = vmatpush3.xpose.msk.msra.mxu0 %vm450_vm2, %v8064_v60  ;;  %7055 = vmatprep.mubr.msk.f32.mxu0 %vm7516_vm1, %v7515_v24  ;;  %v5621_v60 = vpop.permute.xlu0 %5620 }
0x2726   :  { %v5399_v27 = vmul.f32 %v7430_v34, %v7426_v57  ;;  %7063 = vmatprep.subr.mxu0 %v7515_v24 }
0x2728   :  { %7051 = vmatmul.mubr.msk.f32.vlgmr.msra.gmra.mrb[62].mxu1 %vm608_vm4, %v5399_v27  ;;  %7056 = vmatmul.mubr.msk.f32.vlgmr.msra.gmra.mrb[48].mxu0 %vm450_vm2, %v5547_v56 }
0x2729   :  { %7059 = vmatpush3.xpose.msk.msra.mxu1 %vm450_vm2, %v8066_v26  ;;  %7064 = vmatpush3.msra.mxu0 %v8094_v14 }
0x272a   :  { %7060 = vmatprep.mubr.msk.f32.mxu1 %vm7516_vm1, %v7515_v24  ;;  %7068 = vmatprep.subr.mxu1 %v7515_v24 }
0x272b   :  { %7065 = vmatprep.mubr.msk.f32.mxu0 %vm7516_vm1, %v7515_v24  ;;  %7230 = vmatprep.subr.bf16.mxu0 %v8108_v40 }
0x272c   :  { %7061 = vmatmul.mubr.msk.f32.vlgmr.msra.gmra.mrb[64].mxu1 %vm450_vm2, %v5621_v60 }
0x272d   :  { %7069 = vmatpush3.msra.mxu1 %v8101_v51  ;;  %7070 = vmatprep.mubr.msk.f32.mxu1 %vm7516_vm1, %v7515_v24 }
0x272e   :  { %7238 = vmatprep.subr.bf16.mxu1 %v8132_v39 }
0x27f7   :  { %v5469_v26 = vpop.f32.mrb[46].mxu0 }
0x27f8   :  { %v7047_v14 = vpop.f32.mrb[47].mxu0 }
0x27fb   :  { %v5542_v23 = vpop.f32.mrb[62].mxu1  ;;  %v5616_v44 = vpop.f32.mrb[48].mxu0 }
0x27fc   :  { %v5694_v37 = vmul.f32 0.25, %v5616_v44  ;;  %v7052_v1 = vpop.f32.mrb[63].mxu1  ;;  %v7057_v10 = vpop.f32.mrb[49].mxu0  ;;  %v7454_v44 = vld [vmem:[%s8545_s28] ss:$0 sm:$0xff] }
0x27fd   :  { %v7455_v10 = vld [vmem:[%s8546_s1] ss:$0 sm:$0xff] }
0x27fe   :  { %v5696_v62 = vsel %vm1585_vm7, %v5694_v37, -1e+09 }
0x27ff   :  { %v5690_v11 = vpop.f32.mrb[64].mxu1  ;;  %v5698_v15 = vsel %vm608_vm4, %v5696_v62, -inf }
0x2800   :  { %v5695_v53 = vmul.f32 0.25, %v5690_v11  ;;  %v7062_v51 = vpop.f32.mrb[65].mxu1  ;;  %5699 = vmax.xlane.f32.xlu1 %v5698_v15 }
0x2802   :  { %v5697_v24 = vsel %vm1586_vm6, %v5695_v53, -1e+09  ;;  %v7456_v53 = vld [vmem:[%s8547_s2] ss:$0 sm:$0xff] }
0x2803   :  { %v5701_v38 = vsel %vm608_vm4, %v5697_v24, -inf }
0x2804   :  { %5702 = vmax.xlane.f32.xlu0 %v5701_v38 }
0x288d   :  { %v5700_v45 = vpop.xlane.xlu1 %5699 }
0x288e   :  { %v5704_v7 = vsub.f32 %v5696_v62, %v5700_v45 }
0x2890   :  { %v5706_v5 = vmul.f32 1.442695, %v5704_v7 }
0x2891   :  { %v5703_v33 = vpop.xlane.xlu0 %5702 }
0x2892   :  { %7431 = vpow2.f32 %v5706_v5  ;;  %v5705_v17 = vsub.f32 %v5697_v24, %v5703_v33  ;;  %v7457_v33 = vld [vmem:[%s7674_s19] ss:$0 sm:$0xff] }
0x2894   :  { %v5708_v13 = vmul.f32 1.442695, %v5705_v17 }
0x2896   :  { %7433 = vpow2.f32 %v5708_v13 }
0x289c   :  { %v7432_v9 = vpop.eup %7431 }
0x289d   :  { %v5710_v19 = vsel %vm608_vm4, %v7432_v9, 0.0 }
0x289e   :  { %5711 = vadd.xlane.f32.xlu1 %v5710_v19 }
0x28a0   :  { %v7434_v42 = vpop.eup %7433 }
0x28a1   :  { %v5713_v36 = vsel %vm608_vm4, %v7434_v42, 0.0 }
0x28a2   :  { %5714 = vadd.xlane.f32.xlu0 %v5713_v36 }
0x292b   :  { %v5712_v2 = vpop.xlane.xlu1 %5711 }
0x292c   :  { %7435 = vrcp.f32 %v5712_v2 }
0x292f   :  { %v5715_v35 = vpop.xlane.xlu0 %5714 }
0x2930   :  { %7437 = vrcp.f32 %v5715_v35 }
0x2936   :  { %v7436_v25 = vpop.eup %7435 }
0x2937   :  { %v5718_v48 = vmul.f32 %v7436_v25, %v7432_v9 }
0x2939   :  { %7066 = vmatmul.mubr.msk.f32.vlgmr.msra.gmra.mrb[50].mxu0 %vm608_vm4, %v5718_v48 }
0x293a   :  { %v7438_v41 = vpop.eup %7437  ;;  %7232 = vmatpush3.bf16.msra.mxu0 %v8108_v40  ;;  %v7452_v40 = vld [vmem:[%s8541_s6] ss:$0 sm:$0xff] }
0x293b   :  { %v5719_v16 = vmul.f32 %v7438_v41, %v7434_v42  ;;  %7234 = vmatprep.subr.bf16.mxu0 %v8114_v49 }
0x293d   :  { %7071 = vmatmul.mubr.msk.f32.vlgmr.msra.gmra.mrb[66].mxu1 %vm608_vm4, %v5719_v16 }
0x293e   :  { %7240 = vmatpush3.bf16.msra.mxu1 %v8132_v39 }
0x293f   :  { %7242 = vmatprep.subr.bf16.mxu1 %v8137_v52 }
0x2942   :  { %7244 = vmatpush3.bf16.msra.mxu1 %v8137_v52 }
0x2a0c   :  { %v5789_v47 = vpop.f32.mrb[50].mxu0 }
0x2a0d   :  { %v7067_v30 = vpop.f32.mrb[51].mxu0  ;;  %7077 = vmatprep.mubr.msk.f32.mxu0 %vm450_vm2, %v5789_v47 }
0x2a10   :  { %v5862_v22 = vpop.f32.mrb[66].mxu1 }
0x2a11   :  { %v7072_v0 = vpop.f32.mrb[67].mxu1  ;;  %7078 = vmatmul.mubr.msk.f32.vlgmr.msra.gmra.mrb[44].mxu0 %vm450_vm2, %v5862_v22 }
0x2a12   :  { %7236 = vmatpush3.bf16.msra.mxu0 %v8114_v49  ;;  %7084 = vmatprep.mubr.msk.f32.mxu0 %vm450_vm2, %v5469_v26  ;;  %v7453_v49 = vld [vmem:[%s8542_s22] ss:$0 sm:$0xff] }
0x2a13   :  { %7246 = vmatprep.subr.bf16.mxu0 %v8146_v58  ;;  %v7267_v39 = vadd.f32 %v7453_v49, %v7452_v40 }
0x2a19   :  { %7085 = vmatmul.mubr.msk.f32.vlgmr.msra.gmra.mrb[44].mxu0 %vm450_vm2, %v5542_v23 }
0x2a1a   :  { %7248 = vmatpush3.bf16.msra.mxu0 %v8146_v58 }
0x2a1b   :  { %7250 = vmatprep.subr.bf16.mxu0 %v8149_v61 }
0x2a1e   :  { %7252 = vmatpush3.bf16.msra.mxu0 %v8149_v61 }
0x2a1f   :  { %7254 = vmatprep.subr.bf16.mxu0 %v8156_v4 }
0x2a22   :  { %7256 = vmatpush3.bf16.msra.mxu0 %v8156_v4 }
0x2a23   :  { %7258 = vmatprep.subr.bf16.mxu0 %v8171_v50 }
0x2a26   :  { %7260 = vmatpush3.bf16.msra.mxu0 %v8171_v50 }
0x2aec   :  { %v7086_v52 = vpop.f32.mrb[44].mxu0 }
0x2aed   :  { %v7266_v43 = vadd.f32 %v7267_v39, %v7086_v52  ;;  %v6019_v46 = vpop.f32.mrb[45].mxu0 }
0x2aee   :  { %v7268_v3 = vadd.f32 %v7267_v39, %v6019_v46 }
0x2aef   :  { %v6033_v58 = vmul.f32 0.5, %v7266_v43 }
0x2af0   :  { %v6032_v29 = vmul.f32 0.5, %v7268_v3 }
0x2af1   :  { %v6035_v12 = vadd.f32 %v6033_v58, %v8301_v6 }
0x2af2   :  { %v6034_v61 = vadd.f32 %v6032_v29, %v8299_v54 }
0x2af3   :  { %v6039_v31 = vsel %vm143_vm0, %v6035_v12, 0.0 }
0x2af4   :  { %6040 = vadd.xlane.f32.xlu0 %v6039_v31  ;;  %v6036_v4 = vsel %vm143_vm0, %v6034_v61, 0.0  ;;  %v7458_v31 = vld [vmem:[%s8548_s7] ss:$0 sm:$0xff] }
0x2af5   :  { %6037 = vadd.xlane.f32.xlu1 %v6036_v4 }
0x2b81   :  { %v6041_v50 = vpop.xlane.xlu0 %6040 }
0x2b82   :  { %v6043_v55 = vmul.f32 0.03125, %v6041_v50  ;;  %v6038_v20 = vpop.xlane.xlu1 %6037 }
0x2b83   :  { %v6042_v32 = vmul.f32 0.03125, %v6038_v20 }
0x2b84   :  { %v6045_v59 = vsub.f32 %v6035_v12, %v6043_v55  ;;  %v7459_v55 = vld [vmem:[%s8549_s10] ss:$0 sm:$0xff] }
0x2b85   :  { %v6044_v57 = vsub.f32 %v6034_v61, %v6042_v32 }
0x2b86   :  { %v6047_v21 = vmul.f32 %v6045_v59, %v6045_v59 }
0x2b87   :  { %v6046_v8 = vmul.f32 %v6044_v57, %v6044_v57 }
0x2b88   :  { %v6051_v28 = vsel %vm143_vm0, %v6047_v21, 0.0 }
0x2b89   :  { %6052 = vadd.xlane.f32.xlu0 %v6051_v28  ;;  %v6048_v54 = vsel %vm143_vm0, %v6046_v8, 0.0 }
0x2b8a   :  { %6049 = vadd.xlane.f32.xlu1 %v6048_v54 }
0x2c16   :  { %v6053_v6 = vpop.xlane.xlu0 %6052 }
0x2c17   :  { %v6055_v18 = vmul.f32 0.03125, %v6053_v6  ;;  %v6050_v63 = vpop.xlane.xlu1 %6049 }
0x2c18   :  { %v6054_v34 = vmul.f32 0.03125, %v6050_v63 }
0x2c19   :  { %v6057_v27 = vadd.f32 1e-05, %v6055_v18 }
0x2c1a   :  { %v6056_v56 = vadd.f32 1e-05, %v6054_v34 }
0x2c1b   :  { %7439 = vrsqrt.f32 %v6057_v27 }
0x2c1c   :  { %7441 = vrsqrt.f32 %v6056_v56 }
0x2c25   :  { %v7440_v60 = vpop.eup %7439 }
0x2c26   :  { %v7442_v26 = vpop.eup %7441  ;;  %v6061_v14 = vmul.f32 %v7440_v60, %v6045_v59 }
0x2c27   :  { %v6060_v23 = vmul.f32 %v7442_v26, %v6044_v57 }
0x2c28   :  { %v6063_v37 = vmul.f32 %v7454_v44, %v6061_v14 }
0x2c29   :  { %v6062_v1 = vmul.f32 %v7454_v44, %v6060_v23 }
0x2c2a   :  { %v6065_v11 = vadd.f32 %v7455_v10, %v6063_v37 }
0x2c2b   :  { %v6064_v62 = vadd.f32 %v7455_v10, %v6062_v1 }
0x2c2d   :  { %7095 = vmatprep.mubr.msk.f32.mxu1 %vm143_vm0, %v6064_v62 }
0x2c2e   :  { %7096 = vmatmul.mubr.msk.f32.vlgmr.msra.gmra.mrb[68].mxu1 %vm143_vm0, %v6065_v11 }
0x2d01   :  { %v7097_v15 = vpop.f32.mrb[68].mxu1 }
0x2d02   :  { %v6144_v51 = vadd.f32 %v7456_v53, %v7097_v15  ;;  %v6138_v24 = vpop.f32.mrb[69].mxu1 }
0x2d03   :  { %v6139_v38 = vadd.f32 %v7456_v53, %v6138_v24 }
0x2d04   :  { %v6148_v7 = vmax.f32 %v6144_v51, 0.0 }
0x2d05   :  { %v6147_v45 = vmax.f32 %v6139_v38, 0.0 }
0x2d07   :  { %7114 = vmatprep.mubr.msk.f32.mxu0 %vm3272_vm8, %v6147_v45 }
0x2d08   :  { %7115 = vmatmul.mubr.msk.f32.vlgmr.msra.gmra.mrb[52].mxu0 %vm3272_vm8, %v6148_v7 }
0x2ddb   :  { %v7116_v5 = vpop.f32.mrb[52].mxu0 }
0x2ddc   :  { %v6227_v17 = vadd.f32 %v7457_v33, %v7116_v5  ;;  %v6221_v13 = vpop.f32.mrb[53].mxu0 }
0x2ddd   :  { %v6222_v9 = vadd.f32 %v7457_v33, %v6221_v13 }
0x2dde   :  { %v6231_v19 = vadd.f32 %v6227_v17, %v6065_v11 }
0x2ddf   :  { %v6230_v42 = vadd.f32 %v6222_v9, %v6064_v62 }
0x2de0   :  { %v6235_v36 = vsel %vm143_vm0, %v6231_v19, 0.0 }
0x2de1   :  { %6236 = vadd.xlane.f32.xlu0 %v6235_v36  ;;  %v6232_v2 = vsel %vm143_vm0, %v6230_v42, 0.0 }
0x2de2   :  { %6233 = vadd.xlane.f32.xlu1 %v6232_v2 }
0x2e6e   :  { %v6237_v35 = vpop.xlane.xlu0 %6236 }
0x2e6f   :  { %v6239_v25 = vmul.f32 0.03125, %v6237_v35  ;;  %v6234_v48 = vpop.xlane.xlu1 %6233 }
0x2e70   :  { %v6238_v41 = vmul.f32 0.03125, %v6234_v48 }
0x2e71   :  { %v6241_v16 = vsub.f32 %v6231_v19, %v6239_v25 }
0x2e72   :  { %v6240_v47 = vsub.f32 %v6230_v42, %v6238_v41 }
0x2e73   :  { %v6243_v30 = vmul.f32 %v6241_v16, %v6241_v16 }
0x2e74   :  { %v6242_v22 = vmul.f32 %v6240_v47, %v6240_v47 }
0x2e75   :  { %v6247_v0 = vsel %vm143_vm0, %v6243_v30, 0.0 }
0x2e76   :  { %6248 = vadd.xlane.f32.xlu0 %v6247_v0  ;;  %v6244_v40 = vsel %vm143_vm0, %v6242_v22, 0.0 }
0x2e77   :  { %6245 = vadd.xlane.f32.xlu1 %v6244_v40 }
0x2f03   :  { %v6249_v49 = vpop.xlane.xlu0 %6248 }
0x2f04   :  { %v6251_v39 = vmul.f32 0.03125, %v6249_v49  ;;  %v6246_v52 = vpop.xlane.xlu1 %6245 }
0x2f05   :  { %v6250_v43 = vmul.f32 0.03125, %v6246_v52 }
0x2f06   :  { %v6253_v46 = vadd.f32 1e-05, %v6251_v39 }
0x2f07   :  { %v6252_v3 = vadd.f32 1e-05, %v6250_v43 }
0x2f08   :  { %7443 = vrsqrt.f32 %v6253_v46 }
0x2f09   :  { %7445 = vrsqrt.f32 %v6252_v3 }
0x2f12   :  { %v7444_v58 = vpop.eup %7443 }
0x2f13   :  { %v7446_v29 = vpop.eup %7445  ;;  %v6257_v12 = vmul.f32 %v7444_v58, %v6241_v16 }
0x2f14   :  { %v6256_v61 = vmul.f32 %v7446_v29, %v6240_v47 }
0x2f15   :  { %v6259_v4 = vmul.f32 %v7458_v31, %v6257_v12 }
0x2f16   :  { %v6258_v50 = vmul.f32 %v7458_v31, %v6256_v61 }
0x2f17   :  { %v6261_v20 = vadd.f32 %v7459_v55, %v6259_v4 }
0x2f18   :  { %v6260_v32 = vadd.f32 %v7459_v55, %v6258_v50 }
0x2f19   :  { %6263 = vst.msk [vmem:[#allocation2 + $0x8] sm:$0xff] %vm143_vm0, %v6261_v20 }
0x2f1a   :  { %6262 = vst.msk [vmem:[#allocation2] sm:$0xff] %vm143_vm0, %v6260_v32 }
0x2f1b   :  { %7471 = shalt.err (!%p7468_p4)
}
0x2f1c   :  { %s7472_s19 = scalar_lea.hbm %s7679_s4, 256 }
0x2f1d   :  { %p7473_p5 = scmp.ne.s32.totalorder %s7679_s4, %s7472_s19  ;;  %p7476_p6 = scmp.lt.u32.totalorder %s7472_s19, %s7679_s4 }
0x2f1f   :  { %p7478_p7 = pnand %p7476_p6, %p7473_p5 }
0x2f21   :  { %7481 = shalt.err (!%p7478_p7)
}
0x2f22   :  { %s7524_s12 = smov 128   ;;  %s7525_s20 = smov 8  }
0x2f23   :  { %6279 = dma.vmem_to_hbm [thread:$0]  %s6274_s29, 256, %s7679_s4, [#allocation3], %s7524_s12, %s7524_s12, %s7525_s20  }
0x2f24   :  { %7482 = dma.done.wait [#allocation3], 256  }
0x2f25   :  { %7483 = vsyncadd [#allocation3], 4294967040 }
0x2f26   :  { %6291 = vsyncpa [#allocation3], 1 }

</bundles_post_ra>
